<compile_context>
chip_gen: v7x
topology: tpu7x:2x2x1
jax: 0.10.0
libtpu: 0.0.40
codegen_flags: <defaults>
</compile_context>

<pallas_src>
import math

import jax
import jax.numpy as jnp
from jax.experimental import pallas as pl
from jax.experimental.pallas import tpu as pltpu

_LANE = 128


def _logistic_kernel(x_ref, w_ref, b_ref, o_ref):
    # x_ref: (tm, D)  w_ref: (D, O_pad)  b_ref: (1, O_pad)  o_ref: (tm, O_pad)
    acc = jnp.dot(
        x_ref[...],
        w_ref[...],
        preferred_element_type=jnp.float32,
        precision=jax.lax.Precision.HIGHEST,
    )
    o_ref[...] = (acc + b_ref[...]).astype(o_ref.dtype)


def _round_up(x, m):
    return ((x + m - 1) // m) * m


def mnist_logistic_forward(x, w_padded, b_padded, *, out_features,
                           batch_tile=512, pad_output=False):
    """x: (B, D) unpadded; w_padded: (D, O_pad); b_padded: (1, O_pad)."""
    B, D = x.shape
    Dw, O_pad = w_padded.shape
    assert D == Dw, (D, Dw)
    assert O_pad % _LANE == 0

    # Sublane packing: 8 rows/vreg for 4-byte dtypes, 16 for 2-byte, 32 for 1-byte.
    sub = {4: 8, 2: 16, 1: 32}.get(jnp.dtype(x.dtype).itemsize, 8)
    if B <= batch_tile:
        tm = B                               # full batch dim -> always a legal block
    else:
        tm = _round_up(batch_tile, sub)      # aligned tile; last tile may be partial
    n_steps = pl.cdiv(B, tm)

    itemsize = jnp.dtype(x.dtype).itemsize
    cost = pl.CostEstimate(
        flops=2 * B * D * O_pad,
        transcendentals=0,
        bytes_accessed=(x.size * itemsize
                        + n_steps * w_padded.size * jnp.dtype(w_padded.dtype).itemsize
                        + b_padded.size * jnp.dtype(b_padded.dtype).itemsize
                        + B * O_pad * itemsize),
    )

    out_p = pl.pallas_call(
        _logistic_kernel,
        out_shape=jax.ShapeDtypeStruct((B, O_pad), x.dtype),
        grid_spec=pltpu.PrefetchScalarGridSpec(
            num_scalar_prefetch=0,
            grid=(n_steps,),
            in_specs=[
                # x: no wrapper-side zero-pad; 784 == full array dim, Mosaic pads
                # the lane remainder inside VMEM and masks it for the matmul.
                pl.BlockSpec((tm, D), lambda i: (i, 0)),
                pl.BlockSpec((D, O_pad), lambda i: (0, 0)),   # full pre-padded weights
                pl.BlockSpec((1, O_pad), lambda i: (0, 0)),   # bias row
            ],
            out_specs=pl.BlockSpec((tm, O_pad), lambda i: (i, 0)),
        ),
        compiler_params=pltpu.CompilerParams(
            dimension_semantics=("parallel",),  # batch axis shards across TCs (v7x)
        ),
        cost_estimate=cost,
    )(x, w_padded, b_padded)

    if pad_output:
        # (B, 128) lane-dense output; let the consumer fuse the 10-column slice.
        return out_p
    # NOTE: this slice is a real strided HBM copy (10 of 128 lanes), not metadata.
    # Kept only to match the nn.Linear(784, 10) output contract.
    return out_p[:, :out_features]


class PallasMnistLogistic:
    """JAX/Pallas equivalent of the PyTorch Mnist_Logistic module."""

    def __init__(self, key, in_features=784, out_features=10,
                 dtype=jnp.float32, compute_dtype=None):
        # Match nn.Linear's default init: U(-1/sqrt(fan_in), 1/sqrt(fan_in)).
        k_w, k_b = jax.random.split(key)
        bound = 1.0 / math.sqrt(in_features)
        self.weight = jax.random.uniform(
            k_w, (out_features, in_features), dtype, -bound, bound)
        self.bias = jax.random.uniform(
            k_b, (out_features,), dtype, -bound, bound)
        self.out_features = out_features

        # compute_dtype=jnp.bfloat16 halves HBM traffic on v6e/v7x (f32 accumulate
        # is kept inside the kernel); default stays f32 for bit-tight accuracy.
        cdt = dtype if compute_dtype is None else compute_dtype
        self.compute_dtype = cdt

        # Hoisted out of the per-call path: transpose + output-dim zero-pad
        # happen exactly once here, not on every forward.
        o_pad = _round_up(max(out_features, _LANE), _LANE)   # 10 -> 128
        self.w_padded = (
            jnp.zeros((in_features, o_pad), cdt)
            .at[:, :out_features].set(self.weight.T.astype(cdt)))
        self.b_padded = (
            jnp.zeros((1, o_pad), cdt)
            .at[0, :out_features].set(self.bias.astype(cdt)))

    def __call__(self, xb, *, pad_output=False):
        return mnist_logistic_forward(
            xb.astype(self.compute_dtype), self.w_padded, self.b_padded,
            out_features=self.out_features, pad_output=pad_output)


if __name__ == "__main__":
    key = jax.random.PRNGKey(0)
    k_x, k_m = jax.random.split(key)

    bs, in_features, out_features = 64, 784, 10   # shapes from the source script
    x = jax.random.normal(k_x, (bs, in_features), dtype=jnp.float32)

    model = PallasMnistLogistic(k_m, in_features, out_features)

    y = jax.block_until_ready(model(x))

    # Reference: xb @ W.T + b at highest precision.
    y_ref = (
        jnp.dot(x, model.weight.T, precision=jax.lax.Precision.HIGHEST)
        + model.bias
    )

    assert y.shape == (bs, out_features), y.shape
    assert y.dtype == x.dtype
    assert jnp.allclose(y, y_ref, rtol=1e-3, atol=1e-3), float(
        jnp.max(jnp.abs(y - y_ref)))

    print("KERNEL_OK")
</pallas_src>

<mosaic_0001>
module attributes {stable_mosaic.version = 11 : i64} {
  func.func @_logistic_kernel(%arg0: i32, %arg1: memref<64x784xf32, #tpu.memory_space<vmem>>, %arg2: memref<784x128xf32, #tpu.memory_space<vmem>>, %arg3: memref<1x128xf32, #tpu.memory_space<vmem>>, %arg4: memref<64x128xf32, #tpu.memory_space<vmem>>) attributes {dimension_semantics = [#tpu.dimension_semantics<parallel>], iteration_bounds = array<i64: 1>, scalar_prefetch = 0 : i64, scratch_operands = 0 : i64, tpu.core_type = #tpu.core_type<tc>, window_params = [{transform_indices = @transform_0, window_bounds = array<i64: 64, 784>}, {pipeline_mode = #tpu.pipeline_mode<synchronous>, transform_indices = @transform_1, window_bounds = array<i64: 784, 128>}, {pipeline_mode = #tpu.pipeline_mode<synchronous>, transform_indices = @transform_2, window_bounds = array<i64: 1, 128>}, {transform_indices = @transform_3, window_bounds = array<i64: 64, 128>}]} {
    %c0 = arith.constant 0 : index
    %c0_0 = arith.constant 0 : index
    %0 = vector.load %arg1[%c0, %c0_0] : memref<64x784xf32, #tpu.memory_space<vmem>>, vector<64x784xf32>
    %c0_1 = arith.constant 0 : index
    %c0_2 = arith.constant 0 : index
    %1 = vector.load %arg2[%c0_1, %c0_2] : memref<784x128xf32, #tpu.memory_space<vmem>>, vector<784x128xf32>
    %cst = arith.constant dense<0.000000e+00> : vector<64x128xf32>
    %2 = tpu.matmul %0, %1, %cst {dimension_numbers = #tpu.dot_dimension_numbers<[1], [0], [0], [1], [0, 0, 1, 1], [], []>, precision = #tpu.contract_precision<fp32>} : vector<64x784xf32>, vector<784x128xf32>, vector<64x128xf32> -> vector<64x128xf32>
    %c0_3 = arith.constant 0 : index
    %c0_4 = arith.constant 0 : index
    %3 = vector.load %arg3[%c0_3, %c0_4] : memref<1x128xf32, #tpu.memory_space<vmem>>, vector<1x128xf32>
    %4 = vector.broadcast %3 : vector<1x128xf32> to vector<64x128xf32>
    %5 = arith.addf %2, %4 : vector<64x128xf32>
    %c0_5 = arith.constant 0 : index
    %c0_6 = arith.constant 0 : index
    %6 = vector.load %arg4[%c0_5, %c0_6] : memref<64x128xf32, #tpu.memory_space<vmem>>, vector<64x128xf32>
    tpu.vector_store %arg4[%c0_5, %c0_6], %5 {strides = array<i32>} : memref<64x128xf32, #tpu.memory_space<vmem>>, vector<64x128xf32>,
    return
  }
  func.func @transform_0(%arg0: i32) -> (i32, i32) {
    %c0_i32 = arith.constant 0 : i32
    %c0_i32_0 = arith.constant 0 : i32
    return %arg0, %c0_i32 : i32, i32
  }
  func.func @transform_1(%arg0: i32) -> (i32, i32) {
    %c0_i32 = arith.constant 0 : i32
    %c0_i32_0 = arith.constant 0 : i32
    %c0_i32_1 = arith.constant 0 : i32
    return %c0_i32, %c0_i32_0 : i32, i32
  }
  func.func @transform_2(%arg0: i32) -> (i32, i32) {
    %c0_i32 = arith.constant 0 : i32
    %c0_i32_0 = arith.constant 0 : i32
    %c0_i32_1 = arith.constant 0 : i32
    return %c0_i32, %c0_i32_0 : i32, i32
  }
  func.func @transform_3(%arg0: i32) -> (i32, i32) {
    %c0_i32 = arith.constant 0 : i32
    %c0_i32_0 = arith.constant 0 : i32
    return %arg0, %c0_i32 : i32, i32
  }
}

</mosaic_0001>

<bundles_post_ra>
// kernel: tpu_custom_call.1
= control target key start
LH: loop header
LB: loop body
LE: loop exit
PB: predicated region body
PF: predicated region fallthrough
CT: control target
= control target key end

     0   :  { %8 = vsyncpa [#allocation3], 0  ;;  %s9230_s0 = inlined_call_operand.hbm [shape: f32[64,784], index: 0, kind: input, shape index: {}]   ;;  %s9231_s1 = inlined_call_operand.hbm [shape: f32[784,128], index: 1, kind: input, shape index: {}]   ;;  %s9232_s2 = inlined_call_operand.vmem [shape: f32[1,128], index: 2, kind: input, shape index: {}]   ;;  %s9233_s3 = inlined_call_operand.hbm [shape: f32[64,128], index: 3, kind: output, shape index: {}]  }
   0x1   :  { %9 = vsyncpa [#allocation6], 0 }
   0x2   :  { %10 = vsyncpa [#allocation4], 0  ;;  %s6669_s12 = smov [#allocation2]   ;;  %s6597_s16 = scalar_lea.hbm %s9230_s0, 7168 }
   0x3   :  { %s16_s13 = sshll.u32 %s6669_s12, 4  ;;  %p6598_p0 = scmp.ne.s32.totalorder %s9230_s0, %s6597_s16  ;;  %s17_s13 = int_to_ptr.vmem [resolvable:$true] %s16_s13 }
   0x4   :  { %p6601_p1 = scmp.lt.u32.totalorder %s6597_s16, %s9230_s0 }
   0x6   :  { %p6603_p2 = pnand %p6601_p1, %p6598_p0 }
   0x8   :  { %6606 = shalt.err (!%p6603_p2)
}
   0x9   :  { %s6607_s21 = scalar_lea.vmem %s17_s13, 7168  ;;  %p6612_p4 = scmp.lt.s32.totalorder %s17_s13, %s17_s13 }
   0xa   :  { %p6608_p3 = scmp.ne.s32.totalorder %s17_s13, %s6607_s21  ;;  %p6613_p5 = scmp.lt.s32.totalorder %s6607_s21, %s6607_s21 }
   0xc   :  { %p6614_p6 = por %p6613_p5, %p6612_p4 }
   0xe   :  { %p6615_p7 = pnand %p6614_p6, %p6608_p3 }
  0x10   :  { %6618 = shalt.err (!%p6615_p7)
}
  0x11   :  { %s6670_s22 = smov 896   ;;  %s6671_s23 = smov 56  }
  0x12   :  { %22 = dma.hbm_to_vmem [thread:$0]  %s9230_s0, 7168, %s17_s13, [#allocation3], %s6670_s22, %s6670_s22, %s6671_s23  }
  0x13   :  { %s6672_s26 = smov [#allocation5]   ;;  %s6619_s30 = scalar_lea.hbm %s9231_s1, 12544 }
  0x14   :  { %s28_s27 = sshll.u32 %s6672_s26, 4  ;;  %p6620_p8 = scmp.ne.s32.totalorder %s9231_s1, %s6619_s30  ;;  %s29_s27 = int_to_ptr.vmem [resolvable:$true] %s28_s27 }
  0x15   :  { %p6623_p9 = scmp.lt.u32.totalorder %s6619_s30, %s9231_s1 }
  0x17   :  { %p6625_p10 = pnand %p6623_p9, %p6620_p8 }
  0x19   :  { %6628 = shalt.err (!%p6625_p10)
}
  0x1a   :  { %s6629_s8 = scalar_lea.vmem %s29_s27, 12544  ;;  %p6634_p12 = scmp.lt.s32.totalorder %s29_s27, %s29_s27 }
  0x1b   :  { %p6630_p11 = scmp.ne.s32.totalorder %s29_s27, %s6629_s8  ;;  %p6635_p13 = scmp.lt.s32.totalorder %s6629_s8, %s6629_s8 }
  0x1d   :  { %p6636_p0 = por %p6635_p13, %p6634_p12 }
  0x1f   :  { %p6637_p1 = pnand %p6636_p0, %p6630_p11 }
  0x21   :  { %6640 = shalt.err (!%p6637_p1)
}
  0x22   :  { %s6673_s0 = smov 128   ;;  %s6674_s9 = smov 8  }
  0x23   :  { %34 = dma.hbm_to_vmem [thread:$0]  %s9231_s1, 12544, %s29_s27, [#allocation6], %s6673_s0, %s6673_s0, %s6674_s9  }
  0x24   :  { %6663 = dma.done.wait [#allocation3], 7168  }
  0x25   :  { %6664 = vsyncadd [#allocation3], 4294960128 }
  0x26   :  { %6665 = dma.done.wait [#allocation6], 12544  }
  0x27   :  { %6666 = vsyncadd [#allocation6], 4294954752  ;;  %v115_v0 = vld [vmem:[#allocation5 + $0x80] sm:$0xff]  ;;  %v116_v1 = vld [vmem:[#allocation5 + $0x88] sm:$0xff]  ;;  %vm204_vm0 = vcmask 130048  }
  0x28   :  { %v99_v2 = vld [vmem:[#allocation5] sm:$0xff]  ;;  %v278_v3 = vand.u32 4294901760, %v115_v0  ;;  %v281_v4 = vand.u32 4294901760, %v116_v1  ;;  %v100_v5 = vld [vmem:[#allocation5 + $0x8] sm:$0xff]  ;;  %v117_v7 = vld [vmem:[#allocation5 + $0x90] sm:$0xff] }
  0x29   :  { %v230_v6 = vand.u32 4294901760, %v99_v2  ;;  %v118_v8 = vld [vmem:[#allocation5 + $0x98] sm:$0xff]  ;;  %v233_v9 = vand.u32 4294901760, %v100_v5  ;;  %v284_v10 = vand.u32 4294901760, %v117_v7  ;;  %v101_v12 = vld [vmem:[#allocation5 + $0x10] sm:$0xff]  ;;  %v119_v18 = vld [vmem:[#allocation5 + $0xa0] sm:$0xff] }
  0x2a   :  { %v287_v11 = vand.u32 4294901760, %v118_v8  ;;  %v6723_v13 = vpack.c.bf16 %v281_v4, %v278_v3  ;;  %v6725_v14 = vsub.f32 %v115_v0, %v278_v3  ;;  %v6727_v15 = vsub.f32 %v116_v1, %v281_v4  ;;  %v102_v17 = vld [vmem:[#allocation5 + $0x18] sm:$0xff]  ;;  %v120_v23 = vld [vmem:[#allocation5 + $0xa8] sm:$0xff]  ;;  %v103_v24 = vld [vmem:[#allocation5 + $0x20] sm:$0xff] }
  0x2b   :  { %v6729_v16 = vsub.f32 %v99_v2, %v230_v6  ;;  %v6731_v19 = vpack.c.bf16 %v233_v9, %v230_v6  ;;  %v6733_v20 = vsub.f32 %v100_v5, %v233_v9  ;;  %v6737_v22 = vsub.f32 %v117_v7, %v284_v10  ;;  %v104_v29 = vld [vmem:[#allocation5 + $0x28] sm:$0xff]  ;;  %v121_v34 = vld [vmem:[#allocation5 + $0xb0] sm:$0xff]  ;;  %v122_v39 = vld [vmem:[#allocation5 + $0xb8] sm:$0xff] }
  0x2c   :  { %v6735_v21 = vpack.c.bf16 %v287_v11, %v284_v10  ;;  %5943 = vmatprep.subr.bf16.mxu1 %v6723_v13  ;;  %v6006_v25 = vpack.c.bf16 %v6727_v15, %v6725_v14  ;;  %v6743_v27 = vsub.f32 %v118_v8, %v287_v11  ;;  %v236_v28 = vand.u32 4294901760, %v101_v12  ;;  %v105_v44 = vld [vmem:[#allocation5 + $0x30] sm:$0xff]  ;;  %v106_v45 = vld [vmem:[#allocation5 + $0x38] sm:$0xff]  ;;  %v123_v50 = vld [vmem:[#allocation5 + $0xc0] sm:$0xff] }
  0x2d   :  { %5945 = vmatpush3.bf16.msra.mxu1 %v6731_v19  ;;  %v6008_v31 = vpack.c.bf16 %v6733_v20, %v6729_v16  ;;  %v239_v32 = vand.u32 4294901760, %v102_v17  ;;  %v290_v33 = vand.u32 4294901760, %v119_v18  ;;  %v293_v37 = vand.u32 4294901760, %v120_v23  ;;  %v124_v55 = vld [vmem:[#allocation5 + $0xc8] sm:$0xff]  ;;  %v107_v60 = vld [vmem:[#allocation5 + $0x40] sm:$0xff]  ;;  %v125_v2 = vld [vmem:[#allocation5 + $0xd0] sm:$0xff] }
  0x2e   :  { %6007 = vmatprep.subr.bf16.mxu0 %v6006_v25  ;;  %5947 = vmatprep.subr.bf16.mxu1 %v6735_v21  ;;  %v6750_v35 = vsub.f32 %v101_v12, %v236_v28  ;;  %v6010_v36 = vpack.c.bf16 %v6743_v27, %v6737_v22  ;;  %v242_v38 = vand.u32 4294901760, %v103_v24  ;;  %v245_v43 = vand.u32 4294901760, %v104_v29  ;;  %v108_v61 = vld [vmem:[#allocation5 + $0x48] sm:$0xff]  ;;  %v126_v7 = vld [vmem:[#allocation5 + $0xd8] sm:$0xff]  ;;  %v109_v12 = vld [vmem:[#allocation5 + $0x50] sm:$0xff] }
  0x2f   :  { %6009 = vmatpush3.bf16.msra.mxu0 %v6008_v31  ;;  %v6754_v40 = vpack.c.bf16 %v239_v32, %v236_v28  ;;  %v6756_v41 = vsub.f32 %v102_v17, %v239_v32  ;;  %v6758_v42 = vsub.f32 %v119_v18, %v290_v33  ;;  %v6760_v46 = vpack.c.bf16 %v293_v37, %v290_v33  ;;  %v110_v17 = vld [vmem:[#allocation5 + $0x58] sm:$0xff]  ;;  %v127_v28 = vld [vmem:[#allocation5 + $0xe0] sm:$0xff] }
  0x30   :  { %6011 = vmatprep.subr.bf16.mxu0 %v6010_v36  ;;  %v6762_v47 = vsub.f32 %v120_v23, %v293_v37  ;;  %v6764_v48 = vsub.f32 %v103_v24, %v242_v38  ;;  %v296_v49 = vand.u32 4294901760, %v121_v34  ;;  %v6769_v52 = vpack.c.bf16 %v245_v43, %v242_v38 }
  0x31   :  { %5949 = vmatpush3.bf16.msra.mxu1 %v6754_v40  ;;  %v6012_v51 = vpack.c.bf16 %v6756_v41, %v6750_v35  ;;  %v6771_v53 = vsub.f32 %v104_v29, %v245_v43  ;;  %v299_v54 = vand.u32 4294901760, %v122_v39  ;;  %v248_v58 = vand.u32 4294901760, %v105_v44  ;;  %v111_v43 = vld [vmem:[#allocation5 + $0x60] sm:$0xff] }
  0x32   :  { %9566 = vst [vmem:[#allocation11_spill] sm:$0xff] %v6769_v52  ;;  %5951 = vmatprep.subr.bf16.mxu1 %v6760_v46  ;;  %v6014_v56 = vpack.c.bf16 %v6762_v47, %v6758_v42  ;;  %v6776_v57 = vsub.f32 %v121_v34, %v296_v49  ;;  %v251_v59 = vand.u32 4294901760, %v106_v45  ;;  %v302_v1 = vand.u32 4294901760, %v123_v50  ;;  %v128_v34 = vld [vmem:[#allocation5 + $0xe8] sm:$0xff] }
  0x33   :  { %6013 = vmatpush3.bf16.msra.mxu0 %v6012_v51  ;;  %v6016_v62 = vpack.c.bf16 %v6771_v53, %v6764_v48  ;;  %v6780_v63 = vpack.c.bf16 %v299_v54, %v296_v49  ;;  %v6782_v0 = vsub.f32 %v122_v39, %v299_v54  ;;  %v6786_v4 = vsub.f32 %v105_v44, %v248_v58  ;;  %v112_v44 = vld [vmem:[#allocation5 + $0x68] sm:$0xff]  ;;  %v129_v54 = vld [vmem:[#allocation5 + $0xf0] sm:$0xff] }
  0x34   :  { %6015 = vmatprep.subr.bf16.mxu0 %v6014_v56  ;;  %v6784_v3 = vpack.c.bf16 %v251_v59, %v248_v58  ;;  %v6788_v5 = vsub.f32 %v106_v45, %v251_v59  ;;  %v305_v6 = vand.u32 4294901760, %v124_v55  ;;  %v6793_v9 = vsub.f32 %v123_v50, %v302_v1 }
  0x35   :  { %9567 = vst [vmem:[#allocation12_spill] sm:$0xff] %v6780_v63  ;;  %5953 = vmatpush3.bf16.msra.mxu1 %v6769_v52  ;;  %v6018_v8 = vpack.c.bf16 %v6782_v0, %v6776_v57  ;;  %v254_v10 = vand.u32 4294901760, %v107_v60  ;;  %v257_v11 = vand.u32 4294901760, %v108_v61  ;;  %v308_v25 = vand.u32 4294901760, %v125_v2 }
  0x36   :  { %9568 = vst [vmem:[#allocation13_spill] sm:$0xff] %v6784_v3  ;;  %5955 = vmatprep.subr.bf16.mxu1 %v6780_v63  ;;  %v6020_v18 = vpack.c.bf16 %v6788_v5, %v6786_v4  ;;  %v6798_v23 = vpack.c.bf16 %v305_v6, %v302_v1  ;;  %v6800_v24 = vsub.f32 %v124_v55, %v305_v6  ;;  %v311_v33 = vand.u32 4294901760, %v126_v7  ;;  %v113_v6 = vld [vmem:[#allocation5 + $0x70] sm:$0xff] }
  0x37   :  { %6017 = vmatpush3.bf16.msra.mxu0 %v6016_v62  ;;  %v6802_v29 = vpack.c.bf16 %v257_v11, %v254_v10  ;;  %v6804_v31 = vsub.f32 %v107_v60, %v254_v10  ;;  %v6806_v32 = vsub.f32 %v108_v61, %v257_v11  ;;  %v6810_v37 = vsub.f32 %v125_v2, %v308_v25  ;;  %v130_v60 = vld [vmem:[#allocation5 + $0xf8] sm:$0xff] }
  0x38   :  { %9569 = vst [vmem:[#allocation14_spill] sm:$0xff] %v6798_v23  ;;  %6019 = vmatprep.subr.bf16.mxu0 %v6018_v8  ;;  %v6022_v36 = vpack.c.bf16 %v6800_v24, %v6793_v9  ;;  %v260_v38 = vand.u32 4294901760, %v109_v12  ;;  %v263_v39 = vand.u32 4294901760, %v110_v17  ;;  %v6815_v49 = vpack.c.bf16 %v311_v33, %v308_v25 }
  0x39   :  { %9570 = vst [vmem:[#allocation15_spill] sm:$0xff] %v6802_v29  ;;  %5957 = vmatpush3.bf16.msra.mxu1 %v6784_v3  ;;  %v6024_v45 = vpack.c.bf16 %v6806_v32, %v6804_v31  ;;  %v6817_v50 = vsub.f32 %v126_v7, %v311_v33  ;;  %v314_v51 = vand.u32 4294901760, %v127_v28  ;;  %v317_v59 = vand.u32 4294901760, %v128_v34  ;;  %v114_v7 = vld [vmem:[#allocation5 + $0x78] sm:$0xff] }
  0x3a   :  { %9571 = vst [vmem:[#allocation16_spill] sm:$0xff] %v6815_v49  ;;  %5959 = vmatprep.subr.bf16.mxu1 %v6798_v23  ;;  %v6820_v55 = vpack.c.bf16 %v263_v39, %v260_v38  ;;  %v6822_v56 = vsub.f32 %v109_v12, %v260_v38  ;;  %v6824_v58 = vsub.f32 %v110_v17, %v263_v39  ;;  %v266_v1 = vand.u32 4294901760, %v111_v43  ;;  %v44_v17 = vld [vmem:[#allocation2 + $0x8] sm:$0xff]  ;;  %v43_v38 = vld [vmem:[#allocation2] sm:$0xff] }
  0x3b   :  { %6021 = vmatpush3.bf16.msra.mxu0 %v6020_v18  ;;  %v6026_v61 = vpack.c.bf16 %v6817_v50, %v6810_v37  ;;  %v6828_v62 = vsub.f32 %v127_v28, %v314_v51  ;;  %v269_v2 = vand.u32 4294901760, %v112_v44  ;;  %v6832_v10 = vpack.c.bf16 %v317_v59, %v314_v51 }
  0x3c   :  { %9572 = vst [vmem:[#allocation17_spill] sm:$0xff] %v6820_v55  ;;  %6023 = vmatprep.subr.bf16.mxu0 %v6022_v36  ;;  %v6028_v8 = vpack.c.bf16 %v6824_v58, %v6822_v56  ;;  %v6834_v11 = vsub.f32 %v128_v34, %v317_v59  ;;  %v320_v12 = vand.u32 4294901760, %v129_v54  ;;  %v6839_v25 = vsub.f32 %v111_v43, %v266_v1 }
  0x3d   :  { %9573 = vst [vmem:[#allocation18_spill] sm:$0xff] %v6832_v10  ;;  %5961 = vmatpush3.bf16.msra.mxu1 %v6802_v29  ;;  %v6837_v18 = vpack.c.bf16 %v269_v2, %v266_v1  ;;  %v6841_v28 = vsub.f32 %v112_v44, %v269_v2  ;;  %v323_v33 = vand.u32 4294901760, %v130_v60  ;;  %v272_v34 = vand.u32 4294901760, %v113_v6 }
  0x3e   :  { %5963 = vmatprep.subr.bf16.mxu1 %v6815_v49  ;;  %v6030_v36 = vpack.c.bf16 %v6834_v11, %v6828_v62  ;;  %v6846_v39 = vsub.f32 %v129_v54, %v320_v12  ;;  %v275_v51 = vand.u32 4294901760, %v114_v7  ;;  %v6854_v44 = vand.u32 4294901760, %v44_v17 }
  0x3f   :  { %9574 = vst [vmem:[#allocation19_spill] sm:$0xff] %v6837_v18  ;;  %6025 = vmatpush3.bf16.msra.mxu0 %v6024_v45  ;;  %v6032_v59 = vpack.c.bf16 %v6841_v28, %v6839_v25  ;;  %v6850_v30 = vpack.c.bf16 %v323_v33, %v320_v12  ;;  %v6852_v43 = vsub.f32 %v130_v60, %v323_v33  ;;  %v6862_v54 = vand.u32 4294901760, %v43_v38  ;;  %v51_v33 = vld [vmem:[#allocation2 + $0x40] sm:$0xff] }
  0x40   :  { %9576 = vst [vmem:[#allocation21_spill] sm:$0xff] %v6854_v44  ;;  %6027 = vmatprep.subr.bf16.mxu0 %v6026_v61  ;;  %v6856_v1 = vpack.c.bf16 %v275_v51, %v272_v34  ;;  %v6858_v2 = vsub.f32 %v113_v6, %v272_v34  ;;  %v6860_v26 = vsub.f32 %v114_v7, %v275_v51  ;;  %v561_v60 = vand.u32 4294901760, %v6725_v14 }
  0x41   :  { %9575 = vst [vmem:[#allocation20_spill] sm:$0xff] %v6850_v30  ;;  %9578 = vst [vmem:[#allocation23_spill] sm:$0xff] %v6862_v54  ;;  %5965 = vmatpush3.bf16.msra.mxu1 %v6820_v55  ;;  %v6034_v45 = vpack.c.bf16 %v6852_v43, %v6846_v39  ;;  %v6868_v12 = vsub.f32 %v44_v17, %v6854_v44  ;;  %v568_v61 = vand.u32 4294901760, %v6727_v15  ;;  %v9580_v34 = vand.u32 4294901760, %v6729_v16 }
  0x42   :  { %9577 = vst [vmem:[#allocation22_spill] sm:$0xff] %v6856_v1  ;;  %5967 = vmatprep.subr.bf16.mxu1 %v6832_v10  ;;  %v6036_v6 = vpack.c.bf16 %v6860_v26, %v6858_v2  ;;  %v6876_v7 = vsub.f32 %v43_v38, %v6862_v54  ;;  %v9581_v17 = vand.u32 4294901760, %v6733_v20  ;;  %v562_v29 = vsub.f32 %v6725_v14, %v561_v60  ;;  %v50_v38 = vld [vmem:[#allocation2 + $0x38] sm:$0xff] }
  0x43   :  { %9579 = vst [vmem:[#allocation24_spill] sm:$0xff] %v6868_v12  ;;  %v450_v51 = vsub.f32 %v6729_v16, %v9580_v34  ;;  %6029 = vmatpush3.bf16.msra.mxu0 %v6028_v8  ;;  %v9252_v49 = vand.u32 4294901760, %v6868_v12  ;;  %v569_v10 = vsub.f32 %v6727_v15, %v568_v61  ;;  %857 = vmatprep.mubr.f32.mxu0 %v6868_v12  ;;  %v6889_v52 = vand.u32 4294901760, %v51_v33 }
  0x44   :  { %v457_v55 = vsub.f32 %v6733_v20, %v9581_v17  ;;  %v6070_v23 = vpack.c.bf16 %v568_v61, %v561_v60  ;;  %6031 = vmatprep.subr.bf16.mxu0 %v6030_v36  ;;  %v9253_v3 = vand.u32 4294901760, %v6876_v7  ;;  %v563_v14 = vand.u32 4294901760, %v562_v29 }
  0x45   :  { %v451_v63 = vand.u32 4294901760, %v450_v51  ;;  %9582 = vst [vmem:[#allocation25_spill] sm:$0xff] %v6889_v52  ;;  %5969 = vmatpush3.bf16.msra.mxu1 %v6837_v18  ;;  %v328_v8 = vsub.f32 %v6868_v12, %v9252_v49  ;;  %v570_v17 = vand.u32 4294901760, %v569_v10  ;;  %v9583_v15 = vand.u32 4294901760, %v6729_v16 }
  0x46   :  { %v458_v34 = vand.u32 4294901760, %v457_v55  ;;  %v9584_v60 = vand.u32 4294901760, %v6733_v20  ;;  %5971 = vmatprep.subr.bf16.mxu1 %v6850_v30  ;;  %v334_v55 = vsub.f32 %v6876_v7, %v9253_v3  ;;  %v6904_v51 = vsub.f32 %v51_v33, %v6889_v52 }
  0x47   :  { %v6906_v18 = vand.u32 4294901760, %v50_v38  ;;  %6033 = vmatpush3.bf16.msra.mxu0 %v6032_v59  ;;  %v329_v29 = vand.u32 4294901760, %v328_v8  ;;  %v5974_v10 = vpack.c.bf16 %v570_v17, %v563_v14  ;;  %v575_v16 = vand.u32 4294901760, %v6737_v22 }
  0x48   :  { %v6072_v61 = vpack.c.bf16 %v9584_v60, %v9583_v15  ;;  %v5976_v36 = vpack.c.bf16 %v458_v34, %v451_v63  ;;  %v582_v20 = vand.u32 4294901760, %v6743_v27  ;;  %v58_v15 = vld [vmem:[#allocation2 + $0x78] sm:$0xff]  ;;  %6035 = vmatprep.subr.bf16.mxu0 %v6034_v45  ;;  %v335_v60 = vand.u32 4294901760, %v334_v55  ;;  %v57_v55 = vld [vmem:[#allocation2 + $0x70] sm:$0xff] }
  0x49   :  { %9585 = vst [vmem:[#allocation26_spill] sm:$0xff] %v6906_v18  ;;  %v9255_v49 = vand.u32 4294901760, %v6904_v51  ;;  %v6912_v3 = vsub.f32 %v50_v38, %v6906_v18  ;;  %v463_v63 = vand.u32 4294901760, %v6750_v35  ;;  %5973 = vmatpush3.bf16.msra.mxu1 %v6856_v1  ;;  %330 = vmatprep.mubr.f32.mxu1 %v329_v29  ;;  %v576_v59 = vsub.f32 %v6737_v22, %v575_v16 }
  0x4a   :  { %v583_v33 = vsub.f32 %v6743_v27, %v582_v20  ;;  %v470_v34 = vand.u32 4294901760, %v6756_v41  ;;  %v6074_v8 = vpack.c.bf16 %v582_v20, %v575_v16  ;;  %5975 = vmatprep.subr.bf16.mxu1 %v5974_v10  ;;  %v6924_v17 = vand.u32 4294901760, %v58_v15 }
  0x4b   :  { %v343_v45 = vsub.f32 %v6904_v51, %v9255_v49  ;;  %v9270_v38 = vand.u32 4294901760, %v6912_v3  ;;  %v464_v14 = vsub.f32 %v6750_v35, %v463_v63  ;;  %6037 = vmatpush3.bf16.msra.mxu0 %v6036_v6  ;;  %v577_v29 = vand.u32 4294901760, %v576_v59 }
  0x4c   :  { %9586 = vst [vmem:[#allocation27_spill] sm:$0xff] %v6924_v17  ;;  %v584_v22 = vand.u32 4294901760, %v583_v33  ;;  %v471_v27 = vsub.f32 %v6756_v41, %v470_v34  ;;  %v6076_v12 = vpack.c.bf16 %v470_v34, %v463_v63  ;;  %336 = vmatmul.mubr.f32.vlgmr.msra.gmra.mrb[0].mxu1 %v335_v60  ;;  %6071 = vmatprep.subr.bf16.mxu0 %v6070_v23  ;;  %v6933_v6 = vand.u32 4294901760, %v57_v55  ;;  %v65_v41 = vld [vmem:[#allocation2 + $0xb0] sm:$0xff] }
  0x4d   :  { %v344_v10 = vand.u32 4294901760, %v343_v45  ;;  %v349_v16 = vsub.f32 %v6912_v3, %v9270_v38  ;;  %v465_v20 = vand.u32 4294901760, %v464_v14  ;;  %v6931_v49 = vsub.f32 %v58_v15, %v6924_v17  ;;  %5977 = vmatpush3.bf16.msra.mxu1 %v5976_v36  ;;  %v7155_v38 = vld [vmem:[#allocation5 + $0x1b8] sm:$0xff] }
  0x4e   :  { %v5978_v35 = vpack.c.bf16 %v584_v22, %v577_v29  ;;  %v472_v1 = vand.u32 4294901760, %v471_v27  ;;  %9587 = vst [vmem:[#allocation28_spill] sm:$0xff] %v6933_v6  ;;  %v589_v59 = vand.u32 4294901760, %v6758_v42  ;;  %860 = vmatmul.mubr.f32.vlgmr.msra.gmra.mrb[0].mxu0 %v6876_v7  ;;  %v596_v63 = vand.u32 4294901760, %v6762_v47 }
  0x4f   :  { %345 = vmatprep.mubr.f32.mxu1 %v344_v10  ;;  %v350_v23 = vand.u32 4294901760, %v349_v16  ;;  %v9269_v60 = vand.u32 4294901760, %v6931_v49  ;;  %v477_v33 = vand.u32 4294901760, %v6764_v48  ;;  %6073 = vmatpush3.bf16.msra.mxu0 %v6072_v61  ;;  %v6941_v15 = vsub.f32 %v57_v55, %v6933_v6 }
  0x50   :  { %5979 = vmatprep.subr.bf16.mxu1 %v5978_v35  ;;  %v5980_v36 = vpack.c.bf16 %v472_v1, %v465_v20  ;;  %v590_v34 = vsub.f32 %v6758_v42, %v589_v59  ;;  %v484_v45 = vand.u32 4294901760, %v6771_v53  ;;  %866 = vmatprep.mubr.f32.mxu0 %v6904_v51  ;;  %v597_v29 = vsub.f32 %v6762_v47, %v596_v63  ;;  %v64_v1 = vld [vmem:[#allocation2 + $0xa8] sm:$0xff] }
  0x51   :  { %9588 = vst [vmem:[#allocation29_spill] sm:$0xff] %v6941_v15  ;;  %351 = vmatmul.mubr.f32.gmra.mrb[2].mxu1 %v350_v23  ;;  %v358_v14 = vsub.f32 %v6931_v49, %v9269_v60  ;;  %v478_v61 = vsub.f32 %v6764_v48, %v477_v33  ;;  %v6951_v22 = vand.u32 4294901760, %v65_v41  ;;  %6075 = vmatprep.subr.bf16.mxu0 %v6074_v8  ;;  %v9267_v42 = vand.u32 4294901760, %v6941_v15  ;;  %v7153_v60 = vld [vmem:[#allocation5 + $0x1b0] sm:$0xff] }
  0x52   :  { %5981 = vmatpush3.bf16.msra.mxu1 %v5980_v36  ;;  %v591_v55 = vand.u32 4294901760, %v590_v34  ;;  %v485_v27 = vsub.f32 %v6771_v53, %v484_v45  ;;  %v6078_v10 = vpack.c.bf16 %v596_v63, %v589_v59  ;;  %869 = vmatmul.mubr.f32.gmra.mrb[2].mxu0 %v6912_v3  ;;  %v598_v20 = vand.u32 4294901760, %v597_v29 }
  0x53   :  { %9589 = vst [vmem:[#allocation30_spill] sm:$0xff] %v6951_v22  ;;  %v359_v16 = vand.u32 4294901760, %v358_v14  ;;  %v479_v35 = vand.u32 4294901760, %v478_v61  ;;  %v6957_v47 = vsub.f32 %v65_v41, %v6951_v22  ;;  %6077 = vmatpush3.bf16.msra.mxu0 %v6076_v12  ;;  %v364_v48 = vsub.f32 %v6941_v15, %v9267_v42  ;;  %875 = vmatprep.mubr.f32.mxu0 %v6931_v49  ;;  %v72_v12 = vld [vmem:[#allocation2 + $0xe8] sm:$0xff]  ;;  %v7117_v42 = vld [vmem:[#allocation5 + $0x118] sm:$0xff] }
  0x54   :  { %v486_v8 = vand.u32 4294901760, %v485_v27  ;;  %v6080_v23 = vpack.c.bf16 %v484_v45, %v477_v33  ;;  %v6963_v36 = vand.u32 4294901760, %v64_v1  ;;  %v5982_v53 = vpack.c.bf16 %v598_v20, %v591_v55  ;;  %6079 = vmatprep.subr.bf16.mxu0 %v6078_v10 }
  0x55   :  { %9590 = vst [vmem:[#allocation31_spill] sm:$0xff] %v6957_v47  ;;  %360 = vmatprep.mubr.f32.mxu1 %v359_v16  ;;  %v9262_v59 = vand.u32 4294901760, %v6957_v47  ;;  %v603_v63 = vand.u32 4294901760, %v6776_v57  ;;  %v610_v41 = vand.u32 4294901760, %v6782_v0  ;;  %v365_v34 = vand.u32 4294901760, %v364_v48 }
  0x56   :  { %9591 = vst [vmem:[#allocation32_spill] sm:$0xff] %v6963_v36  ;;  %v5984_v14 = vpack.c.bf16 %v486_v8, %v479_v35  ;;  %v6969_v29 = vsub.f32 %v64_v1, %v6963_v36  ;;  %v491_v61 = vand.u32 4294901760, %v6786_v4  ;;  %5983 = vmatprep.subr.bf16.mxu1 %v5982_v53  ;;  %878 = vmatmul.mubr.f32.gmra.mrb[4].mxu0 %v6941_v15  ;;  %v498_v27 = vand.u32 4294901760, %v6788_v5  ;;  %v71_v35 = vld [vmem:[#allocation2 + $0xe0] sm:$0xff] }
  0x57   :  { %v373_v33 = vsub.f32 %v6957_v47, %v9262_v59  ;;  %v604_v45 = vsub.f32 %v6776_v57, %v603_v63  ;;  %v611_v55 = vsub.f32 %v6782_v0, %v610_v41  ;;  %366 = vmatmul.mubr.f32.gmra.mrb[4].mxu1 %v365_v34  ;;  %6081 = vmatpush3.bf16.msra.mxu0 %v6080_v23  ;;  %v6981_v20 = vand.u32 4294901760, %v72_v12 }
  0x58   :  { %9592 = vst [vmem:[#allocation33_spill] sm:$0xff] %v6969_v29  ;;  %v9258_v1 = vand.u32 4294901760, %v6969_v29  ;;  %v492_v10 = vsub.f32 %v6786_v4, %v491_v61  ;;  %v6082_v16 = vpack.c.bf16 %v610_v41, %v603_v63  ;;  %5985 = vmatpush3.bf16.msra.mxu1 %v5984_v14  ;;  %v499_v57 = vsub.f32 %v6788_v5, %v498_v27 }
  0x59   :  { %9593 = vst [vmem:[#allocation34_spill] sm:$0xff] %v6981_v20  ;;  %v374_v48 = vand.u32 4294901760, %v373_v33  ;;  %v605_v8 = vand.u32 4294901760, %v604_v45  ;;  %v612_v53 = vand.u32 4294901760, %v611_v55  ;;  %884 = vmatprep.mubr.f32.mxu0 %v6957_v47  ;;  %v6989_v4 = vsub.f32 %v72_v12, %v6981_v20  ;;  %v79_v12 = vld [vmem:[#allocation2 + $0x120] sm:$0xff] }
  0x5a   :  { %v379_v0 = vsub.f32 %v6969_v29, %v9258_v1  ;;  %v493_v23 = vand.u32 4294901760, %v492_v10  ;;  %6083 = vmatprep.subr.bf16.mxu0 %v6082_v16  ;;  %v6084_v63 = vpack.c.bf16 %v498_v27, %v491_v61  ;;  %v500_v34 = vand.u32 4294901760, %v499_v57  ;;  %887 = vmatmul.mubr.f32.gmra.mrb[6].mxu0 %v6969_v29 }
  0x5b   :  { %9594 = vst [vmem:[#allocation35_spill] sm:$0xff] %v6989_v4  ;;  %375 = vmatprep.mubr.f32.mxu1 %v374_v48  ;;  %v5986_v41 = vpack.c.bf16 %v612_v53, %v605_v8  ;;  %v6992_v14 = vand.u32 4294901760, %v71_v35  ;;  %v617_v5 = vand.u32 4294901760, %v6793_v9  ;;  %v9259_v45 = vand.u32 4294901760, %v6989_v4  ;;  %893 = vmatprep.mubr.f32.mxu0 %v6989_v4 }
  0x5c   :  { %v380_v33 = vand.u32 4294901760, %v379_v0  ;;  %6085 = vmatpush3.bf16.msra.mxu0 %v6084_v63  ;;  %v624_v55 = vand.u32 4294901760, %v6800_v24  ;;  %v505_v10 = vand.u32 4294901760, %v6804_v31  ;;  %v5988_v61 = vpack.c.bf16 %v500_v34, %v493_v23  ;;  %v78_v63 = vld [vmem:[#allocation2 + $0x118] sm:$0xff] }
  0x5d   :  { %9595 = vst [vmem:[#allocation36_spill] sm:$0xff] %v6992_v14  ;;  %5987 = vmatprep.subr.bf16.mxu1 %v5986_v41  ;;  %v7000_v27 = vsub.f32 %v71_v35, %v6992_v14  ;;  %v618_v16 = vsub.f32 %v6793_v9, %v617_v5  ;;  %v512_v48 = vand.u32 4294901760, %v6806_v32  ;;  %v388_v8 = vsub.f32 %v6989_v4, %v9259_v45 }
  0x5e   :  { %381 = vmatmul.mubr.f32.gmra.mrb[6].mxu1 %v380_v33  ;;  %v625_v53 = vsub.f32 %v6800_v24, %v624_v55  ;;  %v506_v57 = vsub.f32 %v6804_v31, %v505_v10  ;;  %v6086_v0 = vpack.c.bf16 %v624_v55, %v617_v5  ;;  %v7012_v9 = vand.u32 4294901760, %v79_v12 }
  0x5f   :  { %9596 = vst [vmem:[#allocation37_spill] sm:$0xff] %v7000_v27  ;;  %5989 = vmatpush3.bf16.msra.mxu1 %v5988_v61  ;;  %v9261_v23 = vand.u32 4294901760, %v7000_v27  ;;  %v619_v35 = vand.u32 4294901760, %v618_v16  ;;  %v513_v41 = vsub.f32 %v6806_v32, %v512_v48  ;;  %896 = vmatmul.mubr.f32.gmra.mrb[8].mxu0 %v7000_v27  ;;  %v389_v34 = vand.u32 4294901760, %v388_v8 }
  0x60   :  { %9597 = vst [vmem:[#allocation38_spill] sm:$0xff] %v7012_v9  ;;  %v626_v33 = vand.u32 4294901760, %v625_v53  ;;  %v507_v1 = vand.u32 4294901760, %v506_v57  ;;  %6087 = vmatprep.subr.bf16.mxu0 %v6086_v0  ;;  %v6088_v45 = vpack.c.bf16 %v512_v48, %v505_v10  ;;  %v7018_v5 = vsub.f32 %v79_v12, %v7012_v9  ;;  %v86_v10 = vld [vmem:[#allocation2 + $0x158] sm:$0xff] }
  0x61   :  { %v394_v24 = vsub.f32 %v7000_v27, %v9261_v23  ;;  %v514_v31 = vand.u32 4294901760, %v513_v41  ;;  %v7020_v55 = vand.u32 4294901760, %v78_v63  ;;  %390 = vmatprep.mubr.f32.mxu1 %v389_v34  ;;  %v631_v61 = vand.u32 4294901760, %v6810_v37 }
  0x62   :  { %9598 = vst [vmem:[#allocation39_spill] sm:$0xff] %v7018_v5  ;;  %v5990_v32 = vpack.c.bf16 %v626_v33, %v619_v35  ;;  %6089 = vmatpush3.bf16.msra.mxu0 %v6088_v45  ;;  %v638_v16 = vand.u32 4294901760, %v6817_v50  ;;  %v519_v8 = vand.u32 4294901760, %v6822_v56  ;;  %v9260_v57 = vand.u32 4294901760, %v7018_v5  ;;  %902 = vmatprep.mubr.f32.mxu0 %v7018_v5 }
  0x63   :  { %9599 = vst [vmem:[#allocation40_spill] sm:$0xff] %v7020_v55  ;;  %v395_v48 = vand.u32 4294901760, %v394_v24  ;;  %v5992_v53 = vpack.c.bf16 %v514_v31, %v507_v1  ;;  %v7027_v0 = vsub.f32 %v78_v63, %v7020_v55  ;;  %v632_v12 = vsub.f32 %v6810_v37, %v631_v61  ;;  %v85_v24 = vld [vmem:[#allocation2 + $0x150] sm:$0xff] }
  0x64   :  { %5991 = vmatprep.subr.bf16.mxu1 %v5990_v32  ;;  %v639_v45 = vsub.f32 %v6817_v50, %v638_v16  ;;  %v520_v35 = vsub.f32 %v6822_v56, %v519_v8  ;;  %v526_v41 = vand.u32 4294901760, %v6824_v58  ;;  %v403_v1 = vsub.f32 %v7018_v5, %v9260_v57  ;;  %v53_v5 = vld [vmem:[#allocation2 + $0x50] sm:$0xff] }
  0x65   :  { %9600 = vst [vmem:[#allocation41_spill] sm:$0xff] %v7027_v0  ;;  %396 = vmatmul.mubr.f32.gmra.mrb[8].mxu1 %v395_v48  ;;  %v9266_v34 = vand.u32 4294901760, %v7027_v0  ;;  %905 = vmatmul.mubr.f32.gmra.mrb[10].mxu0 %v7027_v0  ;;  %v6090_v63 = vpack.c.bf16 %v638_v16, %v631_v61  ;;  %v7039_v33 = vand.u32 4294901760, %v86_v10  ;;  %v633_v37 = vand.u32 4294901760, %v632_v12 }
  0x66   :  { %5993 = vmatpush3.bf16.msra.mxu1 %v5992_v53  ;;  %v640_v50 = vand.u32 4294901760, %v639_v45  ;;  %v521_v31 = vand.u32 4294901760, %v520_v35  ;;  %v527_v56 = vsub.f32 %v6824_v58, %v526_v41  ;;  %v404_v32 = vand.u32 4294901760, %v403_v1  ;;  %v93_v1 = vld [vmem:[#allocation2 + $0x190] sm:$0xff] }
  0x67   :  { %9601 = vst [vmem:[#allocation42_spill] sm:$0xff] %v7039_v33  ;;  %v409_v48 = vsub.f32 %v7027_v0, %v9266_v34  ;;  %6091 = vmatprep.subr.bf16.mxu0 %v6090_v63  ;;  %v7046_v57 = vsub.f32 %v86_v10, %v7039_v33  ;;  %v6092_v23 = vpack.c.bf16 %v526_v41, %v519_v8  ;;  %v7048_v59 = vand.u32 4294901760, %v85_v24  ;;  %v7110_v34 = vld [vmem:[#allocation5 + $0x190] sm:$0xff]  ;;  %v7270_v0 = vld [vmem:[#allocation5 + $0x168] sm:$0xff] }
  0x68   :  { %v5994_v61 = vpack.c.bf16 %v640_v50, %v633_v37  ;;  %v528_v16 = vand.u32 4294901760, %v527_v56  ;;  %v645_v53 = vand.u32 4294901760, %v6828_v62  ;;  %405 = vmatprep.mubr.f32.mxu1 %v404_v32  ;;  %v652_v45 = vand.u32 4294901760, %v6834_v11  ;;  %9635 = vst [vmem:[#allocation64_spill] sm:$0xff] %v7270_v0 }
  0x69   :  { %9602 = vst [vmem:[#allocation43_spill] sm:$0xff] %v7046_v57  ;;  %9603 = vst [vmem:[#allocation44_spill] sm:$0xff] %v7048_v59  ;;  %v410_v12 = vand.u32 4294901760, %v409_v48  ;;  %v9263_v58 = vand.u32 4294901760, %v7046_v57  ;;  %6093 = vmatpush3.bf16.msra.mxu0 %v6092_v23  ;;  %v533_v35 = vand.u32 4294901760, %v6839_v25  ;;  %v7055_v8 = vsub.f32 %v85_v24, %v7048_v59  ;;  %911 = vmatprep.mubr.f32.mxu0 %v7046_v57 }
  0x6a   :  { %5995 = vmatprep.subr.bf16.mxu1 %v5994_v61  ;;  %v5996_v10 = vpack.c.bf16 %v528_v16, %v521_v31  ;;  %v646_v41 = vsub.f32 %v6828_v62, %v645_v53  ;;  %v540_v63 = vand.u32 4294901760, %v6841_v28  ;;  %v653_v37 = vsub.f32 %v6834_v11, %v652_v45  ;;  %v92_v31 = vld [vmem:[#allocation2 + $0x188] sm:$0xff] }
  0x6b   :  { %9604 = vst [vmem:[#allocation45_spill] sm:$0xff] %v7055_v8  ;;  %411 = vmatmul.mubr.f32.gmra.mrb[10].mxu1 %v410_v12  ;;  %v418_v23 = vsub.f32 %v7046_v57, %v9263_v58  ;;  %v534_v50 = vsub.f32 %v6839_v25, %v533_v35  ;;  %v6094_v56 = vpack.c.bf16 %v652_v45, %v645_v53  ;;  %v9265_v24 = vand.u32 4294901760, %v7055_v8  ;;  %v9631_v57 = vld [vmem:[#allocation12_spill] sm:$0xff] }
  0x6c   :  { %5997 = vmatpush3.bf16.msra.mxu1 %v5996_v10  ;;  %v647_v32 = vand.u32 4294901760, %v646_v41  ;;  %v541_v62 = vsub.f32 %v6841_v28, %v540_v63  ;;  %914 = vmatmul.mubr.f32.gmra.mrb[12].mxu0 %v7055_v8  ;;  %v7068_v48 = vand.u32 4294901760, %v93_v1  ;;  %v654_v16 = vand.u32 4294901760, %v653_v37 }
  0x6d   :  { %v419_v61 = vand.u32 4294901760, %v418_v23  ;;  %v535_v12 = vand.u32 4294901760, %v534_v50  ;;  %6095 = vmatprep.subr.bf16.mxu0 %v6094_v56  ;;  %v6096_v58 = vpack.c.bf16 %v540_v63, %v533_v35  ;;  %v424_v11 = vsub.f32 %v7055_v8, %v9265_v24  ;;  %v7081_v35 = vld [vmem:[#allocation5 + $0x180] sm:$0xff] }
  0x6e   :  { %9605 = vst [vmem:[#allocation46_spill] sm:$0xff] %v7068_v48  ;;  %v542_v25 = vand.u32 4294901760, %v541_v62  ;;  %v7074_v53 = vsub.f32 %v93_v1, %v7068_v48  ;;  %v7076_v45 = vand.u32 4294901760, %v92_v31  ;;  %v5998_v28 = vpack.c.bf16 %v654_v16, %v647_v32 }
  0x6f   :  { %420 = vmatprep.mubr.f32.mxu1 %v419_v61  ;;  %6097 = vmatpush3.bf16.msra.mxu0 %v6096_v58  ;;  %v659_v10 = vand.u32 4294901760, %v6846_v39  ;;  %v666_v41 = vand.u32 4294901760, %v6852_v43  ;;  %v547_v23 = vand.u32 4294901760, %v6858_v2  ;;  %v425_v63 = vand.u32 4294901760, %v424_v11  ;;  %v7092_v61 = vld [vmem:[#allocation5 + $0x188] sm:$0xff]  ;;  %v7100_v11 = vld [vmem:[#allocation5 + $0x100] sm:$0xff] }
  0x70   :  { %9606 = vst [vmem:[#allocation47_spill] sm:$0xff] %v7074_v53  ;;  %9607 = vst [vmem:[#allocation48_spill] sm:$0xff] %v7076_v45  ;;  %v6000_v37 = vpack.c.bf16 %v542_v25, %v535_v12  ;;  %v9264_v50 = vand.u32 4294901760, %v7074_v53  ;;  %v7085_v1 = vsub.f32 %v92_v31, %v7076_v45  ;;  %920 = vmatprep.mubr.f32.mxu0 %v7074_v53  ;;  %5999 = vmatprep.subr.bf16.mxu1 %v5998_v28 }
  0x71   :  { %v660_v58 = vsub.f32 %v6846_v39, %v659_v10  ;;  %v667_v56 = vsub.f32 %v6852_v43, %v666_v41  ;;  %v548_v32 = vsub.f32 %v6858_v2, %v547_v23  ;;  %v554_v62 = vand.u32 4294901760, %v6860_v26  ;;  %426 = vmatmul.mubr.f32.gmra.mrb[12].mxu1 %v425_v63  ;;  %v7104_v63 = vld [vmem:[#allocation5 + $0x108] sm:$0xff] }
  0x72   :  { %9608 = vst [vmem:[#allocation49_spill] sm:$0xff] %v7085_v1  ;;  %v433_v16 = vsub.f32 %v7074_v53, %v9264_v50  ;;  %v9268_v31 = vand.u32 4294901760, %v7085_v1  ;;  %923 = vmatmul.mubr.f32.gmra.mrb[14].mxu0 %v7085_v1  ;;  %v6098_v12 = vpack.c.bf16 %v666_v41, %v659_v10  ;;  %v9276_v39 = vand.u32 4294901760, %v7081_v35  ;;  %6001 = vmatpush3.bf16.msra.mxu1 %v6000_v37  ;;  %v7112_v37 = vld [vmem:[#allocation5 + $0x198] sm:$0xff] }
  0x73   :  { %v661_v43 = vand.u32 4294901760, %v660_v58  ;;  %v668_v2 = vand.u32 4294901760, %v667_v56  ;;  %v549_v25 = vand.u32 4294901760, %v548_v32  ;;  %v555_v28 = vsub.f32 %v6860_v26, %v554_v62  ;;  %1274 = vmatprep.mubr.f32.mxu0 %v6854_v44  ;;  %v7115_v32 = vld [vmem:[#allocation5 + $0x110] sm:$0xff] }
  0x74   :  { %v434_v50 = vand.u32 4294901760, %v433_v16  ;;  %v439_v24 = vsub.f32 %v7085_v1, %v9268_v31  ;;  %6099 = vmatprep.subr.bf16.mxu0 %v6098_v12  ;;  %v6100_v10 = vpack.c.bf16 %v554_v62, %v547_v23  ;;  %v9275_v41 = vand.u32 4294901760, %v7092_v61  ;;  %v7126_v12 = vld [vmem:[#allocation5 + $0x1a0] sm:$0xff]  ;;  %v7130_v31 = vld [vmem:[#allocation5 + $0x1a8] sm:$0xff] }
  0x75   :  { %v6002_v58 = vpack.c.bf16 %v668_v2, %v661_v43  ;;  %v556_v56 = vand.u32 4294901760, %v555_v28  ;;  %v9274_v26 = vand.u32 4294901760, %v7100_v11  ;;  %v9273_v62 = vand.u32 4294901760, %v7104_v63 }
  0x76   :  { %435 = vmatprep.mubr.f32.mxu1 %v434_v50  ;;  %v440_v16 = vand.u32 4294901760, %v439_v24  ;;  %6101 = vmatpush3.bf16.msra.mxu0 %v6100_v10  ;;  %v7123_v23 = vpack.c.bf16 %v9275_v41, %v9276_v39  ;;  %v9272_v2 = vand.u32 4294901760, %v7110_v34  ;;  %v9271_v28 = vand.u32 4294901760, %v7112_v37  ;;  %v7220_v41 = vld [vmem:[#allocation5 + $0x1d8] sm:$0xff] }
  0x77   :  { %6003 = vmatprep.subr.bf16.mxu1 %v6002_v58  ;;  %v6004_v43 = vpack.c.bf16 %v556_v56, %v549_v25  ;;  %v7137_v24 = vpack.c.bf16 %v9273_v62, %v9274_v26  ;;  %v9278_v50 = vand.u32 4294901760, %v7115_v32  ;;  %v9277_v10 = vand.u32 4294901760, %v7117_v42  ;;  %v7141_v25 = vld [vmem:[#allocation5 + $0x120] sm:$0xff]  ;;  %v7143_v58 = vld [vmem:[#allocation5 + $0x128] sm:$0xff] }
  0x78   :  { %9609 = vst [vmem:[#allocation50_spill] sm:$0xff] %v7123_v23  ;;  %441 = vmatmul.mubr.f32.gmra.mrb[14].mxu1 %v440_v16  ;;  %6135 = vmatprep.subr.bf16.mxu0 %v7123_v23  ;;  %v7150_v56 = vpack.c.bf16 %v9271_v28, %v9272_v2  ;;  %v9280_v16 = vand.u32 4294901760, %v7126_v12  ;;  %v7186_v62 = vld [vmem:[#allocation5 + $0x1c0] sm:$0xff]  ;;  %v7188_v2 = vld [vmem:[#allocation5 + $0x1c8] sm:$0xff]  ;;  %v9637_v27 = vand.u32 4294901760, %v7220_v41 }
  0x79   :  { %9610 = vst [vmem:[#allocation51_spill] sm:$0xff] %v7137_v24  ;;  %6005 = vmatpush3.bf16.msra.mxu1 %v6004_v43  ;;  %671 = vmatprep.mubr.f32.mxu1 %v6854_v44  ;;  %v9279_v43 = vand.u32 4294901760, %v7130_v31  ;;  %v7166_v28 = vpack.c.bf16 %v9277_v10, %v9278_v50  ;;  %v7180_v10 = vld [vmem:[#allocation5 + $0x130] sm:$0xff]  ;;  %v7182_v50 = vld [vmem:[#allocation5 + $0x138] sm:$0xff]  ;;  %v9625_v44 = vand.u32 4294901760, %v7186_v62 }
  0x7a   :  { %9611 = vst [vmem:[#allocation52_spill] sm:$0xff] %v7150_v56  ;;  %6039 = vmatprep.subr.bf16.mxu1 %v6723_v13  ;;  %1276 = vmatmul.mubr.f32.vlgmr.msra.gmra.mrb[16].mxu0 %v6862_v54 }
  0x7b   :  { %6137 = vmatpush3.bf16.msra.mxu0 %v7137_v24  ;;  %1281 = vmatprep.mubr.f32.mxu0 %v6889_v52  ;;  %9612 = vst [vmem:[#allocation53_spill] sm:$0xff] %v7166_v28  ;;  %v7176_v26 = vpack.c.bf16 %v9279_v43, %v9280_v16  ;;  %v9614_v43 = vand.u32 4294901760, %v7141_v25  ;;  %v9615_v16 = vand.u32 4294901760, %v7143_v58  ;;  %v9617_v24 = vand.u32 4294901760, %v7153_v60 }
  0x7c   :  { %673 = vmatmul.mubr.f32.vlgmr.msra.gmra.mrb[16].mxu1 %v6862_v54  ;;  %6139 = vmatprep.subr.bf16.mxu0 %v7150_v56  ;;  %v7218_v56 = vld [vmem:[#allocation5 + $0x1d0] sm:$0xff]  ;;  %v9622_v54 = vand.u32 4294901760, %v7180_v10 }
  0x7d   :  { %9613 = vst [vmem:[#allocation54_spill] sm:$0xff] %v7176_v26  ;;  %6041 = vmatpush3.bf16.msra.mxu1 %v6731_v19  ;;  %678 = vmatprep.mubr.f32.mxu1 %v6889_v52  ;;  %v7198_v39 = vpack.c.bf16 %v9615_v16, %v9614_v43  ;;  %v7212_v16 = vld [vmem:[#allocation5 + $0x140] sm:$0xff]  ;;  %v7214_v43 = vld [vmem:[#allocation5 + $0x148] sm:$0xff]  ;;  %v9623_v52 = vand.u32 4294901760, %v7182_v50 }
  0x7e   :  { %6043 = vmatprep.subr.bf16.mxu1 %v6735_v21  ;;  %1283 = vmatmul.mubr.f32.gmra.mrb[18].mxu0 %v6906_v18  ;;  %v9633_v8 = vand.u32 4294901760, %v7214_v43 }
  0x7f   :  { %6141 = vmatpush3.bf16.msra.mxu0 %v7166_v28  ;;  %1288 = vmatprep.mubr.f32.mxu0 %v6924_v17  ;;  %9616 = vst [vmem:[#allocation55_spill] sm:$0xff] %v7198_v39  ;;  %v9618_v28 = vand.u32 4294901760, %v7155_v38 }
  0x80   :  { %680 = vmatmul.mubr.f32.gmra.mrb[18].mxu1 %v6906_v18  ;;  %6143 = vmatprep.subr.bf16.mxu0 %v7176_v26  ;;  %v7234_v26 = vpack.c.bf16 %v9623_v52, %v9622_v54  ;;  %v7248_v52 = vld [vmem:[#allocation5 + $0x1e0] sm:$0xff]  ;;  %v7250_v54 = vld [vmem:[#allocation5 + $0x1e8] sm:$0xff] }
  0x81   :  { %v7208_v23 = vpack.c.bf16 %v9618_v28, %v9617_v24  ;;  %6045 = vmatpush3.bf16.msra.mxu1 %v6754_v40  ;;  %685 = vmatprep.mubr.f32.mxu1 %v6924_v17  ;;  %v7224_v28 = vld [vmem:[#allocation5 + $0x150] sm:$0xff]  ;;  %v7226_v24 = vld [vmem:[#allocation5 + $0x158] sm:$0xff]  ;;  %9628 = vst [vmem:[#allocation61_spill] sm:$0xff] %v7248_v52  ;;  %9629 = vst [vmem:[#allocation62_spill] sm:$0xff] %v7250_v54 }
  0x82   :  { %6047 = vmatprep.subr.bf16.mxu1 %v6760_v46  ;;  %1290 = vmatmul.mubr.f32.gmra.mrb[20].mxu0 %v6933_v6  ;;  %9620 = vst [vmem:[#allocation57_spill] sm:$0xff] %v7224_v28  ;;  %9621 = vst [vmem:[#allocation58_spill] sm:$0xff] %v7226_v24  ;;  %v9630_v17 = vld [vmem:[#allocation11_spill] sm:$0xff]  ;;  %v9640_v18 = vld [vmem:[#allocation13_spill] sm:$0xff]  ;;  %v9641_v29 = vand.u32 4294901760, %v7224_v28 }
  0x83   :  { %9619 = vst [vmem:[#allocation56_spill] sm:$0xff] %v7208_v23  ;;  %6145 = vmatpush3.bf16.msra.mxu0 %v7198_v39  ;;  %1295 = vmatprep.mubr.f32.mxu0 %v6951_v22  ;;  %9624 = vst [vmem:[#allocation59_spill] sm:$0xff] %v7234_v26  ;;  %v9626_v39 = vand.u32 4294901760, %v7188_v2 }
  0x84   :  { %687 = vmatmul.mubr.f32.gmra.mrb[20].mxu1 %v6933_v6  ;;  %6147 = vmatprep.subr.bf16.mxu0 %v7208_v23  ;;  %v46_v6 = vld [vmem:[#allocation2 + $0x18] sm:$0xff]  ;;  %v52_v23 = vld [vmem:[#allocation2 + $0x48] sm:$0xff] }
  0x85   :  { %v7244_v1 = vpack.c.bf16 %v9626_v39, %v9625_v44  ;;  %6049 = vmatpush3.bf16.msra.mxu1 %v9630_v17  ;;  %692 = vmatprep.mubr.f32.mxu1 %v6951_v22  ;;  %v45_v44 = vld [vmem:[#allocation2 + $0x10] sm:$0xff]  ;;  %v9632_v39 = vand.u32 4294901760, %v7212_v16  ;;  %v7268_v22 = vld [vmem:[#allocation5 + $0x160] sm:$0xff]  ;;  %v7316_v17 = vld [vmem:[#allocation5 + $0x178] sm:$0xff] }
  0x86   :  { %6051 = vmatprep.subr.bf16.mxu1 %v9631_v57  ;;  %1297 = vmatmul.mubr.f32.gmra.mrb[22].mxu0 %v6963_v36  ;;  %v7292_v57 = vld [vmem:[#allocation5 + $0x1f8] sm:$0xff]  ;;  %v7294_v47 = vand.u32 4294901760, %v45_v44 }
  0x87   :  { %9627 = vst [vmem:[#allocation60_spill] sm:$0xff] %v7244_v1  ;;  %6149 = vmatpush3.bf16.msra.mxu0 %v7234_v26  ;;  %1302 = vmatprep.mubr.f32.mxu0 %v6981_v20  ;;  %v7264_v53 = vpack.c.bf16 %v9633_v8, %v9632_v39  ;;  %v9636_v26 = vand.u32 4294901760, %v7218_v56  ;;  %v7280_v8 = vld [vmem:[#allocation5 + $0x1f0] sm:$0xff]  ;;  %v7282_v39 = vand.u32 4294901760, %v46_v6 }
  0x88   :  { %694 = vmatmul.mubr.f32.gmra.mrb[22].mxu1 %v6963_v36  ;;  %6151 = vmatprep.subr.bf16.mxu0 %v7244_v1  ;;  %v9642_v36 = vand.u32 4294901760, %v7226_v24  ;;  %9644 = vst [vmem:[#allocation68_spill] sm:$0xff] %v7294_v47  ;;  %v9649_v24 = vand.u32 4294901760, %v7250_v54  ;;  %v9655_v54 = vand.u32 4294901760, %v7081_v35 }
  0x89   :  { %9634 = vst [vmem:[#allocation63_spill] sm:$0xff] %v7264_v53  ;;  %v7278_v4 = vpack.c.bf16 %v9637_v27, %v9636_v26  ;;  %9639 = vst [vmem:[#allocation66_spill] sm:$0xff] %v7282_v39  ;;  %6053 = vmatpush3.bf16.msra.mxu1 %v9640_v18  ;;  %699 = vmatprep.mubr.f32.mxu1 %v6981_v20  ;;  %v60_v27 = vld [vmem:[#allocation2 + $0x88] sm:$0xff]  ;;  %v7300_v20 = vld [vmem:[#allocation5 + $0x170] sm:$0xff]  ;;  %v7303_v28 = vsub.f32 %v46_v6, %v7282_v39  ;;  %v7321_v39 = vand.u32 4294901760, %v52_v23 }
  0x8a   :  { %v7290_v1 = vpack.c.bf16 %v9642_v36, %v9641_v29  ;;  %v9645_v26 = vld [vmem:[#allocation14_spill] sm:$0xff]  ;;  %1304 = vmatmul.mubr.f32.gmra.mrb[24].mxu0 %v6992_v14  ;;  %v7305_v36 = vand.u32 4294901760, %v53_v5  ;;  %v59_v29 = vld [vmem:[#allocation2 + $0x80] sm:$0xff]  ;;  %v7319_v6 = vsub.f32 %v45_v44, %v7294_v47  ;;  %v7335_v44 = vsub.f32 %v7081_v35, %v9655_v54 }
  0x8b   :  { %9638 = vst [vmem:[#allocation65_spill] sm:$0xff] %v7278_v4  ;;  %6055 = vmatprep.subr.bf16.mxu1 %v9645_v26  ;;  %9646 = vst [vmem:[#allocation69_spill] sm:$0xff] %v7303_v28  ;;  %6153 = vmatpush3.bf16.msra.mxu0 %v7264_v53  ;;  %v9648_v26 = vand.u32 4294901760, %v7248_v52  ;;  %v67_v18 = vld [vmem:[#allocation2 + $0xc0] sm:$0xff]  ;;  %v9656_v47 = vand.u32 4294901760, %v7092_v61  ;;  %v7345_v53 = vand.u32 4294901760, %v59_v29 }
  0x8c   :  { %9643 = vst [vmem:[#allocation67_spill] sm:$0xff] %v7290_v1  ;;  %9647 = vst [vmem:[#allocation70_spill] sm:$0xff] %v7305_v36  ;;  %1309 = vmatprep.mubr.f32.mxu0 %v7012_v9  ;;  %701 = vmatmul.mubr.f32.gmra.mrb[24].mxu1 %v6992_v14  ;;  %v9659_v52 = vld [vmem:[#allocation16_spill] sm:$0xff]  ;;  %v9660_v35 = vand.u32 4294901760, %v7268_v22  ;;  %v9661_v54 = vand.u32 4294901760, %v7270_v0 }
  0x8d   :  { %v7313_v15 = vpack.c.bf16 %v9649_v24, %v9648_v26  ;;  %9651 = vst [vmem:[#allocation72_spill] sm:$0xff] %v7319_v6  ;;  %9652 = vst [vmem:[#allocation73_spill] sm:$0xff] %v7321_v39  ;;  %6155 = vmatprep.subr.bf16.mxu0 %v7278_v4  ;;  %v7328_v24 = vsub.f32 %v53_v5, %v7305_v36  ;;  %v7330_v26 = vand.u32 4294901760, %v60_v27  ;;  %v9657_v4 = vld [vmem:[#allocation15_spill] sm:$0xff]  ;;  %706 = vmatprep.mubr.f32.mxu1 %v7012_v9  ;;  %v66_v5 = vld [vmem:[#allocation2 + $0xb8] sm:$0xff] }
  0x8e   :  { %v7340_v14 = vsub.f32 %v7092_v61, %v9656_v47  ;;  %6057 = vmatpush3.bf16.msra.mxu1 %v9657_v4  ;;  %9658 = vst [vmem:[#allocation76_spill] sm:$0xff] %v7345_v53  ;;  %1311 = vmatmul.mubr.f32.gmra.mrb[26].mxu0 %v7020_v55  ;;  %v7353_v36 = vpack.c.bf16 %v9661_v54, %v9660_v35  ;;  %v7369_v54 = vand.u32 4294901760, %v67_v18  ;;  %v9667_v47 = vand.u32 4294901760, %v7100_v11 }
  0x8f   :  { %9650 = vst [vmem:[#allocation71_spill] sm:$0xff] %v7313_v15  ;;  %9653 = vst [vmem:[#allocation74_spill] sm:$0xff] %v7328_v24  ;;  %6059 = vmatprep.subr.bf16.mxu1 %v9659_v52  ;;  %v7358_v9 = vsub.f32 %v52_v23, %v7321_v39  ;;  %6157 = vmatpush3.bf16.msra.mxu0 %v7290_v1  ;;  %v9664_v52 = vand.u32 4294901760, %v7303_v28  ;;  %v7367_v35 = vsub.f32 %v60_v27, %v7330_v26 }
  0x90   :  { %9654 = vst [vmem:[#allocation75_spill] sm:$0xff] %v7330_v26  ;;  %9662 = vst [vmem:[#allocation77_spill] sm:$0xff] %v7353_v36  ;;  %1316 = vmatprep.mubr.f32.mxu0 %v7039_v33  ;;  %v7374_v23 = vsub.f32 %v7100_v11, %v9667_v47  ;;  %v9668_v61 = vand.u32 4294901760, %v7104_v63  ;;  %708 = vmatmul.mubr.f32.gmra.mrb[26].mxu1 %v7020_v55  ;;  %v9670_v27 = vand.u32 4294901760, %v7292_v57  ;;  %v9672_v26 = vand.u32 4294901760, %v7110_v34 }
  0x91   :  { %9663 = vst [vmem:[#allocation78_spill] sm:$0xff] %v7358_v9  ;;  %v1582_v4 = vsub.f32 %v7303_v28, %v9664_v52  ;;  %9665 = vst [vmem:[#allocation79_spill] sm:$0xff] %v7367_v35  ;;  %6159 = vmatprep.subr.bf16.mxu0 %v7313_v15  ;;  %v9669_v52 = vand.u32 4294901760, %v7280_v8  ;;  %v9673_v47 = vand.u32 4294901760, %v7112_v37  ;;  %713 = vmatprep.mubr.f32.mxu1 %v7039_v33  ;;  %v7404_v39 = vand.u32 4294901760, %v66_v5 }
  0x92   :  { %9666 = vst [vmem:[#allocation80_spill] sm:$0xff] %v7369_v54  ;;  %v7379_v1 = vsub.f32 %v7104_v63, %v9668_v61  ;;  %v7392_v11 = vsub.f32 %v7110_v34, %v9672_v26  ;;  %v9674_v61 = vld [vmem:[#allocation17_spill] sm:$0xff]  ;;  %v7402_v15 = vsub.f32 %v59_v29, %v7345_v53  ;;  %v9678_v26 = vld [vmem:[#allocation18_spill] sm:$0xff]  ;;  %1318 = vmatmul.mubr.f32.gmra.mrb[28].mxu0 %v7048_v59  ;;  %v9684_v28 = vand.u32 4294901760, %v7328_v24 }
  0x93   :  { %v7387_v0 = vpack.c.bf16 %v9670_v27, %v9669_v52  ;;  %v7397_v63 = vsub.f32 %v7112_v37, %v9673_v47  ;;  %6061 = vmatpush3.bf16.msra.mxu1 %v9674_v61  ;;  %9676 = vst [vmem:[#allocation82_spill] sm:$0xff] %v7404_v39  ;;  %v74_v52 = vld [vmem:[#allocation2 + $0xf8] sm:$0xff]  ;;  %v9677_v27 = vand.u32 4294901760, %v7115_v32  ;;  %v9679_v37 = vand.u32 4294901760, %v7319_v6  ;;  %6161 = vmatpush3.bf16.msra.mxu0 %v7353_v36 }
  0x94   :  { %9675 = vst [vmem:[#allocation17_spill] sm:$0xff] %v7402_v15  ;;  %6063 = vmatprep.subr.bf16.mxu1 %v9678_v26  ;;  %v7418_v29 = vsub.f32 %v67_v18, %v7369_v54  ;;  %1323 = vmatprep.mubr.f32.mxu0 %v7068_v48  ;;  %v1583_v55 = vand.u32 4294901760, %v1582_v4  ;;  %v9685_v18 = vand.u32 4294901760, %v7117_v42  ;;  %v9686_v54 = vand.u32 4294901760, %v7126_v12 }
  0x95   :  { %9671 = vst [vmem:[#allocation81_spill] sm:$0xff] %v7387_v0  ;;  %v7409_v34 = vsub.f32 %v7115_v32, %v9677_v27  ;;  %v1588_v47 = vsub.f32 %v7319_v6, %v9679_v37  ;;  %v9681_v32 = vand.u32 4294901760, %v7300_v20  ;;  %v9682_v27 = vand.u32 4294901760, %v7316_v17  ;;  %v73_v6 = vld [vmem:[#allocation2 + $0xf0] sm:$0xff]  ;;  %715 = vmatmul.mubr.f32.gmra.mrb[28].mxu1 %v7048_v59  ;;  %6163 = vmatprep.subr.bf16.mxu0 %v7387_v0 }
  0x96   :  { %9680 = vst [vmem:[#allocation83_spill] sm:$0xff] %v7418_v29  ;;  %v1597_v37 = vsub.f32 %v7328_v24, %v9684_v28  ;;  %v7435_v36 = vsub.f32 %v7117_v42, %v9685_v18  ;;  %v7440_v26 = vsub.f32 %v7126_v12, %v9686_v54  ;;  %v6198_v4 = vpack.c.bf16 %v7340_v14, %v7335_v44  ;;  %v9689_v18 = vld [vmem:[#allocation19_spill] sm:$0xff] }
  0x97   :  { %v7426_v53 = vpack.c.bf16 %v9682_v27, %v9681_v32  ;;  %v7446_v28 = vand.u32 4294901760, %v74_v52  ;;  %v81_v32 = vld [vmem:[#allocation2 + $0x130] sm:$0xff]  ;;  %v9688_v27 = vand.u32 4294901760, %v7130_v31  ;;  %6065 = vmatpush3.bf16.msra.mxu1 %v9689_v18  ;;  %720 = vmatprep.mubr.f32.mxu1 %v7068_v48  ;;  %v6200_v12 = vpack.c.bf16 %v7379_v1, %v7374_v23 }
  0x98   :  { %v7459_v33 = vsub.f32 %v66_v5, %v7404_v39  ;;  %6067 = vmatprep.subr.bf16.mxu1 %v6850_v30  ;;  %1325 = vmatmul.mubr.f32.gmra.mrb[30].mxu0 %v7076_v45  ;;  %v1589_v0 = vand.u32 4294901760, %v1588_v47  ;;  %v7467_v48 = vand.u32 4294901760, %v73_v6  ;;  %v1598_v54 = vand.u32 4294901760, %v1597_v37  ;;  %v80_v30 = vld [vmem:[#allocation2 + $0x128] sm:$0xff] }
  0x99   :  { %9683 = vst [vmem:[#allocation84_spill] sm:$0xff] %v7426_v53  ;;  %9687 = vst [vmem:[#allocation85_spill] sm:$0xff] %v7446_v28  ;;  %v7451_v42 = vsub.f32 %v7130_v31, %v9688_v27  ;;  %v9691_v31 = vand.u32 4294901760, %v7358_v9  ;;  %6165 = vmatpush3.bf16.msra.mxu0 %v7426_v53  ;;  %1584 = vmatprep.mubr.f32.mxu0 %v1583_v55  ;;  %v9693_v5 = vand.u32 4294901760, %v7367_v35  ;;  %v7476_v47 = vand.u32 4294901760, %v81_v32  ;;  %v88_v37 = vld [vmem:[#allocation2 + $0x168] sm:$0xff] }
  0x9a   :  { %9690 = vst [vmem:[#allocation19_spill] sm:$0xff] %v7459_v33  ;;  %9692 = vst [vmem:[#allocation86_spill] sm:$0xff] %v7467_v48  ;;  %v7474_v24 = vsub.f32 %v74_v52, %v7446_v28  ;;  %722 = vmatmul.mubr.f32.gmra.mrb[30].mxu1 %v7076_v45  ;;  %6199 = vmatprep.subr.bf16.mxu0 %v6198_v4  ;;  %v6202_v52 = vpack.c.bf16 %v7397_v63, %v7392_v11  ;;  %v9699_v28 = vld [vmem:[#allocation22_spill] sm:$0xff] }
  0x9b   :  { %v1603_v27 = vsub.f32 %v7358_v9, %v9691_v31  ;;  %v1612_v39 = vsub.f32 %v7367_v35, %v9693_v5  ;;  %9695 = vst [vmem:[#allocation88_spill] sm:$0xff] %v7476_v47  ;;  %v9696_v31 = vand.u32 4294901760, %v7141_v25  ;;  %v9697_v9 = vand.u32 4294901760, %v7143_v58  ;;  %6069 = vmatpush3.bf16.msra.mxu1 %v9699_v28 }
  0x9c   :  { %9694 = vst [vmem:[#allocation87_spill] sm:$0xff] %v7474_v24  ;;  %v9698_v5 = vand.u32 4294901760, %v7153_v60  ;;  %6103 = vmatprep.subr.bf16.mxu1 %v6723_v13  ;;  %1590 = vmatmul.mubr.f32.vlgmr.msra.gmra.mrb[32].mxu0 %v1589_v0  ;;  %v7516_v45 = vsub.f32 %v81_v32, %v7476_v47  ;;  %v7518_v13 = vand.u32 4294901760, %v88_v37  ;;  %v87_v0 = vld [vmem:[#allocation2 + $0x160] sm:$0xff]  ;;  %v6206_v32 = vpack.c.bf16 %v7451_v42, %v7440_v26  ;;  %v9764_v47 = vld [vmem:[#allocation39_spill] sm:$0xff] }
  0x9d   :  { %v7481_v59 = vsub.f32 %v7141_v25, %v9696_v31  ;;  %v7486_v55 = vsub.f32 %v7143_v58, %v9697_v9  ;;  %v9700_v25 = vld [vmem:[#allocation24_spill] sm:$0xff]  ;;  %v6204_v9 = vpack.c.bf16 %v7435_v36, %v7409_v34  ;;  %v9702_v58 = vand.u32 4294901760, %v7402_v15  ;;  %6201 = vmatpush3.bf16.msra.mxu0 %v6200_v12  ;;  %1599 = vmatprep.mubr.f32.mxu0 %v1598_v54  ;;  %v95_v12 = vld [vmem:[#allocation2 + $0x1a0] sm:$0xff] }
  0x9e   :  { %v7494_v53 = vsub.f32 %v7153_v60, %v9698_v5  ;;  %v9701_v31 = vand.u32 4294901760, %v9700_v25  ;;  %v1604_v35 = vand.u32 4294901760, %v1603_v27  ;;  %v9703_v60 = vand.u32 4294901760, %v7418_v29  ;;  %9706 = vst [vmem:[#allocation90_spill] sm:$0xff] %v7516_v45  ;;  %9707 = vst [vmem:[#allocation91_spill] sm:$0xff] %v7518_v13  ;;  %6203 = vmatprep.subr.bf16.mxu0 %v6202_v52 }
  0x9f   :  { %v1618_v4 = vsub.f32 %v7402_v15, %v9702_v58  ;;  %v7510_v25 = vsub.f32 %v73_v6, %v7467_v48  ;;  %v1613_v28 = vand.u32 4294901760, %v1612_v39  ;;  %v9708_v27 = vand.u32 4294901760, %v7155_v38 }
  0xa0   :  { %1027 = vmatprep.mubr.f32.mxu1 %v9701_v31  ;;  %v1627_v5 = vsub.f32 %v7418_v29, %v9703_v60  ;;  %v7512_v31 = vand.u32 4294901760, %v80_v30  ;;  %v9709_v6 = vand.u32 4294901760, %v7180_v10  ;;  %v9710_v39 = vand.u32 4294901760, %v6876_v7  ;;  %1605 = vmatmul.mubr.f32.gmra.mrb[34].mxu0 %v1604_v35  ;;  %v94_v35 = vld [vmem:[#allocation2 + $0x198] sm:$0xff] }
  0xa1   :  { %9704 = vst [vmem:[#allocation24_spill] sm:$0xff] %v7510_v25  ;;  %v7523_v60 = vsub.f32 %v7155_v38, %v9708_v27  ;;  %v9711_v54 = vand.u32 4294901760, %v7182_v50  ;;  %v9712_v38 = vand.u32 4294901760, %v6904_v51  ;;  %v6208_v7 = vpack.c.bf16 %v7486_v55, %v7481_v59  ;;  %6205 = vmatpush3.bf16.msra.mxu0 %v6204_v9  ;;  %1614 = vmatprep.mubr.f32.mxu0 %v1613_v28 }
  0xa2   :  { %9705 = vst [vmem:[#allocation89_spill] sm:$0xff] %v7512_v31  ;;  %v7528_v48 = vsub.f32 %v7180_v10, %v9709_v6  ;;  %1031 = vmatmul.mubr.f32.vlgmr.msra.gmra.mrb[32].mxu1 %v9710_v39  ;;  %v1619_v10 = vand.u32 4294901760, %v1618_v4  ;;  %v9713_v52 = vand.u32 4294901760, %v7459_v33  ;;  %v1628_v6 = vand.u32 4294901760, %v1627_v5  ;;  %6207 = vmatprep.subr.bf16.mxu0 %v6206_v32 }
  0xa3   :  { %v7537_v58 = vsub.f32 %v7182_v50, %v9711_v54  ;;  %6105 = vmatpush3.bf16.msra.mxu1 %v6731_v19  ;;  %1038 = vmatprep.mubr.f32.mxu1 %v9712_v38  ;;  %v9381_v50 = vand.u32 4294901760, %v7510_v25  ;;  %v7550_v39 = vsub.f32 %v80_v30, %v7512_v31  ;;  %v7552_v19 = vand.u32 4294901760, %v87_v0 }
  0xa4   :  { %v1633_v27 = vsub.f32 %v7459_v33, %v9713_v52  ;;  %6107 = vmatprep.subr.bf16.mxu1 %v6735_v21  ;;  %v9716_v51 = vand.u32 4294901760, %v7474_v24  ;;  %v7559_v38 = vsub.f32 %v88_v37, %v7518_v13  ;;  %v7561_v21 = vand.u32 4294901760, %v95_v12  ;;  %1620 = vmatmul.mubr.f32.gmra.mrb[36].mxu0 %v1619_v10 }
  0xa5   :  { %9714 = vst [vmem:[#allocation92_spill] sm:$0xff] %v7550_v39  ;;  %9715 = vst [vmem:[#allocation93_spill] sm:$0xff] %v7552_v19  ;;  %v9719_v5 = vand.u32 4294901760, %v7186_v62  ;;  %v9720_v9 = vand.u32 4294901760, %v7188_v2  ;;  %v9721_v52 = vand.u32 4294901760, %v6912_v3  ;;  %v6210_v37 = vpack.c.bf16 %v7523_v60, %v7494_v53  ;;  %6209 = vmatpush3.bf16.msra.mxu0 %v6208_v7  ;;  %1629 = vmatprep.mubr.f32.mxu0 %v1628_v6  ;;  %v9731_v6 = vld [vmem:[#allocation29_spill] sm:$0xff] }
  0xa6   :  { %v1642_v4 = vsub.f32 %v7474_v24, %v9716_v51  ;;  %9717 = vst [vmem:[#allocation94_spill] sm:$0xff] %v7559_v38  ;;  %9718 = vst [vmem:[#allocation95_spill] sm:$0xff] %v7561_v21  ;;  %v9722_v51 = vand.u32 4294901760, %v7212_v16  ;;  %v1634_v3 = vand.u32 4294901760, %v1633_v27  ;;  %v6212_v32 = vpack.c.bf16 %v7537_v58, %v7528_v48 }
  0xa7   :  { %v7566_v30 = vsub.f32 %v7186_v62, %v9719_v5  ;;  %v7571_v28 = vsub.f32 %v7188_v2, %v9720_v9  ;;  %1042 = vmatmul.mubr.f32.gmra.mrb[34].mxu1 %v9721_v52  ;;  %v9723_v62 = vand.u32 4294901760, %v7214_v43  ;;  %v9724_v2 = vand.u32 4294901760, %v6931_v49  ;;  %6211 = vmatprep.subr.bf16.mxu0 %v6210_v37  ;;  %v9737_v9 = vld [vmem:[#allocation11_spill] sm:$0xff] }
  0xa8   :  { %v7580_v54 = vsub.f32 %v7212_v16, %v9722_v51  ;;  %6109 = vmatpush3.bf16.msra.mxu1 %v6754_v40  ;;  %v1648_v16 = vsub.f32 %v7510_v25, %v9381_v50  ;;  %v7600_v40 = vand.u32 4294901760, %v94_v35  ;;  %v1643_v49 = vand.u32 4294901760, %v1642_v4  ;;  %1635 = vmatmul.mubr.f32.gmra.mrb[38].mxu0 %v1634_v3 }
  0xa9   :  { %v7585_v5 = vsub.f32 %v7214_v43, %v9723_v62  ;;  %1049 = vmatprep.mubr.f32.mxu1 %v9724_v2  ;;  %6111 = vmatprep.subr.bf16.mxu1 %v6760_v46  ;;  %v7598_v43 = vsub.f32 %v87_v0, %v7552_v19  ;;  %v9727_v27 = vand.u32 4294901760, %v7516_v45  ;;  %v7607_v10 = vsub.f32 %v95_v12, %v7561_v21  ;;  %v9735_v46 = vld [vmem:[#allocation58_spill] sm:$0xff]  ;;  %v9753_v19 = vld [vmem:[#allocation13_spill] sm:$0xff] }
  0xaa   :  { %9726 = vst [vmem:[#allocation97_spill] sm:$0xff] %v7600_v40  ;;  %v9729_v51 = vand.u32 4294901760, %v7218_v56  ;;  %v9730_v0 = vand.u32 4294901760, %v7220_v41  ;;  %v9732_v4 = vand.u32 4294901760, %v9731_v6  ;;  %v6214_v2 = vpack.c.bf16 %v7571_v28, %v7566_v30  ;;  %v9740_v6 = vld [vmem:[#allocation12_spill] sm:$0xff]  ;;  %6213 = vmatpush3.bf16.msra.mxu0 %v6212_v32  ;;  %1644 = vmatprep.mubr.f32.mxu0 %v1643_v49  ;;  %v9748_v49 = vld [vmem:[#allocation33_spill] sm:$0xff] }
  0xab   :  { %9725 = vst [vmem:[#allocation96_spill] sm:$0xff] %v7598_v43  ;;  %v1657_v52 = vsub.f32 %v7516_v45, %v9727_v27  ;;  %9728 = vst [vmem:[#allocation98_spill] sm:$0xff] %v7607_v10  ;;  %v9733_v27 = vld [vmem:[#allocation57_spill] sm:$0xff]  ;;  %v1649_v37 = vand.u32 4294901760, %v1648_v16 }
  0xac   :  { %v7612_v62 = vsub.f32 %v7218_v56, %v9729_v51  ;;  %v7617_v7 = vsub.f32 %v7220_v41, %v9730_v0  ;;  %1053 = vmatmul.mubr.f32.gmra.mrb[36].mxu1 %v9732_v4  ;;  %v9734_v12 = vand.u32 4294901760, %v9733_v27  ;;  %v9736_v56 = vand.u32 4294901760, %v9735_v46  ;;  %v9738_v41 = vld [vmem:[#allocation31_spill] sm:$0xff]  ;;  %6215 = vmatprep.subr.bf16.mxu0 %v6214_v2 }
  0xad   :  { %6113 = vmatpush3.bf16.msra.mxu1 %v9737_v9  ;;  %v9739_v0 = vand.u32 4294901760, %v9738_v41  ;;  %v9741_v4 = vand.u32 4294901760, %v7550_v39  ;;  %v6216_v9 = vpack.c.bf16 %v7585_v5, %v7580_v54  ;;  %v9744_v41 = vld [vmem:[#allocation61_spill] sm:$0xff]  ;;  %v1815_v2 = vand.u32 4294901760, %v7335_v44  ;;  %1650 = vmatmul.mubr.f32.gmra.mrb[40].mxu0 %v1649_v37 }
  0xae   :  { %v7626_v50 = vsub.f32 %v9733_v27, %v9734_v12  ;;  %v7631_v51 = vsub.f32 %v9735_v46, %v9736_v56  ;;  %6115 = vmatprep.subr.bf16.mxu1 %v9740_v6  ;;  %v7642_v12 = vsub.f32 %v94_v35, %v7600_v40  ;;  %v1658_v46 = vand.u32 4294901760, %v1657_v52  ;;  %v9751_v40 = vld [vmem:[#allocation64_spill] sm:$0xff] }
  0xaf   :  { %1060 = vmatprep.mubr.f32.mxu1 %v9739_v0  ;;  %v1663_v21 = vsub.f32 %v7550_v39, %v9741_v4  ;;  %v9743_v56 = vand.u32 4294901760, %v7559_v38  ;;  %v9745_v0 = vand.u32 4294901760, %v9744_v41  ;;  %v9746_v4 = vld [vmem:[#allocation62_spill] sm:$0xff]  ;;  %v9749_v27 = vand.u32 4294901760, %v9748_v49  ;;  %6217 = vmatpush3.bf16.msra.mxu0 %v6216_v9  ;;  %v9761_v9 = vld [vmem:[#allocation37_spill] sm:$0xff] }
  0xb0   :  { %9742 = vst [vmem:[#allocation29_spill] sm:$0xff] %v7642_v12  ;;  %v9747_v35 = vand.u32 4294901760, %v9746_v4  ;;  %v6218_v52 = vpack.c.bf16 %v7617_v7, %v7612_v62  ;;  %v9756_v49 = vld [vmem:[#allocation14_spill] sm:$0xff]  ;;  %1659 = vmatprep.mubr.f32.mxu0 %v1658_v46  ;;  %v9759_v37 = vand.u32 4294901760, %v7280_v8  ;;  %v9762_v46 = vand.u32 4294901760, %v9761_v9  ;;  %v9780_v39 = vld [vmem:[#allocation69_spill] sm:$0xff] }
  0xb1   :  { %v1672_v3 = vsub.f32 %v7559_v38, %v9743_v56  ;;  %v7653_v6 = vsub.f32 %v9744_v41, %v9745_v0  ;;  %1064 = vmatmul.mubr.f32.gmra.mrb[38].mxu1 %v9749_v27  ;;  %v9750_v56 = vand.u32 4294901760, %v7268_v22  ;;  %v9752_v41 = vand.u32 4294901760, %v9751_v40 }
  0xb2   :  { %v7658_v32 = vsub.f32 %v9746_v4, %v9747_v35  ;;  %6117 = vmatpush3.bf16.msra.mxu1 %v9753_v19  ;;  %v9754_v4 = vld [vmem:[#allocation35_spill] sm:$0xff]  ;;  %v1822_v27 = vand.u32 4294901760, %v7340_v14  ;;  %v1664_v13 = vand.u32 4294901760, %v1663_v21  ;;  %v1710_v21 = vand.u32 4294901760, %v7379_v1  ;;  %6219 = vmatprep.subr.bf16.mxu0 %v6218_v52 }
  0xb3   :  { %v7667_v16 = vsub.f32 %v7268_v22, %v9750_v56  ;;  %v7672_v0 = vsub.f32 %v9751_v40, %v9752_v41  ;;  %v9755_v35 = vand.u32 4294901760, %v9754_v4  ;;  %6119 = vmatprep.subr.bf16.mxu1 %v9756_v49  ;;  %v6220_v22 = vpack.c.bf16 %v7631_v51, %v7626_v50 }
  0xb4   :  { %v9757_v56 = vand.u32 4294901760, %v7598_v43  ;;  %v1673_v41 = vand.u32 4294901760, %v1672_v3  ;;  %v9758_v4 = vand.u32 4294901760, %v7607_v10  ;;  %v1703_v49 = vand.u32 4294901760, %v7374_v23  ;;  %1665 = vmatmul.mubr.f32.gmra.mrb[42].mxu0 %v1664_v13 }
  0xb5   :  { %1071 = vmatprep.mubr.f32.mxu1 %v9755_v35  ;;  %v7694_v31 = vsub.f32 %v7280_v8, %v9759_v37  ;;  %v6222_v3 = vpack.c.bf16 %v7658_v32, %v7653_v6  ;;  %v1816_v8 = vsub.f32 %v7335_v44, %v1815_v2  ;;  %v1823_v37 = vsub.f32 %v7340_v14, %v1822_v27 }
  0xb6   :  { %v1678_v40 = vsub.f32 %v7598_v43, %v9757_v56  ;;  %v1687_v35 = vsub.f32 %v7607_v10, %v9758_v4  ;;  %v9760_v56 = vand.u32 4294901760, %v7292_v57  ;;  %1075 = vmatmul.mubr.f32.gmra.mrb[40].mxu1 %v9762_v46  ;;  %v9763_v4 = vld [vmem:[#allocation15_spill] sm:$0xff]  ;;  %v9765_v10 = vand.u32 4294901760, %v9764_v47  ;;  %v9768_v47 = vld [vmem:[#allocation16_spill] sm:$0xff]  ;;  %6221 = vmatpush3.bf16.msra.mxu0 %v6220_v22 }
  0xb7   :  { %6121 = vmatpush3.bf16.msra.mxu1 %v9763_v4  ;;  %v1829_v43 = vand.u32 4294901760, %v7392_v11  ;;  %v9767_v9 = vand.u32 4294901760, %v7316_v17  ;;  %v9769_v14 = vand.u32 4294901760, %v7642_v12  ;;  %1674 = vmatprep.mubr.f32.mxu0 %v1673_v41  ;;  %v6224_v4 = vpack.c.bf16 %v7672_v0, %v7667_v16  ;;  %v9772_v41 = vld [vmem:[#allocation43_spill] sm:$0xff] }
  0xb8   :  { %v7699_v19 = vsub.f32 %v7292_v57, %v9760_v56  ;;  %1082 = vmatprep.mubr.f32.mxu1 %v9765_v10  ;;  %v1836_v57 = vand.u32 4294901760, %v7397_v63  ;;  %v9766_v56 = vand.u32 4294901760, %v7300_v20  ;;  %6123 = vmatprep.subr.bf16.mxu1 %v9768_v47  ;;  %v1679_v44 = vand.u32 4294901760, %v1678_v40 }
  0xb9   :  { %v7720_v46 = vsub.f32 %v7316_v17, %v9767_v9  ;;  %v1693_v10 = vsub.f32 %v7642_v12, %v9769_v14  ;;  %v1711_v38 = vsub.f32 %v7379_v1, %v1710_v21  ;;  %v9770_v17 = vld [vmem:[#allocation41_spill] sm:$0xff]  ;;  %6223 = vmatprep.subr.bf16.mxu0 %v6222_v3  ;;  %v1717_v40 = vand.u32 4294901760, %v7409_v34 }
  0xba   :  { %v7715_v52 = vsub.f32 %v7300_v20, %v9766_v56  ;;  %v1688_v20 = vand.u32 4294901760, %v1687_v35  ;;  %v1704_v56 = vsub.f32 %v7374_v23, %v1703_v49  ;;  %v9771_v9 = vand.u32 4294901760, %v9770_v17  ;;  %v9774_v17 = vld [vmem:[#allocation18_spill] sm:$0xff]  ;;  %1680 = vmatmul.mubr.f32.gmra.mrb[44].mxu0 %v1679_v44 }
  0xbb   :  { %v6226_v13 = vpack.c.bf16 %v7699_v19, %v7694_v31  ;;  %v1724_v22 = vand.u32 4294901760, %v7435_v36  ;;  %6125 = vmatpush3.bf16.msra.mxu1 %v9674_v61  ;;  %v9773_v47 = vand.u32 4294901760, %v9772_v41  ;;  %v1817_v35 = vand.u32 4294901760, %v1816_v8  ;;  %6225 = vmatpush3.bf16.msra.mxu0 %v6224_v4  ;;  %v9777_v4 = vld [vmem:[#allocation47_spill] sm:$0xff] }
  0xbc   :  { %1086 = vmatmul.mubr.f32.gmra.mrb[42].mxu1 %v9771_v9  ;;  %v1824_v23 = vand.u32 4294901760, %v1823_v37  ;;  %v1830_v1 = vsub.f32 %v7392_v11, %v1829_v43  ;;  %v1837_v14 = vsub.f32 %v7397_v63, %v1836_v57  ;;  %6127 = vmatprep.subr.bf16.mxu1 %v9774_v17  ;;  %v1694_v3 = vand.u32 4294901760, %v1693_v10 }
  0xbd   :  { %1093 = vmatprep.mubr.f32.mxu1 %v9773_v47  ;;  %v1843_v9 = vand.u32 4294901760, %v7440_v26  ;;  %v1850_v12 = vand.u32 4294901760, %v7451_v42  ;;  %1689 = vmatprep.mubr.f32.mxu0 %v1688_v20  ;;  %v6228_v61 = vpack.c.bf16 %v7720_v46, %v7715_v52  ;;  %v1705_v41 = vand.u32 4294901760, %v1704_v56  ;;  %v9775_v47 = vld [vmem:[#allocation45_spill] sm:$0xff] }
  0xbe   :  { %v1712_v8 = vand.u32 4294901760, %v1711_v38  ;;  %v6262_v37 = vpack.c.bf16 %v1822_v27, %v1815_v2  ;;  %v9776_v11 = vand.u32 4294901760, %v9775_v47  ;;  %6227 = vmatprep.subr.bf16.mxu0 %v6226_v13  ;;  %v1718_v63 = vsub.f32 %v7409_v34, %v1717_v40  ;;  %v9779_v47 = vld [vmem:[#allocation20_spill] sm:$0xff]  ;;  %1695 = vmatmul.mubr.f32.gmra.mrb[46].mxu0 %v1694_v3  ;;  %v9783_v3 = vld [vmem:[#allocation22_spill] sm:$0xff] }
  0xbf   :  { %v1725_v44 = vsub.f32 %v7435_v36, %v1724_v22  ;;  %v1731_v10 = vand.u32 4294901760, %v7481_v59  ;;  %v1738_v17 = vand.u32 4294901760, %v7486_v55  ;;  %6129 = vmatpush3.bf16.msra.mxu1 %v9689_v18  ;;  %v9778_v20 = vand.u32 4294901760, %v9777_v4  ;;  %6229 = vmatpush3.bf16.msra.mxu0 %v6228_v61  ;;  %v9784_v61 = vld [vmem:[#allocation21_spill] sm:$0xff] }
  0xc0   :  { %1097 = vmatmul.mubr.f32.gmra.mrb[44].mxu1 %v9776_v11  ;;  %v6166_v56 = vpack.c.bf16 %v1824_v23, %v1817_v35  ;;  %v6264_v38 = vpack.c.bf16 %v1710_v21, %v1703_v49  ;;  %v1831_v2 = vand.u32 4294901760, %v1830_v1  ;;  %v1838_v27 = vand.u32 4294901760, %v1837_v14  ;;  %6131 = vmatprep.subr.bf16.mxu1 %v9779_v47  ;;  %v9781_v35 = vld [vmem:[#allocation49_spill] sm:$0xff] }
  0xc1   :  { %1104 = vmatprep.mubr.f32.mxu1 %v9778_v20  ;;  %v1844_v34 = vsub.f32 %v7440_v26, %v1843_v9  ;;  %v1851_v36 = vsub.f32 %v7451_v42, %v1850_v12  ;;  %v1857_v13 = vand.u32 4294901760, %v7494_v53  ;;  %v1864_v11 = vand.u32 4294901760, %v7523_v60  ;;  %2111 = vmatprep.mubr.f32.mxu0 %v9780_v39  ;;  %v9785_v20 = vld [vmem:[#allocation72_spill] sm:$0xff] }
  0xc2   :  { %v6168_v18 = vpack.c.bf16 %v1712_v8, %v1705_v41  ;;  %v6266_v4 = vpack.c.bf16 %v1836_v57, %v1829_v43  ;;  %v1745_v49 = vand.u32 4294901760, %v7528_v48  ;;  %v1752_v21 = vand.u32 4294901760, %v7537_v58  ;;  %6263 = vmatprep.subr.bf16.mxu0 %v6262_v37  ;;  %2114 = vmatmul.mubr.f32.vlgmr.msra.gmra.mrb[48].mxu0 %v9785_v20 }
  0xc3   :  { %v9782_v23 = vand.u32 4294901760, %v9781_v35  ;;  %v1719_v26 = vand.u32 4294901760, %v1718_v63  ;;  %v1726_v1 = vand.u32 4294901760, %v1725_v44  ;;  %v1732_v42 = vsub.f32 %v7481_v59, %v1731_v10  ;;  %6133 = vmatpush3.bf16.msra.mxu1 %v9783_v3  ;;  %6265 = vmatpush3.bf16.msra.mxu0 %v6264_v38 }
  0xc4   :  { %v1739_v14 = vsub.f32 %v7486_v55, %v1738_v17  ;;  %v6170_v41 = vpack.c.bf16 %v1838_v27, %v1831_v2  ;;  %v6268_v43 = vpack.c.bf16 %v1724_v22, %v1717_v40  ;;  %v1871_v57 = vand.u32 4294901760, %v7566_v30  ;;  %6167 = vmatprep.subr.bf16.mxu1 %v6166_v56  ;;  %v9786_v55 = vld [vmem:[#allocation74_spill] sm:$0xff]  ;;  %v9787_v2 = vld [vmem:[#allocation23_spill] sm:$0xff]  ;;  %6267 = vmatprep.subr.bf16.mxu0 %v6266_v4 }
  0xc5   :  { %1108 = vmatmul.mubr.f32.gmra.mrb[46].mxu1 %v9782_v23  ;;  %v1878_v8 = vand.u32 4294901760, %v7571_v28  ;;  %v1845_v37 = vand.u32 4294901760, %v1844_v34  ;;  %v1852_v63 = vand.u32 4294901760, %v1851_v36  ;;  %v1858_v44 = vsub.f32 %v7494_v53, %v1857_v13  ;;  %2120 = vmatprep.mubr.f32.mxu0 %v9786_v55  ;;  %v9789_v23 = vld [vmem:[#allocation78_spill] sm:$0xff] }
  0xc6   :  { %1427 = vmatprep.mubr.f32.mxu1 %v9784_v61  ;;  %v1865_v59 = vsub.f32 %v7523_v60, %v1864_v11  ;;  %v6270_v47 = vpack.c.bf16 %v1850_v12, %v1843_v9  ;;  %v1746_v40 = vsub.f32 %v7528_v48, %v1745_v49  ;;  %v1753_v22 = vsub.f32 %v7537_v58, %v1752_v21  ;;  %v9788_v12 = vld [vmem:[#allocation25_spill] sm:$0xff] }
  0xc7   :  { %v1759_v56 = vand.u32 4294901760, %v7580_v54  ;;  %v6172_v27 = vpack.c.bf16 %v1726_v1, %v1719_v26  ;;  %v1733_v53 = vand.u32 4294901760, %v1732_v42  ;;  %v1740_v60 = vand.u32 4294901760, %v1739_v14  ;;  %2123 = vmatmul.mubr.f32.gmra.mrb[50].mxu0 %v9789_v23  ;;  %v9790_v14 = vld [vmem:[#allocation79_spill] sm:$0xff] }
  0xc8   :  { %v1766_v38 = vand.u32 4294901760, %v7585_v5  ;;  %v1872_v9 = vsub.f32 %v7566_v30, %v1871_v57  ;;  %v1879_v34 = vsub.f32 %v7571_v28, %v1878_v8  ;;  %v1885_v36 = vand.u32 4294901760, %v7612_v62  ;;  %6269 = vmatpush3.bf16.msra.mxu0 %v6268_v43  ;;  %2129 = vmatprep.mubr.f32.mxu0 %v9790_v14  ;;  %v9791_v28 = vld [vmem:[#allocation26_spill] sm:$0xff]  ;;  %v9792_v43 = vld [vmem:[#allocation27_spill] sm:$0xff] }
  0xc9   :  { %1429 = vmatmul.mubr.f32.vlgmr.msra.gmra.mrb[48].mxu1 %v9787_v2  ;;  %v1892_v35 = vand.u32 4294901760, %v7617_v7  ;;  %v6174_v26 = vpack.c.bf16 %v1852_v63, %v1845_v37  ;;  %v6272_v4 = vpack.c.bf16 %v1738_v17, %v1731_v10  ;;  %v1859_v1 = vand.u32 4294901760, %v1858_v44  ;;  %6271 = vmatprep.subr.bf16.mxu0 %v6270_v47 }
  0xca   :  { %6169 = vmatpush3.bf16.msra.mxu1 %v6168_v18  ;;  %1434 = vmatprep.mubr.f32.mxu1 %v9788_v12  ;;  %v1866_v42 = vand.u32 4294901760, %v1865_v59  ;;  %v1747_v18 = vand.u32 4294901760, %v1746_v40  ;;  %v1754_v3 = vand.u32 4294901760, %v1753_v22  ;;  %v6274_v61 = vpack.c.bf16 %v1864_v11, %v1857_v13 }
  0xcb   :  { %6171 = vmatprep.subr.bf16.mxu1 %v6170_v41  ;;  %v1760_v30 = vsub.f32 %v7580_v54, %v1759_v56  ;;  %v6176_v2 = vpack.c.bf16 %v1740_v60, %v1733_v53  ;;  %v1767_v41 = vsub.f32 %v7585_v5, %v1766_v38  ;;  %v1773_v10 = vand.u32 4294901760, %v7626_v50  ;;  %2132 = vmatmul.mubr.f32.gmra.mrb[52].mxu0 %v7402_v15  ;;  %v9879_v15 = vld [vmem:[#allocation89_spill] sm:$0xff] }
  0xcc   :  { %v1780_v17 = vand.u32 4294901760, %v7631_v51  ;;  %v1873_v37 = vand.u32 4294901760, %v1872_v9  ;;  %v1880_v63 = vand.u32 4294901760, %v1879_v34  ;;  %v1886_v13 = vsub.f32 %v7612_v62, %v1885_v36  ;;  %6273 = vmatpush3.bf16.msra.mxu0 %v6272_v4  ;;  %2138 = vmatprep.mubr.f32.mxu0 %v7418_v29  ;;  %v9794_v9 = vld [vmem:[#allocation30_spill] sm:$0xff]  ;;  %v9795_v4 = vld [vmem:[#allocation32_spill] sm:$0xff] }
  0xcd   :  { %1436 = vmatmul.mubr.f32.gmra.mrb[50].mxu1 %v9791_v28  ;;  %v1893_v11 = vsub.f32 %v7617_v7, %v1892_v35  ;;  %v6178_v44 = vpack.c.bf16 %v1866_v42, %v1859_v1  ;;  %v1899_v59 = vand.u32 4294901760, %v7653_v6  ;;  %v1906_v5 = vand.u32 4294901760, %v7658_v32  ;;  %v9793_v7 = vld [vmem:[#allocation28_spill] sm:$0xff]  ;;  %6275 = vmatprep.subr.bf16.mxu0 %v6274_v61 }
  0xce   :  { %6173 = vmatpush3.bf16.msra.mxu1 %v6172_v27  ;;  %1441 = vmatprep.mubr.f32.mxu1 %v9792_v43  ;;  %v6180_v47 = vpack.c.bf16 %v1754_v3, %v1747_v18  ;;  %v6276_v40 = vpack.c.bf16 %v1752_v21, %v1745_v49  ;;  %v1761_v62 = vand.u32 4294901760, %v1760_v30  ;;  %v6278_v22 = vpack.c.bf16 %v1878_v8, %v1871_v57  ;;  %v9797_v28 = vld [vmem:[#allocation36_spill] sm:$0xff] }
  0xcf   :  { %6175 = vmatprep.subr.bf16.mxu1 %v6174_v26  ;;  %v1768_v27 = vand.u32 4294901760, %v1767_v41  ;;  %v1774_v53 = vsub.f32 %v7626_v50, %v1773_v10  ;;  %v1781_v60 = vsub.f32 %v7631_v51, %v1780_v17  ;;  %v1787_v12 = vand.u32 4294901760, %v7667_v16  ;;  %2141 = vmatmul.mubr.f32.gmra.mrb[54].mxu0 %v7459_v33  ;;  %v9798_v41 = vld [vmem:[#allocation38_spill] sm:$0xff]  ;;  %v9868_v33 = vld [vmem:[#allocation88_spill] sm:$0xff] }
  0xd0   :  { %v6182_v34 = vpack.c.bf16 %v1880_v63, %v1873_v37  ;;  %v1887_v48 = vand.u32 4294901760, %v1886_v13  ;;  %v1894_v26 = vand.u32 4294901760, %v1893_v11  ;;  %v1794_v58 = vand.u32 4294901760, %v7672_v0  ;;  %6277 = vmatpush3.bf16.msra.mxu0 %v6276_v40  ;;  %2147 = vmatprep.mubr.f32.mxu0 %v7474_v24  ;;  %v7837_v13 = vld [vmem:[#allocation5 + $0x280] sm:$0xff] }
  0xd1   :  { %1443 = vmatmul.mubr.f32.gmra.mrb[52].mxu1 %v9793_v7  ;;  %v1900_v49 = vsub.f32 %v7653_v6, %v1899_v59  ;;  %v1907_v21 = vsub.f32 %v7658_v32, %v1906_v5  ;;  %v1913_v50 = vand.u32 4294901760, %v7694_v31  ;;  %v1920_v51 = vand.u32 4294901760, %v7699_v19  ;;  %6279 = vmatprep.subr.bf16.mxu0 %v6278_v22  ;;  %v9796_v32 = vld [vmem:[#allocation34_spill] sm:$0xff] }
  0xd2   :  { %6177 = vmatpush3.bf16.msra.mxu1 %v6176_v2  ;;  %1448 = vmatprep.mubr.f32.mxu1 %v9794_v9  ;;  %v6280_v57 = vpack.c.bf16 %v1766_v38, %v1759_v56  ;;  %v6282_v8 = vpack.c.bf16 %v1892_v35, %v1885_v36  ;;  %v6184_v1 = vpack.c.bf16 %v1768_v27, %v1761_v62  ;;  %v1775_v42 = vand.u32 4294901760, %v1774_v53  ;;  %v7846_v62 = vld [vmem:[#allocation5 + $0x200] sm:$0xff]  ;;  %v7848_v22 = vld [vmem:[#allocation5 + $0x208] sm:$0xff]  ;;  %v7851_v9 = vld [vmem:[#allocation5 + $0x290] sm:$0xff] }
  0xd3   :  { %6179 = vmatprep.subr.bf16.mxu1 %v6178_v44  ;;  %v1782_v18 = vand.u32 4294901760, %v1781_v60  ;;  %v1788_v6 = vsub.f32 %v7667_v16, %v1787_v12  ;;  %v6186_v3 = vpack.c.bf16 %v1894_v26, %v1887_v48  ;;  %v1795_v61 = vsub.f32 %v7672_v0, %v1794_v58  ;;  %2150 = vmatmul.mubr.f32.gmra.mrb[56].mxu0 %v7510_v25  ;;  %v9802_v7 = vld [vmem:[#allocation42_spill] sm:$0xff] }
  0xd4   :  { %v1801_v30 = vand.u32 4294901760, %v7715_v52  ;;  %v1808_v54 = vand.u32 4294901760, %v7720_v46  ;;  %v1901_v56 = vand.u32 4294901760, %v1900_v49  ;;  %v1908_v38 = vand.u32 4294901760, %v1907_v21  ;;  %6281 = vmatpush3.bf16.msra.mxu0 %v6280_v57  ;;  %2156 = vmatprep.mubr.f32.mxu0 %v7516_v45  ;;  %v9804_v26 = vld [vmem:[#allocation98_spill] sm:$0xff]  ;;  %v8076_v45 = vld [vmem:[#allocation5 + $0x2f8] sm:$0xff] }
  0xd5   :  { %1450 = vmatmul.mubr.f32.gmra.mrb[54].mxu1 %v9795_v4  ;;  %v1914_v36 = vsub.f32 %v7694_v31, %v1913_v50  ;;  %v1921_v35 = vsub.f32 %v7699_v19, %v1920_v51  ;;  %v6284_v16 = vpack.c.bf16 %v1780_v17, %v1773_v10  ;;  %v6188_v0 = vpack.c.bf16 %v1782_v18, %v1775_v42  ;;  %v7839_v19 = vld [vmem:[#allocation5 + $0x288] sm:$0xff]  ;;  %v9799_v10 = vld [vmem:[#allocation92_spill] sm:$0xff]  ;;  %v7868_v4 = vld [vmem:[#allocation5 + $0x210] sm:$0xff] }
  0xd6   :  { %6181 = vmatpush3.bf16.msra.mxu1 %v6180_v47  ;;  %1455 = vmatprep.mubr.f32.mxu1 %v9796_v32  ;;  %v6286_v2 = vpack.c.bf16 %v1906_v5, %v1899_v59  ;;  %v1789_v43 = vand.u32 4294901760, %v1788_v6  ;;  %v1796_v37 = vand.u32 4294901760, %v1795_v61  ;;  %v1802_v63 = vsub.f32 %v7715_v52, %v1801_v30  ;;  %v9800_v59 = vld [vmem:[#allocation94_spill] sm:$0xff]  ;;  %v9801_v47 = vld [vmem:[#allocation40_spill] sm:$0xff]  ;;  %v7873_v6 = vld [vmem:[#allocation5 + $0x2a0] sm:$0xff]  ;;  %9857 = vst [vmem:[#allocation18_spill] sm:$0xff] %v8076_v45 }
  0xd7   :  { %6183 = vmatprep.subr.bf16.mxu1 %v6182_v34  ;;  %6283 = vmatprep.subr.bf16.mxu0 %v6282_v8  ;;  %v1809_v31 = vsub.f32 %v7720_v46, %v1808_v54  ;;  %v6190_v17 = vpack.c.bf16 %v1908_v38, %v1901_v56  ;;  %v1915_v11 = vand.u32 4294901760, %v1914_v36  ;;  %v1922_v44 = vand.u32 4294901760, %v1921_v35  ;;  %v9803_v34 = vld [vmem:[#allocation96_spill] sm:$0xff]  ;;  %v9807_v42 = vld [vmem:[#allocation46_spill] sm:$0xff] }
  0xd8   :  { %2159 = vmatmul.mubr.f32.gmra.mrb[58].mxu0 %v9799_v10  ;;  %v6288_v5 = vpack.c.bf16 %v1794_v58, %v1787_v12  ;;  %v6290_v52 = vpack.c.bf16 %v1920_v51, %v1913_v50  ;;  %v9417_v46 = vand.u32 4294901760, %v7837_v13  ;;  %v9416_v40 = vand.u32 4294901760, %v7839_v19  ;;  %v7853_v12 = vld [vmem:[#allocation5 + $0x298] sm:$0xff]  ;;  %v7875_v32 = vld [vmem:[#allocation5 + $0x2a8] sm:$0xff] }
  0xd9   :  { %1457 = vmatmul.mubr.f32.gmra.mrb[56].mxu1 %v9797_v28  ;;  %6285 = vmatpush3.bf16.msra.mxu0 %v6284_v16  ;;  %v6192_v27 = vpack.c.bf16 %v1796_v37, %v1789_v43  ;;  %v1803_v53 = vand.u32 4294901760, %v1802_v63  ;;  %v1810_v60 = vand.u32 4294901760, %v1809_v31  ;;  %v6194_v48 = vpack.c.bf16 %v1922_v44, %v1915_v11  ;;  %v9805_v50 = vld [vmem:[#allocation44_spill] sm:$0xff]  ;;  %v9809_v61 = vld [vmem:[#allocation66_spill] sm:$0xff]  ;;  %v7897_v28 = vld [vmem:[#allocation5 + $0x220] sm:$0xff] }
  0xda   :  { %6185 = vmatpush3.bf16.msra.mxu1 %v6184_v1  ;;  %1462 = vmatprep.mubr.f32.mxu1 %v9798_v41  ;;  %v6292_v58 = vpack.c.bf16 %v1808_v54, %v1801_v30  ;;  %v9413_v49 = vand.u32 4294901760, %v7846_v62  ;;  %v9412_v21 = vand.u32 4294901760, %v7848_v22  ;;  %v7864_v51 = vpack.c.bf16 %v9416_v40, %v9417_v46  ;;  %v7870_v1 = vld [vmem:[#allocation5 + $0x218] sm:$0xff]  ;;  %v9813_v43 = vld [vmem:[#allocation50_spill] sm:$0xff] }
  0xdb   :  { %6187 = vmatprep.subr.bf16.mxu1 %v6186_v3  ;;  %2165 = vmatprep.mubr.f32.mxu0 %v9800_v59  ;;  %v9411_v57 = vand.u32 4294901760, %v7851_v9  ;;  %v9410_v8 = vand.u32 4294901760, %v7853_v12  ;;  %v6196_v18 = vpack.c.bf16 %v1810_v60, %v1803_v53  ;;  %v9808_v3 = vld [vmem:[#allocation29_spill] sm:$0xff]  ;;  %v9409_v54 = vand.u32 4294901760, %v7868_v4  ;;  %v9811_v38 = vld [vmem:[#allocation48_spill] sm:$0xff]  ;;  %v9815_v63 = vld [vmem:[#allocation70_spill] sm:$0xff] }
  0xdc   :  { %6287 = vmatprep.subr.bf16.mxu0 %v6286_v2  ;;  %2168 = vmatmul.mubr.f32.gmra.mrb[60].mxu0 %v9803_v34  ;;  %9806 = vst [vmem:[#allocation57_spill] sm:$0xff] %v7864_v51  ;;  %v7883_v30 = vpack.c.bf16 %v9412_v21, %v9413_v49  ;;  %v9406_v56 = vand.u32 4294901760, %v7870_v1  ;;  %v9405_v35 = vand.u32 4294901760, %v7873_v6  ;;  %v9404_v16 = vand.u32 4294901760, %v7875_v32  ;;  %v7902_v2 = vld [vmem:[#allocation5 + $0x2b0] sm:$0xff]  ;;  %v7904_v41 = vld [vmem:[#allocation5 + $0x2b8] sm:$0xff] }
  0xdd   :  { %1464 = vmatmul.mubr.f32.gmra.mrb[58].mxu1 %v9801_v47  ;;  %6289 = vmatpush3.bf16.msra.mxu0 %v6288_v5  ;;  %v7893_v36 = vpack.c.bf16 %v9410_v8, %v9411_v57  ;;  %v9814_v37 = vld [vmem:[#allocation68_spill] sm:$0xff]  ;;  %v9415_v5 = vand.u32 4294901760, %v7902_v2  ;;  %v9414_v47 = vand.u32 4294901760, %v7904_v41  ;;  %v7934_v53 = vld [vmem:[#allocation5 + $0x2c0] sm:$0xff]  ;;  %v7936_v60 = vld [vmem:[#allocation5 + $0x2c8] sm:$0xff] }
  0xde   :  { %6189 = vmatpush3.bf16.msra.mxu1 %v6188_v0  ;;  %1469 = vmatprep.mubr.f32.mxu1 %v9802_v7  ;;  %9810 = vst [vmem:[#allocation58_spill] sm:$0xff] %v7883_v30  ;;  %v7899_v0 = vld [vmem:[#allocation5 + $0x228] sm:$0xff]  ;;  %v7914_v31 = vpack.c.bf16 %v9406_v56, %v9409_v54  ;;  %v7924_v44 = vpack.c.bf16 %v9404_v16, %v9405_v35  ;;  %v7930_v7 = vld [vmem:[#allocation5 + $0x238] sm:$0xff]  ;;  %v9824_v8 = vld [vmem:[#allocation53_spill] sm:$0xff] }
  0xdf   :  { %6191 = vmatprep.subr.bf16.mxu1 %v6190_v17  ;;  %2174 = vmatprep.mubr.f32.mxu0 %v9804_v26  ;;  %9812 = vst [vmem:[#allocation11_spill] sm:$0xff] %v7893_v36  ;;  %v9408_v17 = vand.u32 4294901760, %v7897_v28  ;;  %v9407_v11 = vand.u32 4294901760, %v7899_v0  ;;  %v7956_v16 = vpack.c.bf16 %v9414_v47, %v9415_v5  ;;  %v48_v54 = vld [vmem:[#allocation2 + $0x28] sm:$0xff]  ;;  %v7966_v57 = vld [vmem:[#allocation5 + $0x2d0] sm:$0xff]  ;;  %v7968_v21 = vld [vmem:[#allocation5 + $0x2d8] sm:$0xff] }
  0xe0   :  { %6291 = vmatprep.subr.bf16.mxu0 %v6290_v52  ;;  %2177 = vmatmul.mubr.f32.gmra.mrb[62].mxu0 %v9808_v3  ;;  %9816 = vst [vmem:[#allocation31_spill] sm:$0xff] %v7914_v31  ;;  %9817 = vst [vmem:[#allocation12_spill] sm:$0xff] %v7924_v44  ;;  %v7928_v52 = vld [vmem:[#allocation5 + $0x230] sm:$0xff]  ;;  %v9825_v49 = vld [vmem:[#allocation54_spill] sm:$0xff] }
  0xe1   :  { %1471 = vmatmul.mubr.f32.gmra.mrb[60].mxu1 %v9805_v50  ;;  %6293 = vmatpush3.bf16.msra.mxu0 %v6292_v58  ;;  %v9820_v58 = vld [vmem:[#allocation73_spill] sm:$0xff]  ;;  %v9821_v50 = vld [vmem:[#allocation75_spill] sm:$0xff]  ;;  %9823 = vst [vmem:[#allocation62_spill] sm:$0xff] %v7956_v16  ;;  %v9826_v47 = vld [vmem:[#allocation76_spill] sm:$0xff] }
  0xe2   :  { %6193 = vmatpush3.bf16.msra.mxu1 %v6192_v27  ;;  %1476 = vmatprep.mubr.f32.mxu1 %v9807_v42  ;;  %v9818_v27 = vld [vmem:[#allocation51_spill] sm:$0xff]  ;;  %v7946_v42 = vpack.c.bf16 %v9407_v11, %v9408_v17  ;;  %v7960_v11 = vld [vmem:[#allocation5 + $0x240] sm:$0xff]  ;;  %v7962_v17 = vld [vmem:[#allocation5 + $0x248] sm:$0xff] }
  0xe3   :  { %6195 = vmatprep.subr.bf16.mxu1 %v6194_v48  ;;  %2528 = vmatprep.mubr.f32.mxu0 %v9809_v61  ;;  %v9819_v48 = vld [vmem:[#allocation52_spill] sm:$0xff]  ;;  %v7982_v35 = vld [vmem:[#allocation5 + $0x250] sm:$0xff]  ;;  %v9837_v46 = vld [vmem:[#allocation82_spill] sm:$0xff] }
  0xe4   :  { %6327 = vmatprep.subr.bf16.mxu0 %v7864_v51  ;;  %2530 = vmatmul.mubr.f32.vlgmr.msra.gmra.mrb[64].mxu0 %v9814_v37  ;;  %9822 = vst [vmem:[#allocation61_spill] sm:$0xff] %v7946_v42  ;;  %v9827_v5 = vld [vmem:[#allocation80_spill] sm:$0xff]  ;;  %v9833_v51 = vand.u32 4294901760, %v7837_v13  ;;  %v8053_v59 = vld [vmem:[#allocation5 + $0x260] sm:$0xff]  ;;  %v8055_v10 = vld [vmem:[#allocation5 + $0x268] sm:$0xff] }
  0xe5   :  { %1478 = vmatmul.mubr.f32.gmra.mrb[62].mxu1 %v9811_v38  ;;  %6329 = vmatpush3.bf16.msra.mxu0 %v7883_v30  ;;  %v9426_v38 = vand.u32 4294901760, %v7930_v7  ;;  %v55_v30 = vld [vmem:[#allocation2 + $0x60] sm:$0xff]  ;;  %v9836_v56 = vld [vmem:[#allocation56_spill] sm:$0xff]  ;;  %9851 = vst [vmem:[#allocation41_spill] sm:$0xff] %v8055_v10 }
  0xe6   :  { %6197 = vmatpush3.bf16.msra.mxu1 %v6196_v18  ;;  %1925 = vmatprep.mubr.f32.mxu1 %v9809_v61  ;;  %v9427_v18 = vand.u32 4294901760, %v7928_v52  ;;  %v9840_v61 = vld [vmem:[#allocation85_spill] sm:$0xff]  ;;  %v54_v26 = vld [vmem:[#allocation2 + $0x58] sm:$0xff] }
  0xe7   :  { %6231 = vmatprep.subr.bf16.mxu1 %v9813_v43  ;;  %2535 = vmatprep.mubr.f32.mxu0 %v9815_v63  ;;  %v62_v34 = vld [vmem:[#allocation2 + $0x98] sm:$0xff]  ;;  %v8093_v24 = vand.u32 4294901760, %v54_v26 }
  0xe8   :  { %6331 = vmatprep.subr.bf16.mxu0 %v7893_v36  ;;  %2537 = vmatmul.mubr.f32.gmra.mrb[66].mxu0 %v9820_v58  ;;  %v7978_v40 = vpack.c.bf16 %v9426_v38, %v9427_v18  ;;  %v47_v36 = vld [vmem:[#allocation2 + $0x20] sm:$0xff]  ;;  %v9831_v38 = vand.u32 4294901760, %v7936_v60 }
  0xe9   :  { %1927 = vmatmul.mubr.f32.vlgmr.msra.gmra.mrb[64].mxu1 %v9814_v37  ;;  %6333 = vmatpush3.bf16.msra.mxu0 %v7914_v31  ;;  %v7986_v31 = vand.u32 4294901760, %v48_v54  ;;  %9866 = vst [vmem:[#allocation49_spill] sm:$0xff] %v8093_v24 }
  0xea   :  { %6233 = vmatpush3.bf16.msra.mxu1 %v9818_v27  ;;  %1932 = vmatprep.mubr.f32.mxu1 %v9815_v63  ;;  %9828 = vst [vmem:[#allocation33_spill] sm:$0xff] %v7978_v40  ;;  %v8018_v63 = vand.u32 4294901760, %v47_v36 }
  0xeb   :  { %6235 = vmatprep.subr.bf16.mxu1 %v9819_v48  ;;  %2542 = vmatprep.mubr.f32.mxu0 %v9821_v50  ;;  %9829 = vst [vmem:[#allocation64_spill] sm:$0xff] %v7986_v31 }
  0xec   :  { %6335 = vmatprep.subr.bf16.mxu0 %v7924_v44  ;;  %2544 = vmatmul.mubr.f32.gmra.mrb[68].mxu0 %v9826_v47  ;;  %v7984_v44 = vld [vmem:[#allocation5 + $0x258] sm:$0xff]  ;;  %9838 = vst [vmem:[#allocation35_spill] sm:$0xff] %v8018_v63 }
  0xed   :  { %1934 = vmatmul.mubr.f32.gmra.mrb[66].mxu1 %v9820_v58  ;;  %6337 = vmatpush3.bf16.msra.mxu0 %v7946_v42  ;;  %v9830_v42 = vand.u32 4294901760, %v7934_v53  ;;  %v9834_v58 = vld [vmem:[#allocation55_spill] sm:$0xff] }
  0xee   :  { %6237 = vmatpush3.bf16.msra.mxu1 %v9824_v8  ;;  %1939 = vmatprep.mubr.f32.mxu1 %v9821_v50  ;;  %v8001_v50 = vsub.f32 %v7837_v13, %v9833_v51  ;;  %v8034_v13 = vsub.f32 %v48_v54, %v7986_v31  ;;  %v8036_v51 = vand.u32 4294901760, %v55_v30  ;;  %v9855_v31 = vld [vmem:[#allocation59_spill] sm:$0xff] }
  0xef   :  { %6239 = vmatprep.subr.bf16.mxu1 %v9825_v49  ;;  %2549 = vmatprep.mubr.f32.mxu0 %v9827_v5  ;;  %v7994_v18 = vpack.c.bf16 %v9831_v38, %v9830_v42  ;;  %v9835_v42 = vand.u32 4294901760, %v7839_v19  ;;  %v8074_v54 = vld [vmem:[#allocation5 + $0x2f0] sm:$0xff] }
  0xf0   :  { %6339 = vmatprep.subr.bf16.mxu0 %v7956_v16  ;;  %v8005_v16 = vld [vmem:[#allocation5 + $0x2e0] sm:$0xff]  ;;  %2551 = vmatmul.mubr.f32.gmra.mrb[70].mxu0 %v9837_v46  ;;  %9844 = vst [vmem:[#allocation37_spill] sm:$0xff] %v8034_v13  ;;  %9845 = vst [vmem:[#allocation15_spill] sm:$0xff] %v8036_v51  ;;  %v8103_v29 = vsub.f32 %v55_v30, %v8036_v51  ;;  %v9874_v51 = vand.u32 4294901760, %v7873_v6 }
  0xf1   :  { %1941 = vmatmul.mubr.f32.gmra.mrb[68].mxu1 %v9826_v47  ;;  %9832 = vst [vmem:[#allocation13_spill] sm:$0xff] %v7994_v18  ;;  %v8007_v47 = vld [vmem:[#allocation5 + $0x2e8] sm:$0xff]  ;;  %v8012_v38 = vsub.f32 %v7839_v19, %v9835_v42  ;;  %6341 = vmatpush3.bf16.msra.mxu0 %v7978_v40  ;;  %v9841_v19 = vand.u32 4294901760, %v7960_v11  ;;  %v9842_v42 = vand.u32 4294901760, %v7962_v17  ;;  %v9848_v40 = vand.u32 4294901760, %v7966_v57  ;;  %9856 = vst [vmem:[#allocation43_spill] sm:$0xff] %v8074_v54 }
  0xf2   :  { %6241 = vmatpush3.bf16.msra.mxu1 %v9834_v58  ;;  %1946 = vmatprep.mubr.f32.mxu1 %v9827_v5  ;;  %v9839_v5 = vand.u32 4294901760, %v7846_v62  ;;  %9869 = vst [vmem:[#allocation21_spill] sm:$0xff] %v8103_v29 }
  0xf3   :  { %6243 = vmatprep.subr.bf16.mxu1 %v9836_v56  ;;  %2556 = vmatprep.mubr.f32.mxu0 %v9840_v61  ;;  %v8031_v3 = vpack.c.bf16 %v9842_v42, %v9841_v19  ;;  %v9849_v19 = vand.u32 4294901760, %v7968_v21  ;;  %v9872_v56 = vand.u32 4294901760, %v8007_v47 }
  0xf4   :  { %v8023_v37 = vsub.f32 %v7846_v62, %v9839_v5  ;;  %v9846_v62 = vand.u32 4294901760, %v7848_v22  ;;  %6343 = vmatprep.subr.bf16.mxu0 %v7994_v18  ;;  %v9853_v18 = vand.u32 4294901760, %v7853_v12 }
  0xf5   :  { %9843 = vst [vmem:[#allocation14_spill] sm:$0xff] %v8031_v3  ;;  %1948 = vmatmul.mubr.f32.gmra.mrb[70].mxu1 %v9837_v46  ;;  %v8049_v42 = vpack.c.bf16 %v9849_v19, %v9848_v40  ;;  %v9854_v40 = vand.u32 4294901760, %v7868_v4  ;;  %6345 = vmatpush3.bf16.msra.mxu0 %v8031_v3  ;;  %v9871_v3 = vand.u32 4294901760, %v8005_v16 }
  0xf6   :  { %v8041_v5 = vsub.f32 %v7848_v22, %v9846_v62  ;;  %v9852_v22 = vand.u32 4294901760, %v7851_v9  ;;  %v8065_v46 = vsub.f32 %v7853_v12, %v9853_v18  ;;  %6245 = vmatpush3.bf16.msra.mxu1 %v9855_v31  ;;  %1953 = vmatprep.mubr.f32.mxu1 %v9840_v61  ;;  %v9860_v12 = vand.u32 4294901760, %v7982_v35 }
  0xf7   :  { %9850 = vst [vmem:[#allocation16_spill] sm:$0xff] %v8049_v42  ;;  %v8070_v19 = vsub.f32 %v7868_v4, %v9854_v40  ;;  %v9861_v18 = vand.u32 4294901760, %v7984_v44  ;;  %v8086_v4 = vld [vmem:[#allocation5 + $0x270] sm:$0xff]  ;;  %v8088_v40 = vld [vmem:[#allocation5 + $0x278] sm:$0xff]  ;;  %v8091_v61 = vsub.f32 %v47_v36, %v8018_v63  ;;  %v8095_v31 = vand.u32 4294901760, %v62_v34  ;;  %6347 = vmatprep.subr.bf16.mxu0 %v8049_v42 }
  0xf8   :  { %9847 = vst [vmem:[#allocation39_spill] sm:$0xff] %v8041_v5  ;;  %v8060_v62 = vsub.f32 %v7851_v9, %v9852_v22  ;;  %v9858_v9 = vld [vmem:[#allocation60_spill] sm:$0xff]  ;;  %v9859_v22 = vld [vmem:[#allocation86_spill] sm:$0xff]  ;;  %9863 = vst [vmem:[#allocation47_spill] sm:$0xff] %v8086_v4  ;;  %v9870_v36 = vand.u32 4294901760, %v7870_v1  ;;  %v8116_v58 = vpack.c.bf16 %v9872_v56, %v9871_v3  ;;  %v9877_v56 = vand.u32 4294901760, %v7875_v32 }
  0xf9   :  { %6247 = vmatprep.subr.bf16.mxu1 %v9858_v9  ;;  %2558 = vmatmul.mubr.f32.gmra.mrb[72].mxu0 %v9859_v22  ;;  %v8084_v25 = vpack.c.bf16 %v9861_v18, %v9860_v12  ;;  %9864 = vst [vmem:[#allocation20_spill] sm:$0xff] %v8088_v40  ;;  %9865 = vst [vmem:[#allocation69_spill] sm:$0xff] %v8091_v61  ;;  %v61_v9 = vld [vmem:[#allocation2 + $0x90] sm:$0xff]  ;;  %v9878_v18 = vld [vmem:[#allocation65_spill] sm:$0xff]  ;;  %v8143_v42 = vsub.f32 %v62_v34, %v8095_v31 }
  0xfa   :  { %9867 = vst [vmem:[#allocation22_spill] sm:$0xff] %v8095_v31  ;;  %2563 = vmatprep.mubr.f32.mxu0 %v9868_v33  ;;  %v8108_v63 = vsub.f32 %v7870_v1, %v9870_v36  ;;  %1955 = vmatmul.mubr.f32.gmra.mrb[72].mxu1 %v9859_v22  ;;  %9873 = vst [vmem:[#allocation72_spill] sm:$0xff] %v8116_v58  ;;  %v69_v12 = vld [vmem:[#allocation2 + $0xd0] sm:$0xff]  ;;  %v8123_v1 = vsub.f32 %v7873_v6, %v9874_v51  ;;  %v8129_v3 = vand.u32 4294901760, %v61_v9  ;;  %v68_v34 = vld [vmem:[#allocation2 + $0xc8] sm:$0xff] }
  0xfb   :  { %9862 = vst [vmem:[#allocation45_spill] sm:$0xff] %v8084_v25  ;;  %v9875_v36 = vld [vmem:[#allocation63_spill] sm:$0xff]  ;;  %1960 = vmatprep.mubr.f32.mxu1 %v9868_v33  ;;  %v8134_v30 = vsub.f32 %v7875_v32, %v9877_v56  ;;  %v8140_v51 = vsub.f32 %v54_v26, %v8093_v24  ;;  %6349 = vmatpush3.bf16.msra.mxu0 %v8084_v25  ;;  %v9882_v33 = vand.u32 4294901760, %v8053_v59  ;;  %v9883_v32 = vand.u32 4294901760, %v8055_v10  ;;  %v76_v26 = vld [vmem:[#allocation2 + $0x108] sm:$0xff] }
  0xfc   :  { %6249 = vmatpush3.bf16.msra.mxu1 %v9875_v36  ;;  %9876 = vst [vmem:[#allocation74_spill] sm:$0xff] %v8129_v3  ;;  %v9881_v22 = vld [vmem:[#allocation91_spill] sm:$0xff]  ;;  %v8157_v24 = vand.u32 4294901760, %v69_v12  ;;  %v9887_v31 = vand.u32 4294901760, %v7897_v28  ;;  %v9888_v36 = vand.u32 4294901760, %v7899_v0  ;;  %6351 = vmatprep.subr.bf16.mxu0 %v8116_v58 }
  0xfd   :  { %6251 = vmatprep.subr.bf16.mxu1 %v9878_v18  ;;  %2565 = vmatmul.mubr.f32.gmra.mrb[74].mxu0 %v9879_v15  ;;  %9880 = vst [vmem:[#allocation23_spill] sm:$0xff] %v8140_v51  ;;  %v8151_v56 = vpack.c.bf16 %v9883_v32, %v9882_v33  ;;  %v9885_v18 = vand.u32 4294901760, %v8034_v13  ;;  %v9889_v33 = vand.u32 4294901760, %v8074_v54 }
  0xfe   :  { %2570 = vmatprep.mubr.f32.mxu0 %v9881_v22  ;;  %9886 = vst [vmem:[#allocation78_spill] sm:$0xff] %v8157_v24  ;;  %v8162_v25 = vsub.f32 %v7897_v28, %v9887_v31  ;;  %v8167_v10 = vsub.f32 %v7899_v0, %v9888_v36  ;;  %1962 = vmatmul.mubr.f32.gmra.mrb[74].mxu1 %v9879_v15  ;;  %v9893_v31 = vld [vmem:[#allocation67_spill] sm:$0xff]  ;;  %v9894_v0 = vand.u32 4294901760, %v8086_v4  ;;  %v9895_v36 = vand.u32 4294901760, %v8088_v40  ;;  %v75_v40 = vld [vmem:[#allocation2 + $0x100] sm:$0xff] }
  0xff   :  { %9884 = vst [vmem:[#allocation25_spill] sm:$0xff] %v8151_v56  ;;  %v2836_v6 = vsub.f32 %v8034_v13, %v9885_v18  ;;  %v9890_v18 = vand.u32 4294901760, %v8076_v45  ;;  %v9892_v13 = vand.u32 4294901760, %v7902_v2  ;;  %1967 = vmatprep.mubr.f32.mxu1 %v9881_v22  ;;  %v8191_v15 = vsub.f32 %v61_v9, %v8129_v3  ;;  %6353 = vmatpush3.bf16.msra.mxu0 %v8151_v56 }
 0x100   :  { %6253 = vmatpush3.bf16.msra.mxu1 %v9893_v31  ;;  %v8188_v58 = vpack.c.bf16 %v9895_v36, %v9894_v0  ;;  %v8200_v4 = vand.u32 4294901760, %v68_v34  ;;  %v9901_v0 = vld [vmem:[#allocation95_spill] sm:$0xff]  ;;  %v9902_v36 = vand.u32 4294901760, %v8103_v29  ;;  %v9904_v31 = vand.u32 4294901760, %v7904_v41 }
 0x101   :  { %v8175_v32 = vpack.c.bf16 %v9890_v18, %v9889_v33  ;;  %v8180_v28 = vsub.f32 %v7902_v2, %v9892_v13  ;;  %v9897_v33 = vld [vmem:[#allocation71_spill] sm:$0xff]  ;;  %v9898_v18 = vld [vmem:[#allocation93_spill] sm:$0xff]  ;;  %v9899_v2 = vand.u32 4294901760, %v8091_v61  ;;  %v2837_v9 = vand.u32 4294901760, %v2836_v6 }
 0x102   :  { %9896 = vst [vmem:[#allocation26_spill] sm:$0xff] %v8188_v58  ;;  %6255 = vmatprep.subr.bf16.mxu1 %v9897_v33  ;;  %2572 = vmatmul.mubr.f32.gmra.mrb[76].mxu0 %v9898_v18  ;;  %9900 = vst [vmem:[#allocation27_spill] sm:$0xff] %v8200_v4  ;;  %v2851_v3 = vsub.f32 %v8103_v29, %v9902_v36  ;;  %v8208_v33 = vsub.f32 %v69_v12, %v8157_v24  ;;  %v83_v6 = vld [vmem:[#allocation2 + $0x140] sm:$0xff]  ;;  %v9906_v36 = vand.u32 4294901760, %v7930_v7 }
 0x103   :  { %9891 = vst [vmem:[#allocation79_spill] sm:$0xff] %v8175_v32  ;;  %v2842_v13 = vsub.f32 %v8091_v61, %v9899_v2  ;;  %2577 = vmatprep.mubr.f32.mxu0 %v9901_v0  ;;  %v8210_v2 = vand.u32 4294901760, %v76_v26  ;;  %v8215_v22 = vsub.f32 %v7904_v41, %v9904_v31  ;;  %v9905_v61 = vand.u32 4294901760, %v7928_v52  ;;  %1969 = vmatmul.mubr.f32.gmra.mrb[76].mxu1 %v9898_v18  ;;  %v9907_v41 = vld [vmem:[#allocation77_spill] sm:$0xff] }
 0x104   :  { %6355 = vmatprep.subr.bf16.mxu0 %v8175_v32  ;;  %v6390_v12 = vpack.c.bf16 %v8012_v38, %v8001_v50  ;;  %v8229_v24 = vsub.f32 %v7930_v7, %v9906_v36  ;;  %6257 = vmatpush3.bf16.msra.mxu1 %v9907_v41  ;;  %v8236_v31 = vand.u32 4294901760, %v75_v40  ;;  %v9909_v32 = vld [vmem:[#allocation81_spill] sm:$0xff]  ;;  %v9911_v45 = vand.u32 4294901760, %v8140_v51 }
 0x105   :  { %9903 = vst [vmem:[#allocation28_spill] sm:$0xff] %v8210_v2  ;;  %v8220_v56 = vsub.f32 %v7928_v52, %v9905_v61  ;;  %1974 = vmatprep.mubr.f32.mxu1 %v9901_v0  ;;  %v6392_v61 = vpack.c.bf16 %v8041_v5, %v8023_v37  ;;  %6259 = vmatprep.subr.bf16.mxu1 %v9909_v32  ;;  %v9910_v18 = vld [vmem:[#allocation97_spill] sm:$0xff]  ;;  %v2843_v29 = vand.u32 4294901760, %v2842_v13  ;;  %v9912_v36 = vand.u32 4294901760, %v8143_v42  ;;  %v82_v5 = vld [vmem:[#allocation2 + $0x138] sm:$0xff] }
 0x106   :  { %9908 = vst [vmem:[#allocation30_spill] sm:$0xff] %v8236_v31  ;;  %2579 = vmatmul.mubr.f32.gmra.mrb[78].mxu0 %v9910_v18  ;;  %v2857_v7 = vsub.f32 %v8140_v51, %v9911_v45  ;;  %v8247_v41 = vsub.f32 %v68_v34, %v8200_v4  ;;  %v2852_v52 = vand.u32 4294901760, %v2851_v3  ;;  %v8252_v54 = vsub.f32 %v76_v26, %v8210_v2  ;;  %v90_v26 = vld [vmem:[#allocation2 + $0x178] sm:$0xff] }
 0x107   :  { %v2866_v0 = vsub.f32 %v8143_v42, %v9912_v36  ;;  %6357 = vmatpush3.bf16.msra.mxu0 %v8188_v58  ;;  %2838 = vmatprep.mubr.f32.mxu0 %v2837_v9  ;;  %v8254_v13 = vand.u32 4294901760, %v83_v6  ;;  %v9915_v45 = vand.u32 4294901760, %v7934_v53  ;;  %v9916_v34 = vand.u32 4294901760, %v7936_v60  ;;  %v9917_v9 = vld [vmem:[#allocation84_spill] sm:$0xff] }
 0x108   :  { %9913 = vst [vmem:[#allocation32_spill] sm:$0xff] %v8252_v54  ;;  %1976 = vmatmul.mubr.f32.gmra.mrb[78].mxu1 %v9910_v18  ;;  %6391 = vmatprep.subr.bf16.mxu0 %v6390_v12  ;;  %v6394_v3 = vpack.c.bf16 %v8065_v46, %v8060_v62  ;;  %v9918_v32 = vand.u32 4294901760, %v9780_v39  ;;  %v2858_v12 = vand.u32 4294901760, %v2857_v7  ;;  %v9514_v2 = vand.u32 4294901760, %v8247_v41  ;;  %v89_v39 = vld [vmem:[#allocation2 + $0x170] sm:$0xff] }
 0x109   :  { %9914 = vst [vmem:[#allocation34_spill] sm:$0xff] %v8254_v13  ;;  %v8259_v51 = vsub.f32 %v7934_v53, %v9915_v45  ;;  %v8264_v36 = vsub.f32 %v7936_v60, %v9916_v34  ;;  %6261 = vmatpush3.bf16.msra.mxu1 %v9917_v9  ;;  %v6396_v53 = vpack.c.bf16 %v8108_v63, %v8070_v19  ;;  %v9919_v45 = vand.u32 4294901760, %v8191_v15 }
 0x10a   :  { %2281 = vmatprep.mubr.f32.mxu1 %v9918_v32  ;;  %v8278_v34 = vsub.f32 %v75_v40, %v8236_v31  ;;  %6295 = vmatprep.subr.bf16.mxu1 %v9813_v43  ;;  %v2867_v58 = vand.u32 4294901760, %v2866_v0  ;;  %v8282_v4 = vand.u32 4294901760, %v82_v5  ;;  %v97_v32 = vld [vmem:[#allocation2 + $0x1b0] sm:$0xff]  ;;  %v9922_v18 = vand.u32 4294901760, %v8208_v33 }
 0x10b   :  { %v2872_v60 = vsub.f32 %v8191_v15, %v9919_v45  ;;  %2844 = vmatmul.mubr.f32.vlgmr.msra.gmra.mrb[80].mxu0 %v2843_v29  ;;  %v8289_v31 = vsub.f32 %v83_v6, %v8254_v13  ;;  %v8291_v29 = vand.u32 4294901760, %v90_v26  ;;  %v9925_v43 = vand.u32 4294901760, %v7960_v11 }
 0x10c   :  { %9920 = vst [vmem:[#allocation36_spill] sm:$0xff] %v8278_v34  ;;  %9921 = vst [vmem:[#allocation38_spill] sm:$0xff] %v8282_v4  ;;  %6393 = vmatpush3.bf16.msra.mxu0 %v6392_v61  ;;  %2853 = vmatprep.mubr.f32.mxu0 %v2852_v52  ;;  %v2881_v45 = vsub.f32 %v8208_v33, %v9922_v18  ;;  %v9926_v7 = vand.u32 4294901760, %v7962_v17  ;;  %v9927_v52 = vand.u32 4294901760, %v9785_v20  ;;  %v9928_v6 = vand.u32 4294901760, %v7966_v57 }
 0x10d   :  { %9923 = vst [vmem:[#allocation40_spill] sm:$0xff] %v8289_v31  ;;  %9924 = vst [vmem:[#allocation42_spill] sm:$0xff] %v8291_v29  ;;  %v8296_v0 = vsub.f32 %v7960_v11, %v9925_v43  ;;  %6395 = vmatprep.subr.bf16.mxu0 %v6394_v3  ;;  %v6398_v18 = vpack.c.bf16 %v8134_v30, %v8123_v1  ;;  %v9929_v11 = vand.u32 4294901760, %v9786_v55  ;;  %v8316_v43 = vand.u32 4294901760, %v89_v39 }
 0x10e   :  { %v8301_v61 = vsub.f32 %v7962_v17, %v9926_v7  ;;  %2285 = vmatmul.mubr.f32.vlgmr.msra.gmra.mrb[80].mxu1 %v9927_v52  ;;  %v8310_v40 = vsub.f32 %v7966_v57, %v9928_v6  ;;  %v9516_v17 = vand.u32 4294901760, %v8278_v34  ;;  %v8318_v20 = vand.u32 4294901760, %v97_v32 }
 0x10f   :  { %6297 = vmatpush3.bf16.msra.mxu1 %v9818_v27  ;;  %2292 = vmatprep.mubr.f32.mxu1 %v9929_v11  ;;  %9930 = vst [vmem:[#allocation44_spill] sm:$0xff] %v8316_v43  ;;  %v2873_v3 = vand.u32 4294901760, %v2872_v60  ;;  %v6400_v7 = vpack.c.bf16 %v8167_v10, %v8162_v25  ;;  %v2887_v57 = vsub.f32 %v8247_v41, %v9514_v2  ;;  %v96_v27 = vld [vmem:[#allocation2 + $0x1a8] sm:$0xff]  ;;  %v2882_v52 = vand.u32 4294901760, %v2881_v45 }
 0x110   :  { %9931 = vst [vmem:[#allocation46_spill] sm:$0xff] %v8318_v20  ;;  %6299 = vmatprep.subr.bf16.mxu1 %v9819_v48  ;;  %2859 = vmatmul.mubr.f32.gmra.mrb[82].mxu0 %v2858_v12  ;;  %v8327_v55 = vsub.f32 %v82_v5, %v8282_v4  ;;  %v9933_v6 = vand.u32 4294901760, %v8252_v54  ;;  %v9515_v60 = vand.u32 4294901760, %v8289_v31  ;;  %v8334_v12 = vsub.f32 %v90_v26, %v8291_v29 }
 0x111   :  { %6397 = vmatpush3.bf16.msra.mxu0 %v6396_v53  ;;  %2868 = vmatprep.mubr.f32.mxu0 %v2867_v58  ;;  %v9935_v11 = vand.u32 4294901760, %v7968_v21  ;;  %v9936_v5 = vand.u32 4294901760, %v7982_v35  ;;  %v9937_v58 = vand.u32 4294901760, %v9789_v23  ;;  %v6402_v45 = vpack.c.bf16 %v8215_v22, %v8180_v28 }
 0x112   :  { %9932 = vst [vmem:[#allocation48_spill] sm:$0xff] %v8327_v55  ;;  %v2896_v48 = vsub.f32 %v8252_v54, %v9933_v6  ;;  %9934 = vst [vmem:[#allocation50_spill] sm:$0xff] %v8334_v12  ;;  %6399 = vmatprep.subr.bf16.mxu0 %v6398_v18  ;;  %v9938_v26 = vand.u32 4294901760, %v9790_v14  ;;  %v8357_v6 = vsub.f32 %v89_v39, %v8316_v43  ;;  %v8362_v23 = vand.u32 4294901760, %v96_v27  ;;  %v9967_v43 = vld [vmem:[#allocation60_spill] sm:$0xff] }
 0x113   :  { %v8339_v2 = vsub.f32 %v7968_v21, %v9935_v11  ;;  %v8344_v53 = vsub.f32 %v7982_v35, %v9936_v5  ;;  %2296 = vmatmul.mubr.f32.gmra.mrb[82].mxu1 %v9937_v58  ;;  %v2902_v21 = vsub.f32 %v8278_v34, %v9516_v17  ;;  %v8360_v35 = vsub.f32 %v97_v32, %v8318_v20  ;;  %v9962_v20 = vld [vmem:[#allocation59_spill] sm:$0xff]  ;;  %v9982_v34 = vld [vmem:[#allocation92_spill] sm:$0xff] }
 0x114   :  { %6301 = vmatpush3.bf16.msra.mxu1 %v9824_v8  ;;  %2303 = vmatprep.mubr.f32.mxu1 %v9938_v26  ;;  %9939 = vst [vmem:[#allocation51_spill] sm:$0xff] %v8357_v6  ;;  %9941 = vst [vmem:[#allocation53_spill] sm:$0xff] %v8362_v23  ;;  %v9942_v18 = vand.u32 4294901760, %v7984_v44  ;;  %v9943_v14 = vand.u32 4294901760, %v8005_v16  ;;  %v2888_v39 = vand.u32 4294901760, %v2887_v57  ;;  %v9517_v5 = vand.u32 4294901760, %v8327_v55 }
 0x115   :  { %9940 = vst [vmem:[#allocation52_spill] sm:$0xff] %v8360_v35  ;;  %6303 = vmatprep.subr.bf16.mxu1 %v9825_v49  ;;  %2874 = vmatmul.mubr.f32.gmra.mrb[84].mxu0 %v2873_v3  ;;  %v6404_v32 = vpack.c.bf16 %v8229_v24, %v8220_v56  ;;  %v2897_v58 = vand.u32 4294901760, %v2896_v48  ;;  %v9518_v26 = vand.u32 4294901760, %v8334_v12  ;;  %v9945_v3 = vand.u32 4294901760, %v8053_v59  ;;  %v9946_v57 = vld [vmem:[#allocation17_spill] sm:$0xff] }
 0x116   :  { %v8367_v11 = vsub.f32 %v7984_v44, %v9942_v18  ;;  %v8372_v8 = vsub.f32 %v8005_v16, %v9943_v14  ;;  %6401 = vmatpush3.bf16.msra.mxu0 %v6400_v7  ;;  %2883 = vmatprep.mubr.f32.mxu0 %v2882_v52  ;;  %v2911_v44 = vsub.f32 %v8289_v31, %v9515_v60  ;;  %v9944_v16 = vand.u32 4294901760, %v8007_v47  ;;  %v9948_v18 = vld [vmem:[#allocation55_spill] sm:$0xff] }
 0x117   :  { %v8390_v7 = vsub.f32 %v8053_v59, %v9945_v3  ;;  %v9947_v52 = vand.u32 4294901760, %v9946_v57  ;;  %6403 = vmatprep.subr.bf16.mxu0 %v6402_v45  ;;  %v6406_v48 = vpack.c.bf16 %v8264_v36, %v8259_v51  ;;  %v9949_v14 = vld [vmem:[#allocation83_spill] sm:$0xff]  ;;  %v2903_v17 = vand.u32 4294901760, %v2902_v21  ;;  %v9952_v3 = vld [vmem:[#allocation56_spill] sm:$0xff] }
 0x118   :  { %v8385_v49 = vsub.f32 %v8007_v47, %v9944_v16  ;;  %6305 = vmatpush3.bf16.msra.mxu1 %v9948_v18  ;;  %v9950_v60 = vand.u32 4294901760, %v9949_v14  ;;  %v8402_v59 = vsub.f32 %v96_v27, %v8362_v23  ;;  %v2917_v45 = vsub.f32 %v8327_v55, %v9517_v5  ;;  %v9953_v18 = vld [vmem:[#allocation39_spill] sm:$0xff] }
 0x119   :  { %2307 = vmatmul.mubr.f32.gmra.mrb[84].mxu1 %v9947_v52  ;;  %6307 = vmatprep.subr.bf16.mxu1 %v9952_v3  ;;  %v6408_v21 = vpack.c.bf16 %v8301_v61, %v8296_v0  ;;  %v2912_v27 = vand.u32 4294901760, %v2911_v44  ;;  %v2964_v14 = vand.u32 4294901760, %v9953_v18  ;;  %v9954_v3 = vld [vmem:[#allocation41_spill] sm:$0xff]  ;;  %v9956_v52 = vld [vmem:[#allocation43_spill] sm:$0xff]  ;;  %v6410_v44 = vpack.c.bf16 %v8339_v2, %v8310_v40 }
 0x11a   :  { %2314 = vmatprep.mubr.f32.mxu1 %v9950_v60  ;;  %9951 = vst [vmem:[#allocation54_spill] sm:$0xff] %v8402_v59  ;;  %2889 = vmatmul.mubr.f32.gmra.mrb[86].mxu0 %v2888_v39  ;;  %v2926_v39 = vsub.f32 %v8334_v12, %v9518_v26  ;;  %v9955_v5 = vand.u32 4294901760, %v9954_v3  ;;  %v9957_v16 = vand.u32 4294901760, %v9956_v52  ;;  %v9960_v26 = vld [vmem:[#allocation18_spill] sm:$0xff]  ;;  %v2978_v31 = vand.u32 4294901760, %v8108_v63 }
 0x11b   :  { %6405 = vmatpush3.bf16.msra.mxu0 %v6404_v32  ;;  %2898 = vmatprep.mubr.f32.mxu0 %v2897_v58  ;;  %v9958_v58 = vld [vmem:[#allocation19_spill] sm:$0xff]  ;;  %v9961_v47 = vand.u32 4294901760, %v9960_v26 }
 0x11c   :  { %v8420_v57 = vsub.f32 %v9954_v3, %v9955_v5  ;;  %v8425_v32 = vsub.f32 %v9956_v52, %v9957_v16  ;;  %v9959_v60 = vand.u32 4294901760, %v9958_v58  ;;  %6407 = vmatprep.subr.bf16.mxu0 %v6406_v48  ;;  %6309 = vmatpush3.bf16.msra.mxu1 %v9962_v20  ;;  %v9963_v5 = vld [vmem:[#allocation87_spill] sm:$0xff]  ;;  %v9965_v16 = vand.u32 4294901760, %v8357_v6 }
 0x11d   :  { %v8434_v23 = vsub.f32 %v9960_v26, %v9961_v47  ;;  %v9964_v3 = vand.u32 4294901760, %v9963_v5  ;;  %6311 = vmatprep.subr.bf16.mxu1 %v9967_v43  ;;  %v2918_v26 = vand.u32 4294901760, %v2917_v45  ;;  %v9968_v47 = vand.u32 4294901760, %v8001_v50  ;;  %v9971_v58 = vld [vmem:[#allocation47_spill] sm:$0xff] }
 0x11e   :  { %2318 = vmatmul.mubr.f32.gmra.mrb[86].mxu1 %v9959_v60  ;;  %v2932_v52 = vsub.f32 %v8357_v6, %v9965_v16  ;;  %v9966_v60 = vand.u32 4294901760, %v8360_v35  ;;  %2904 = vmatmul.mubr.f32.gmra.mrb[88].mxu0 %v2903_v17  ;;  %v9969_v5 = vand.u32 4294901760, %v8012_v38  ;;  %v9970_v16 = vand.u32 4294901760, %v8023_v37 }
 0x11f   :  { %2325 = vmatprep.mubr.f32.mxu1 %v9964_v3  ;;  %v3070_v20 = vsub.f32 %v8001_v50, %v9968_v47  ;;  %6409 = vmatpush3.bf16.msra.mxu0 %v6408_v21  ;;  %v2927_v43 = vand.u32 4294901760, %v2926_v39  ;;  %v2965_v17 = vsub.f32 %v9953_v18, %v2964_v14  ;;  %v3083_v45 = vand.u32 4294901760, %v8060_v62  ;;  %v9975_v21 = vld [vmem:[#allocation24_spill] sm:$0xff]  ;;  %v9977_v18 = vld [vmem:[#allocation63_spill] sm:$0xff] }
 0x120   :  { %v2941_v48 = vsub.f32 %v8360_v35, %v9966_v60  ;;  %v3077_v3 = vsub.f32 %v8012_v38, %v9969_v5  ;;  %v2958_v29 = vsub.f32 %v8023_v37, %v9970_v16  ;;  %2913 = vmatprep.mubr.f32.mxu0 %v2912_v27  ;;  %v6412_v60 = vpack.c.bf16 %v8367_v11, %v8344_v53  ;;  %v9973_v5 = vld [vmem:[#allocation20_spill] sm:$0xff]  ;;  %v9978_v16 = vld [vmem:[#allocation90_spill] sm:$0xff] }
 0x121   :  { %v9972_v47 = vand.u32 4294901760, %v9971_v58  ;;  %v9974_v13 = vand.u32 4294901760, %v9973_v5  ;;  %v9976_v27 = vand.u32 4294901760, %v9975_v21  ;;  %6411 = vmatprep.subr.bf16.mxu0 %v6410_v44  ;;  %v6414_v39 = vpack.c.bf16 %v8385_v49, %v8372_v8  ;;  %6313 = vmatpush3.bf16.msra.mxu1 %v9977_v18  ;;  %v9981_v21 = vld [vmem:[#allocation65_spill] sm:$0xff] }
 0x122   :  { %v9979_v6 = vand.u32 4294901760, %v9978_v16  ;;  %v2933_v12 = vand.u32 4294901760, %v2932_v52  ;;  %6315 = vmatprep.subr.bf16.mxu1 %v9981_v21  ;;  %2919 = vmatmul.mubr.f32.gmra.mrb[90].mxu0 %v2918_v26  ;;  %v2942_v44 = vand.u32 4294901760, %v2941_v48  ;;  %v3078_v55 = vand.u32 4294901760, %v3077_v3  ;;  %v9985_v3 = vld [vmem:[#allocation94_spill] sm:$0xff] }
 0x123   :  { %v8463_v4 = vsub.f32 %v9971_v58, %v9972_v47  ;;  %v8468_v35 = vsub.f32 %v9973_v5, %v9974_v13  ;;  %2329 = vmatmul.mubr.f32.gmra.mrb[88].mxu1 %v9976_v27  ;;  %v6416_v58 = vpack.c.bf16 %v8420_v57, %v8390_v7  ;;  %v9980_v47 = vand.u32 4294901760, %v8402_v59  ;;  %6413 = vmatpush3.bf16.msra.mxu0 %v6412_v60 }
 0x124   :  { %2336 = vmatprep.mubr.f32.mxu1 %v9979_v6  ;;  %v3090_v5 = vand.u32 4294901760, %v8065_v46  ;;  %v3071_v27 = vand.u32 4294901760, %v3070_v20  ;;  %v2959_v18 = vand.u32 4294901760, %v2958_v29  ;;  %2928 = vmatprep.mubr.f32.mxu0 %v2927_v43  ;;  %v2966_v6 = vand.u32 4294901760, %v2965_v17  ;;  %v9984_v20 = vld [vmem:[#allocation67_spill] sm:$0xff] }
 0x125   :  { %v2947_v13 = vsub.f32 %v8402_v59, %v9980_v47  ;;  %v3084_v52 = vsub.f32 %v8060_v62, %v3083_v45  ;;  %v2971_v16 = vand.u32 4294901760, %v8070_v19  ;;  %v9983_v47 = vand.u32 4294901760, %v9982_v34  ;;  %6415 = vmatprep.subr.bf16.mxu0 %v6414_v39  ;;  %6317 = vmatpush3.bf16.msra.mxu1 %v9984_v20 }
 0x126   :  { %v6418_v26 = vpack.c.bf16 %v8434_v23, %v8425_v32  ;;  %v3097_v48 = vand.u32 4294901760, %v8123_v1  ;;  %v3104_v29 = vand.u32 4294901760, %v8134_v30  ;;  %v9986_v60 = vand.u32 4294901760, %v9985_v3  ;;  %2934 = vmatmul.mubr.f32.gmra.mrb[92].mxu0 %v2933_v12 }
 0x127   :  { %2340 = vmatmul.mubr.f32.gmra.mrb[90].mxu1 %v9983_v47  ;;  %v2948_v62 = vand.u32 4294901760, %v2947_v13  ;;  %v6420_v43 = vpack.c.bf16 %v8468_v35, %v8463_v4  ;;  %v9987_v34 = vand.u32 4294901760, %v8001_v50  ;;  %v9988_v17 = vand.u32 4294901760, %v8012_v38  ;;  %v9989_v47 = vld [vmem:[#allocation71_spill] sm:$0xff]  ;;  %6417 = vmatpush3.bf16.msra.mxu0 %v6416_v58  ;;  %v9993_v58 = vld [vmem:[#allocation77_spill] sm:$0xff] }
 0x128   :  { %2347 = vmatprep.mubr.f32.mxu1 %v9986_v60  ;;  %v3091_v21 = vsub.f32 %v8065_v46, %v3090_v5  ;;  %6319 = vmatprep.subr.bf16.mxu1 %v9989_v47  ;;  %v6358_v59 = vpack.c.bf16 %v3078_v55, %v3071_v27  ;;  %v9990_v20 = vand.u32 4294901760, %v8023_v37  ;;  %v2985_v3 = vand.u32 4294901760, %v8162_v25  ;;  %v9991_v46 = vld [vmem:[#allocation96_spill] sm:$0xff] }
 0x129   :  { %v6454_v39 = vpack.c.bf16 %v9988_v17, %v9987_v34  ;;  %v2992_v13 = vand.u32 4294901760, %v8167_v10  ;;  %2943 = vmatprep.mubr.f32.mxu0 %v2942_v44  ;;  %v6360_v60 = vpack.c.bf16 %v2966_v6, %v2959_v18  ;;  %v3085_v50 = vand.u32 4294901760, %v3084_v52  ;;  %6419 = vmatprep.subr.bf16.mxu0 %v6418_v26  ;;  %v9994_v44 = vld [vmem:[#allocation98_spill] sm:$0xff]  ;;  %v9996_v52 = vld [vmem:[#allocation81_spill] sm:$0xff] }
 0x12a   :  { %v6456_v54 = vpack.c.bf16 %v2964_v14, %v9990_v20  ;;  %v2972_v38 = vsub.f32 %v8070_v19, %v2971_v16  ;;  %v2979_v34 = vsub.f32 %v8108_v63, %v2978_v31  ;;  %v9992_v17 = vand.u32 4294901760, %v9991_v46  ;;  %6321 = vmatpush3.bf16.msra.mxu1 %v9993_v58  ;;  %2949 = vmatmul.mubr.f32.gmra.mrb[94].mxu0 %v2948_v62  ;;  %v9997_v20 = vld [vmem:[#allocation37_spill] sm:$0xff] }
 0x12b   :  { %v3098_v55 = vsub.f32 %v8123_v1, %v3097_v48  ;;  %v3105_v37 = vsub.f32 %v8134_v30, %v3104_v29  ;;  %v3111_v12 = vand.u32 4294901760, %v8180_v28  ;;  %v3118_v14 = vand.u32 4294901760, %v8215_v22  ;;  %6323 = vmatprep.subr.bf16.mxu1 %v9996_v52  ;;  %6421 = vmatpush3.bf16.msra.mxu0 %v6420_v43 }
 0x12c   :  { %2351 = vmatmul.mubr.f32.gmra.mrb[92].mxu1 %v9992_v17  ;;  %v9995_v27 = vand.u32 4294901760, %v9994_v44  ;;  %v3092_v19 = vand.u32 4294901760, %v3091_v21  ;;  %v6458_v18 = vpack.c.bf16 %v3090_v5, %v3083_v45  ;;  %v2999_v63 = vand.u32 4294901760, %v8220_v56  ;;  %3365 = vmatprep.mubr.f32.mxu0 %v9997_v20  ;;  %v9998_v17 = vld [vmem:[#allocation29_spill] sm:$0xff]  ;;  %v10003_v44 = vld [vmem:[#allocation68_spill] sm:$0xff] }
 0x12d   :  { %v3006_v6 = vand.u32 4294901760, %v8229_v24  ;;  %v6460_v1 = vpack.c.bf16 %v2978_v31, %v2971_v16  ;;  %v2986_v30 = vsub.f32 %v8162_v25, %v2985_v3  ;;  %v2993_v26 = vsub.f32 %v8167_v10, %v2992_v13  ;;  %6455 = vmatprep.subr.bf16.mxu0 %v6454_v39  ;;  %v10000_v16 = vld [vmem:[#allocation66_spill] sm:$0xff] }
 0x12e   :  { %2358 = vmatprep.mubr.f32.mxu1 %v9995_v27  ;;  %v3125_v47 = vand.u32 4294901760, %v8259_v51  ;;  %v2973_v46 = vand.u32 4294901760, %v2972_v38  ;;  %v2980_v21 = vand.u32 4294901760, %v2979_v34  ;;  %v6462_v45 = vpack.c.bf16 %v3104_v29, %v3097_v48  ;;  %6325 = vmatpush3.bf16.msra.mxu1 %v9917_v9  ;;  %v10001_v29 = vld [vmem:[#allocation69_spill] sm:$0xff] }
 0x12f   :  { %v3132_v5 = vand.u32 4294901760, %v8264_v36  ;;  %v9999_v58 = vand.u32 4294901760, %v9998_v17  ;;  %v3099_v62 = vand.u32 4294901760, %v3098_v55  ;;  %v3106_v31 = vand.u32 4294901760, %v3105_v37  ;;  %6359 = vmatprep.subr.bf16.mxu1 %v6358_v59  ;;  %3368 = vmatmul.mubr.f32.vlgmr.msra.gmra.mrb[96].mxu0 %v10001_v29  ;;  %v10002_v37 = vld [vmem:[#allocation21_spill] sm:$0xff] }
 0x130   :  { %v3112_v25 = vsub.f32 %v8180_v28, %v3111_v12  ;;  %v3119_v10 = vsub.f32 %v8215_v22, %v3118_v14  ;;  %v6362_v43 = vpack.c.bf16 %v3092_v19, %v3085_v50  ;;  %v3000_v38 = vsub.f32 %v8220_v56, %v2999_v63  ;;  %6457 = vmatpush3.bf16.msra.mxu0 %v6456_v54 }
 0x131   :  { %2362 = vmatmul.mubr.f32.gmra.mrb[94].mxu1 %v9999_v58  ;;  %v3007_v48 = vsub.f32 %v8229_v24, %v3006_v6  ;;  %v2987_v34 = vand.u32 4294901760, %v2986_v30  ;;  %v2994_v39 = vand.u32 4294901760, %v2993_v26  ;;  %v3126_v55 = vsub.f32 %v8259_v51, %v3125_v47  ;;  %3374 = vmatprep.mubr.f32.mxu0 %v10002_v37  ;;  %v10004_v51 = vld [vmem:[#allocation70_spill] sm:$0xff]  ;;  %v10005_v26 = vld [vmem:[#allocation23_spill] sm:$0xff] }
 0x132   :  { %2681 = vmatprep.mubr.f32.mxu1 %v10000_v16  ;;  %v3013_v28 = vand.u32 4294901760, %v8296_v0  ;;  %v6364_v22 = vpack.c.bf16 %v2980_v21, %v2973_v46  ;;  %v6464_v9 = vpack.c.bf16 %v2992_v13, %v2985_v3  ;;  %v3133_v50 = vsub.f32 %v8264_v36, %v3132_v5  ;;  %6459 = vmatprep.subr.bf16.mxu0 %v6458_v18  ;;  %v8545_v13 = vld [vmem:[#allocation5 + $0x300] sm:$0xff]  ;;  %v8547_v36 = vld [vmem:[#allocation5 + $0x308] sm:$0xff] }
 0x133   :  { %v3020_v56 = vand.u32 4294901760, %v8301_v61  ;;  %v6366_v24 = vpack.c.bf16 %v3106_v31, %v3099_v62  ;;  %v3113_v59 = vand.u32 4294901760, %v3112_v25  ;;  %v3120_v27 = vand.u32 4294901760, %v3119_v10  ;;  %3377 = vmatmul.mubr.f32.gmra.mrb[98].mxu0 %v10005_v26  ;;  %v10006_v62 = vld [vmem:[#allocation73_spill] sm:$0xff]  ;;  %v4810_v10 = vpop.f32.mrb[0].mxu1 }
 0x134   :  { %v6466_v19 = vpack.c.bf16 %v3118_v14, %v3111_v12  ;;  %v3001_v52 = vand.u32 4294901760, %v3000_v38  ;;  %v3008_v54 = vand.u32 4294901760, %v3007_v48  ;;  %v3139_v30 = vand.u32 4294901760, %v8310_v40  ;;  %6461 = vmatpush3.bf16.msra.mxu0 %v6460_v1  ;;  %3383 = vmatprep.mubr.f32.mxu0 %v8143_v42  ;;  %v4811_v16 = vpop.f32.mrb[1].mxu1  ;;  %v4922_v48 = vpop.f32.mrb[0].mxu0 }
 0x135   :  { %2683 = vmatmul.mubr.f32.vlgmr.msra.gmra.mrb[96].mxu1 %v10003_v44  ;;  %v3146_v3 = vand.u32 4294901760, %v8339_v2  ;;  %v6368_v18 = vpack.c.bf16 %v2994_v39, %v2987_v34  ;;  %v6468_v46 = vpack.c.bf16 %v3006_v6, %v2999_v63  ;;  %v3127_v21 = vand.u32 4294901760, %v3126_v55  ;;  %6463 = vmatprep.subr.bf16.mxu0 %v6462_v45  ;;  %v10007_v6 = vld [vmem:[#allocation75_spill] sm:$0xff]  ;;  %v4923_v44 = vpop.f32.mrb[1].mxu0 }
 0x136   :  { %6361 = vmatpush3.bf16.msra.mxu1 %v6360_v60  ;;  %2688 = vmatprep.mubr.f32.mxu1 %v10004_v51  ;;  %v3014_v60 = vsub.f32 %v8296_v0, %v3013_v28  ;;  %v3134_v12 = vand.u32 4294901760, %v3133_v50  ;;  %v3021_v14 = vsub.f32 %v8301_v61, %v3020_v56  ;;  %v3027_v17 = vand.u32 4294901760, %v8344_v53  ;;  %v10009_v51 = vld [vmem:[#allocation80_spill] sm:$0xff] }
 0x137   :  { %6363 = vmatprep.subr.bf16.mxu1 %v6362_v43  ;;  %v3034_v58 = vand.u32 4294901760, %v8367_v11  ;;  %v6370_v31 = vpack.c.bf16 %v3120_v27, %v3113_v59  ;;  %v6470_v25 = vpack.c.bf16 %v3132_v5, %v3125_v47  ;;  %v9550_v63 = vand.u32 4294901760, %v8545_v13  ;;  %3386 = vmatmul.mubr.f32.gmra.mrb[100].mxu0 %v8191_v15 }
 0x138   :  { %v9549_v0 = vand.u32 4294901760, %v8547_v36  ;;  %v6372_v1 = vpack.c.bf16 %v3008_v54, %v3001_v52  ;;  %v3140_v61 = vsub.f32 %v8310_v40, %v3139_v30  ;;  %v3147_v45 = vsub.f32 %v8339_v2, %v3146_v3  ;;  %6465 = vmatpush3.bf16.msra.mxu0 %v6464_v9  ;;  %3392 = vmatprep.mubr.f32.mxu0 %v8208_v33 }
 0x139   :  { %2690 = vmatmul.mubr.f32.gmra.mrb[98].mxu1 %v10006_v62  ;;  %v3153_v47 = vand.u32 4294901760, %v8372_v8  ;;  %v3015_v5 = vand.u32 4294901760, %v3014_v60  ;;  %v6472_v43 = vpack.c.bf16 %v3020_v56, %v3013_v28  ;;  %v8567_v38 = vadd.f32 %v4811_v16, %v4810_v10  ;;  %v10008_v28 = vld [vmem:[#allocation76_spill] sm:$0xff]  ;;  %6467 = vmatprep.subr.bf16.mxu0 %v6466_v19  ;;  %v4925_v62 = vpop.f32.mrb[2].mxu0 }
 0x13a   :  { %6365 = vmatpush3.bf16.msra.mxu1 %v6364_v22  ;;  %2695 = vmatprep.mubr.f32.mxu1 %v10007_v6  ;;  %v3160_v34 = vand.u32 4294901760, %v8385_v49  ;;  %v6374_v39 = vpack.c.bf16 %v3134_v12, %v3127_v21  ;;  %v3022_v55 = vand.u32 4294901760, %v3021_v14  ;;  %v3028_v22 = vsub.f32 %v8344_v53, %v3027_v17  ;;  %v10010_v16 = vld [vmem:[#allocation32_spill] sm:$0xff] }
 0x13b   :  { %6367 = vmatprep.subr.bf16.mxu1 %v6366_v24  ;;  %v3035_v50 = vsub.f32 %v8367_v11, %v3034_v58  ;;  %v8578_v56 = vadd.f32 %v4923_v44, %v4922_v48  ;;  %v4813_v24 = vpop.f32.mrb[2].mxu1  ;;  %v3041_v9 = vand.u32 4294901760, %v8390_v7  ;;  %v8584_v59 = vsub.f32 %v8545_v13, %v9550_v63  ;;  %3395 = vmatmul.mubr.f32.gmra.mrb[102].mxu0 %v8247_v41  ;;  %v4926_v48 = vpop.f32.mrb[3].mxu0  ;;  %v10011_v44 = vld [vmem:[#allocation82_spill] sm:$0xff]  ;;  %v10016_v11 = vld [vmem:[#allocation88_spill] sm:$0xff] }
 0x13c   :  { %v8589_v27 = vsub.f32 %v8547_v36, %v9549_v0  ;;  %v3141_v52 = vand.u32 4294901760, %v3140_v61  ;;  %v3148_v19 = vand.u32 4294901760, %v3147_v45  ;;  %v4814_v54 = vpop.f32.mrb[3].mxu1  ;;  %v3154_v21 = vsub.f32 %v8372_v8, %v3153_v47  ;;  %6469 = vmatpush3.bf16.msra.mxu0 %v6468_v46  ;;  %3401 = vmatprep.mubr.f32.mxu0 %v10010_v16  ;;  %v8715_v0 = vld [vmem:[%s9232_s2] ss:$0 sm:$0xff]  ;;  %v10049_v63 = vld [vmem:[#allocation16_spill] sm:$0xff] }
 0x13d   :  { %2697 = vmatmul.mubr.f32.gmra.mrb[100].mxu1 %v10008_v28  ;;  %v3048_v60 = vand.u32 4294901760, %v8420_v57  ;;  %v8597_v12 = vadd.f32 %v4814_v54, %v4813_v24  ;;  %v3161_v14 = vsub.f32 %v8385_v49, %v3160_v34  ;;  %v3174_v10 = vand.u32 4294901760, %v8434_v23  ;;  %6471 = vmatprep.subr.bf16.mxu0 %v6470_v25  ;;  %v10013_v25 = vld [vmem:[#allocation36_spill] sm:$0xff]  ;;  %v4928_v54 = vpop.f32.mrb[4].mxu0  ;;  %s6675_s2 = smov [#allocation7]  }
 0x13e   :  { %6369 = vmatpush3.bf16.msra.mxu1 %v6368_v18  ;;  %2702 = vmatprep.mubr.f32.mxu1 %v10009_v51  ;;  %v3167_v18 = vand.u32 4294901760, %v8425_v32  ;;  %v6376_v6 = vpack.c.bf16 %v3022_v55, %v3015_v5  ;;  %v3029_v61 = vand.u32 4294901760, %v3028_v22  ;;  %v3036_v45 = vand.u32 4294901760, %v3035_v50  ;;  %v10012_v55 = vld [vmem:[#allocation85_spill] sm:$0xff]  ;;  %s4764_s13 = sshll.u32 %s6675_s2, 4  ;;  %s4765_s13 = int_to_ptr.vmem [resolvable:$true] %s4764_s13 }
 0x13f   :  { %6371 = vmatprep.subr.bf16.mxu1 %v6370_v31  ;;  %v6474_v31 = vpack.c.bf16 %v3146_v3, %v3139_v30  ;;  %v3042_v49 = vsub.f32 %v8390_v7, %v3041_v9  ;;  %v8611_v28 = vadd.f32 %v4926_v48, %v4925_v62  ;;  %v9548_v46 = vand.u32 4294901760, %v8584_v59  ;;  %3404 = vmatmul.mubr.f32.gmra.mrb[104].mxu0 %v10013_v25  ;;  %v10014_v62 = vld [vmem:[#allocation40_spill] sm:$0xff]  ;;  %s6641_s14 = scalar_lea.vmem %s4765_s13, 1024  ;;  %p6646_p3 = scmp.lt.s32.totalorder %s4765_s13, %s4765_s13 }
 0x140   :  { %v9547_v5 = vand.u32 4294901760, %v8589_v27  ;;  %v6378_v40 = vpack.c.bf16 %v3148_v19, %v3141_v52  ;;  %v3049_v2 = vsub.f32 %v8420_v57, %v3048_v60  ;;  %v3055_v30 = vand.u32 4294901760, %v8463_v4  ;;  %6473 = vmatpush3.bf16.msra.mxu0 %v6472_v43  ;;  %3410 = vmatprep.mubr.f32.mxu0 %v10014_v62  ;;  %v4816_v52 = vpop.f32.mrb[4].mxu1  ;;  %v4929_v19 = vpop.f32.mrb[5].mxu0  ;;  %p6642_p2 = scmp.ne.s32.totalorder %s4765_s13, %s6641_s14  ;;  %p6647_p4 = scmp.lt.s32.totalorder %s6641_s14, %s6641_s14 }
 0x141   :  { %2704 = vmatmul.mubr.f32.gmra.mrb[102].mxu1 %v10011_v44  ;;  %v3062_v3 = vand.u32 4294901760, %v8468_v35  ;;  %v3155_v22 = vand.u32 4294901760, %v3154_v21  ;;  %v3162_v50 = vand.u32 4294901760, %v3161_v14  ;;  %v3168_v24 = vsub.f32 %v8425_v32, %v3167_v18  ;;  %v10015_v21 = vld [vmem:[#allocation86_spill] sm:$0xff]  ;;  %6475 = vmatprep.subr.bf16.mxu0 %v6474_v31  ;;  %v4931_v48 = vpop.f32.mrb[6].mxu0 }
 0x142   :  { %6373 = vmatpush3.bf16.msra.mxu1 %v6372_v1  ;;  %2709 = vmatprep.mubr.f32.mxu1 %v10012_v55  ;;  %v3175_v51 = vsub.f32 %v8434_v23, %v3174_v10  ;;  %v6380_v1 = vpack.c.bf16 %v3036_v45, %v3029_v61  ;;  %v6476_v57 = vpack.c.bf16 %v3034_v58, %v3027_v17  ;;  %v3043_v32 = vand.u32 4294901760, %v3042_v49  ;;  %v4817_v23 = vpop.f32.mrb[5].mxu1  ;;  %v10018_v44 = vld [vmem:[#allocation50_spill] sm:$0xff]  ;;  %v4932_v49 = vpop.f32.mrb[7].mxu0  ;;  %v10019_v55 = vld [vmem:[#allocation89_spill] sm:$0xff]  ;;  %p6648_p5 = por %p6647_p4, %p6646_p3 }
 0x143   :  { %6375 = vmatprep.subr.bf16.mxu1 %v6374_v39  ;;  %v6478_v39 = vpack.c.bf16 %v3160_v34, %v3153_v47  ;;  %v8630_v14 = vadd.f32 %v4929_v19, %v4928_v54  ;;  %v4142_v43 = vsub.f32 %v8584_v59, %v9548_v46  ;;  %v4149_v53 = vsub.f32 %v8589_v27, %v9547_v5  ;;  %v10017_v34 = vld [vmem:[#allocation48_spill] sm:$0xff]  ;;  %v4819_v54 = vpop.f32.mrb[6].mxu1  ;;  %v10047_v5 = vld [vmem:[#allocation34_spill] sm:$0xff] }
 0x144   :  { %v3050_v8 = vand.u32 4294901760, %v3049_v2  ;;  %v8639_v17 = vadd.f32 %v4817_v23, %v4816_v52  ;;  %v3056_v58 = vsub.f32 %v8463_v4, %v3055_v30  ;;  %v3063_v47 = vsub.f32 %v8468_v35, %v3062_v3  ;;  %3413 = vmatmul.mubr.f32.gmra.mrb[106].mxu0 %v10017_v34  ;;  %p6649_p6 = pnand %p6648_p5, %p6642_p2 }
 0x145   :  { %2711 = vmatmul.mubr.f32.gmra.mrb[104].mxu1 %v10015_v21  ;;  %v6382_v61 = vpack.c.bf16 %v3162_v50, %v3155_v22  ;;  %v3169_v45 = vand.u32 4294901760, %v3168_v24  ;;  %v3176_v31 = vand.u32 4294901760, %v3175_v51  ;;  %6477 = vmatpush3.bf16.msra.mxu0 %v6476_v57  ;;  %v6482_v4 = vpack.c.bf16 %v3174_v10, %v3167_v18  ;;  %v10020_v22 = vld [vmem:[#allocation91_spill] sm:$0xff] }
 0x146   :  { %6377 = vmatpush3.bf16.msra.mxu1 %v6376_v6  ;;  %2716 = vmatprep.mubr.f32.mxu1 %v10016_v11  ;;  %v6480_v6 = vpack.c.bf16 %v3048_v60, %v3041_v9  ;;  %v8648_v2 = vadd.f32 %v4932_v49, %v4931_v48  ;;  %v4143_v35 = vand.u32 4294901760, %v4142_v43  ;;  %v6384_v50 = vpack.c.bf16 %v3050_v8, %v3043_v32  ;;  %v10021_v57 = vld [vmem:[#allocation51_spill] sm:$0xff]  ;;  %v4820_v9 = vpop.f32.mrb[7].mxu1  ;;  %v4934_v60 = vpop.f32.mrb[8].mxu0  ;;  %v10025_v43 = vld [vmem:[#allocation54_spill] sm:$0xff] }
 0x147   :  { %6379 = vmatprep.subr.bf16.mxu1 %v6378_v40  ;;  %3419 = vmatprep.mubr.f32.mxu0 %v10018_v44  ;;  %v4150_v40 = vand.u32 4294901760, %v4149_v53  ;;  %v3057_v24 = vand.u32 4294901760, %v3056_v58  ;;  %v3064_v51 = vand.u32 4294901760, %v3063_v47  ;;  %v6386_v7 = vpack.c.bf16 %v3176_v31, %v3169_v45  ;;  %v4935_v52 = vpop.f32.mrb[9].mxu0  ;;  %v10024_v32 = vld [vmem:[#allocation95_spill] sm:$0xff]  ;;  %v10026_v53 = vld [vmem:[#allocation64_spill] sm:$0xff] }
 0x148   :  { %6479 = vmatprep.subr.bf16.mxu0 %v6478_v39  ;;  %3422 = vmatmul.mubr.f32.gmra.mrb[108].mxu0 %v10021_v57  ;;  %v10022_v39 = vld [vmem:[#allocation52_spill] sm:$0xff]  ;;  %v6484_v18 = vpack.c.bf16 %v3062_v3, %v3055_v30  ;;  %v8653_v10 = vadd.f32 %v4820_v9, %v4819_v54  ;;  %v8656_v21 = vadd.f32 %v4935_v52, %v4934_v60  ;;  %v10027_v30 = vld [vmem:[#allocation97_spill] sm:$0xff]  ;;  %v4822_v3 = vpop.f32.mrb[8].mxu1  ;;  %v4937_v11 = vpop.f32.mrb[10].mxu0  ;;  %v10029_v45 = vld [vmem:[#allocation35_spill] sm:$0xff] }
 0x149   :  { %2718 = vmatmul.mubr.f32.gmra.mrb[106].mxu1 %v10019_v55  ;;  %6481 = vmatpush3.bf16.msra.mxu0 %v6480_v6  ;;  %v6522_v19 = vpack.c.bf16 %v4150_v40, %v4143_v35  ;;  %v6388_v23 = vpack.c.bf16 %v3064_v51, %v3057_v24  ;;  %v8664_v8 = vpack.c.bf16 %v8589_v27, %v8584_v59  ;;  %v4823_v58 = vpop.f32.mrb[9].mxu1  ;;  %v4938_v47 = vpop.f32.mrb[11].mxu0  ;;  %v10030_v6 = vld [vmem:[#allocation15_spill] sm:$0xff]  ;;  %v10031_v49 = vld [vmem:[#allocation58_spill] sm:$0xff]  ;;  %v10036_v9 = vld [vmem:[#allocation12_spill] sm:$0xff] }
 0x14a   :  { %6381 = vmatpush3.bf16.msra.mxu1 %v6380_v1  ;;  %2723 = vmatprep.mubr.f32.mxu1 %v10020_v22  ;;  %v10023_v1 = vld [vmem:[#allocation93_spill] sm:$0xff]  ;;  %v8669_v31 = vadd.f32 %v4823_v58, %v4822_v3  ;;  %v8671_v48 = vadd.f32 %v4938_v47, %v4937_v11  ;;  %v10032_v55 = vld [vmem:[#allocation11_spill] sm:$0xff]  ;;  %v4825_v35 = vpop.f32.mrb[10].mxu1  ;;  %v10034_v22 = vld [vmem:[#allocation22_spill] sm:$0xff] }
 0x14b   :  { %6383 = vmatprep.subr.bf16.mxu1 %v6382_v61  ;;  %3428 = vmatprep.mubr.f32.mxu0 %v10022_v39  ;;  %v10028_v61 = vld [vmem:[#allocation57_spill] sm:$0xff]  ;;  %v4826_v40 = vpop.f32.mrb[11].mxu1  ;;  %v10035_v54 = vld [vmem:[#allocation31_spill] sm:$0xff]  ;;  %v10037_v60 = vld [vmem:[#allocation74_spill] sm:$0xff] }
 0x14c   :  { %6483 = vmatprep.subr.bf16.mxu0 %v6482_v4  ;;  %3431 = vmatmul.mubr.f32.gmra.mrb[110].mxu0 %v10025_v43  ;;  %v10033_v4 = vld [vmem:[#allocation49_spill] sm:$0xff]  ;;  %v8682_v24 = vadd.f32 %v4826_v40, %v4825_v35  ;;  %v10042_v58 = vld [vmem:[#allocation28_spill] sm:$0xff]  ;;  %v10057_v39 = vld [vmem:[#allocation46_spill] sm:$0xff] }
 0x14d   :  { %2725 = vmatmul.mubr.f32.gmra.mrb[108].mxu1 %v10023_v1  ;;  %6485 = vmatpush3.bf16.msra.mxu0 %v6484_v18  ;;  %v10038_v18 = vld [vmem:[#allocation78_spill] sm:$0xff]  ;;  %v10039_v52 = vld [vmem:[#allocation61_spill] sm:$0xff]  ;;  %v4828_v1 = vpop.f32.mrb[12].mxu1  ;;  %v10055_v43 = vld [vmem:[#allocation44_spill] sm:$0xff] }
 0x14e   :  { %6385 = vmatpush3.bf16.msra.mxu1 %v6384_v50  ;;  %2730 = vmatprep.mubr.f32.mxu1 %v10024_v32  ;;  %v4940_v50 = vpop.f32.mrb[12].mxu0  ;;  %v4829_v32 = vpop.f32.mrb[13].mxu1  ;;  %v10044_v35 = vld [vmem:[#allocation33_spill] sm:$0xff]  ;;  %v70_v57 = vld [vmem:[#allocation2 + $0xd8] sm:$0xff] }
 0x14f   :  { %6387 = vmatprep.subr.bf16.mxu1 %v6386_v7  ;;  %3782 = vmatprep.mubr.f32.mxu0 %v10026_v53  ;;  %v4941_v51 = vpop.f32.mrb[13].mxu0  ;;  %v8696_v11 = vadd.f32 %v4829_v32, %v4828_v1  ;;  %v10045_v40 = vld [vmem:[#allocation13_spill] sm:$0xff] }
 0x150   :  { %6523 = vmatprep.subr.bf16.mxu0 %v6522_v19  ;;  %3784 = vmatmul.mubr.f32.vlgmr.msra.gmra.mrb[112].mxu0 %v10029_v45  ;;  %v8686_v7 = vadd.f32 %v4941_v51, %v4940_v50  ;;  %v10046_v50 = vld [vmem:[#allocation30_spill] sm:$0xff]  ;;  %v4831_v51 = vpop.f32.mrb[14].mxu1 }
 0x151   :  { %2732 = vmatmul.mubr.f32.gmra.mrb[110].mxu1 %v10027_v30  ;;  %6525 = vmatpush3.bf16.msra.mxu0 %v6522_v19  ;;  %v4943_v19 = vpop.f32.mrb[14].mxu0  ;;  %v10041_v30 = vld [vmem:[#allocation27_spill] sm:$0xff]  ;;  %v4832_v46 = vpop.f32.mrb[15].mxu1 }
 0x152   :  { %6389 = vmatpush3.bf16.msra.mxu1 %v6388_v23  ;;  %3179 = vmatprep.mubr.f32.mxu1 %v10026_v53  ;;  %v10040_v23 = vld [vmem:[#allocation62_spill] sm:$0xff]  ;;  %v4944_v3 = vpop.f32.mrb[15].mxu0  ;;  %v8708_v1 = vadd.f32 %v4832_v46, %v4831_v51 }
 0x153   :  { %6423 = vmatprep.subr.bf16.mxu1 %v10028_v61  ;;  %3789 = vmatprep.mubr.f32.mxu0 %v10030_v6  ;;  %v8699_v47 = vadd.f32 %v4944_v3, %v4943_v19  ;;  %v10048_v19 = vld [vmem:[#allocation14_spill] sm:$0xff]  ;;  %v5034_v32 = vpop.f32.mrb[16].mxu0  ;;  %v49_v3 = vld [vmem:[#allocation2 + $0x30] sm:$0xff] }
 0x154   :  { %6527 = vmatprep.subr.bf16.mxu0 %v8664_v8  ;;  %3791 = vmatmul.mubr.f32.gmra.mrb[114].mxu0 %v10033_v4  ;;  %v10052_v51 = vld [vmem:[#allocation42_spill] sm:$0xff] }
 0x155   :  { %3181 = vmatmul.mubr.f32.vlgmr.msra.gmra.mrb[112].mxu1 %v10029_v45  ;;  %3796 = vmatprep.mubr.f32.mxu0 %v10034_v22  ;;  %10043 = vst [vmem:[#allocation84_spill] sm:$0xff] %v8699_v47  ;;  %v10060_v47 = vld [vmem:[#allocation53_spill] sm:$0xff] }
 0x156   :  { %6425 = vmatpush3.bf16.msra.mxu1 %v10031_v49  ;;  %3186 = vmatprep.mubr.f32.mxu1 %v10030_v6  ;;  %v10053_v6 = vld [vmem:[#allocation45_spill] sm:$0xff] }
 0x157   :  { %6427 = vmatprep.subr.bf16.mxu1 %v10032_v55 }
 0x158   :  { %3798 = vmatmul.mubr.f32.gmra.mrb[116].mxu0 %v10037_v60 }
 0x159   :  { %3188 = vmatmul.mubr.f32.gmra.mrb[114].mxu1 %v10033_v4  ;;  %3803 = vmatprep.mubr.f32.mxu0 %v10038_v18 }
 0x15a   :  { %6429 = vmatpush3.bf16.msra.mxu1 %v10035_v54  ;;  %3193 = vmatprep.mubr.f32.mxu1 %v10034_v22  ;;  %v338_v22 = vadd.f32 %v8567_v38, %v8715_v0 }
 0x15b   :  { %6431 = vmatprep.subr.bf16.mxu1 %v10036_v9 }
 0x15c   :  { %3805 = vmatmul.mubr.f32.gmra.mrb[118].mxu0 %v10041_v30 }
 0x15d   :  { %3195 = vmatmul.mubr.f32.gmra.mrb[116].mxu1 %v10037_v60  ;;  %3810 = vmatprep.mubr.f32.mxu0 %v10042_v58  ;;  %v56_v60 = vld [vmem:[#allocation2 + $0x68] sm:$0xff] }
 0x15e   :  { %6433 = vmatpush3.bf16.msra.mxu1 %v10039_v52  ;;  %3200 = vmatprep.mubr.f32.mxu1 %v10038_v18 }
 0x15f   :  { %6435 = vmatprep.subr.bf16.mxu1 %v10040_v23 }
 0x160   :  { %3812 = vmatmul.mubr.f32.gmra.mrb[120].mxu0 %v10046_v50 }
 0x161   :  { %3202 = vmatmul.mubr.f32.gmra.mrb[118].mxu1 %v10041_v30  ;;  %3817 = vmatprep.mubr.f32.mxu0 %v10047_v5  ;;  %v10050_v30 = vld [vmem:[#allocation38_spill] sm:$0xff] }
 0x162   :  { %6437 = vmatpush3.bf16.msra.mxu1 %v10044_v35  ;;  %3207 = vmatprep.mubr.f32.mxu1 %v10042_v58  ;;  %v5035_v58 = vpop.f32.mrb[17].mxu0 }
 0x163   :  { %6439 = vmatprep.subr.bf16.mxu1 %v10045_v40  ;;  %v8719_v46 = vadd.f32 %v5035_v58, %v5034_v32  ;;  %v5037_v45 = vpop.f32.mrb[18].mxu0  ;;  %v63_v58 = vld [vmem:[#allocation2 + $0xa0] sm:$0xff]  ;;  %v10054_v32 = vld [vmem:[#allocation72_spill] sm:$0xff] }
 0x164   :  { %3819 = vmatmul.mubr.f32.gmra.mrb[122].mxu0 %v10050_v30  ;;  %v5038_v53 = vpop.f32.mrb[19].mxu0 }
 0x165   :  { %3209 = vmatmul.mubr.f32.gmra.mrb[120].mxu1 %v10046_v50  ;;  %v4866_v50 = vpop.f32.mrb[16].mxu1  ;;  %10051 = vst [vmem:[#allocation17_spill] sm:$0xff] %v8719_v46  ;;  %3824 = vmatprep.mubr.f32.mxu0 %v10052_v51 }
 0x166   :  { %6441 = vmatpush3.bf16.msra.mxu1 %v10048_v19  ;;  %3214 = vmatprep.mubr.f32.mxu1 %v10047_v5  ;;  %v4867_v18 = vpop.f32.mrb[17].mxu1  ;;  %v8724_v5 = vsel %vm204_vm0, %v49_v3, 0  ;;  %v8732_v3 = vadd.f32 %v5038_v53, %v5037_v45  ;;  %v10058_v45 = vld [vmem:[#allocation25_spill] sm:$0xff] }
 0x167   :  { %6443 = vmatprep.subr.bf16.mxu1 %v10049_v63  ;;  %v4868_v4 = vadd.f32 %v4867_v18, %v4866_v50  ;;  %v4869_v46 = vpop.f32.mrb[18].mxu1  ;;  %v8736_v38 = vand.u32 4294901760, %v8724_v5  ;;  %v8739_v18 = vsel %vm204_vm0, %v56_v60, 0 }
 0x168   :  { %3826 = vmatmul.mubr.f32.gmra.mrb[124].mxu0 %v10055_v43  ;;  %10056 = vst [vmem:[#allocation55_spill] sm:$0xff] %v8732_v3  ;;  %v4870_v50 = vpop.f32.mrb[19].mxu1  ;;  %v77_v3 = vld [vmem:[#allocation2 + $0x110] sm:$0xff] }
 0x169   :  { %3216 = vmatmul.mubr.f32.gmra.mrb[122].mxu1 %v10050_v30  ;;  %v675_v30 = vadd.f32 %v4868_v4, %v338_v22  ;;  %3831 = vmatprep.mubr.f32.mxu0 %v10057_v39  ;;  %v353_v4 = vadd.f32 %v8597_v12, %v8715_v0  ;;  %v4871_v53 = vadd.f32 %v4870_v50, %v4869_v46  ;;  %v5040_v22 = vpop.f32.mrb[20].mxu0  ;;  %v4872_v12 = vpop.f32.mrb[20].mxu1 }
 0x16a   :  { %6445 = vmatpush3.bf16.msra.mxu1 %v10053_v6  ;;  %3221 = vmatprep.mubr.f32.mxu1 %v10052_v51  ;;  %v8743_v51 = vsel %vm204_vm0, %v63_v58, 0  ;;  %v8755_v58 = vand.u32 4294901760, %v8739_v18 }
 0x16b   :  { %6447 = vmatprep.subr.bf16.mxu1 %v10054_v32  ;;  %v8750_v60 = vadd.f32 %v8578_v56, %v675_v30  ;;  %v10059_v32 = vld [vmem:[#allocation79_spill] sm:$0xff]  ;;  %v682_v44 = vadd.f32 %v4871_v53, %v353_v4  ;;  %v8761_v50 = vand.u32 4294901760, %v8743_v51  ;;  %v8764_v56 = vsel %vm204_vm0, %v70_v57, 0  ;;  %v84_v4 = vld [vmem:[#allocation2 + $0x148] sm:$0xff] }
 0x16c   :  { %3833 = vmatmul.mubr.f32.gmra.mrb[126].mxu0 %v10060_v47  ;;  %v10062_v30 = vand.u32 4294901760, %v8545_v13  ;;  %v368_v53 = vadd.f32 %v8639_v17, %v8715_v0  ;;  %v10065_v57 = vand.u32 4294901760, %v9997_v20 }
 0x16d   :  { %3223 = vmatmul.mubr.f32.gmra.mrb[124].mxu1 %v10055_v43  ;;  %v5041_v43 = vpop.f32.mrb[21].mxu0  ;;  %5866 = vmatprep.mubr.f32.mxu0 %v8736_v38 }
 0x16e   :  { %6449 = vmatpush3.bf16.msra.mxu1 %v10058_v45  ;;  %3228 = vmatprep.mubr.f32.mxu1 %v10057_v39  ;;  %v8757_v46 = vadd.f32 %v5041_v43, %v5040_v22  ;;  %v10063_v39 = vand.u32 4294901760, %v8547_v36  ;;  %v4873_v45 = vpop.f32.mrb[21].mxu1  ;;  %v8774_v43 = vsel %vm204_vm0, %v77_v3, 0  ;;  %v5043_v13 = vpop.f32.mrb[22].mxu0  ;;  %v91_v36 = vld [vmem:[#allocation2 + $0x180] sm:$0xff]  ;;  %v8787_v3 = vand.u32 4294901760, %v8764_v56 }
 0x16f   :  { %6451 = vmatprep.subr.bf16.mxu1 %v10059_v32  ;;  %v4874_v22 = vadd.f32 %v4873_v45, %v4872_v12  ;;  %v4875_v45 = vpop.f32.mrb[22].mxu1  ;;  %v8794_v20 = vand.u32 4294901760, %v8774_v43 }
 0x170   :  { %10061 = vst [vmem:[#allocation83_spill] sm:$0xff] %v8757_v46  ;;  %v8770_v32 = vpack.c.bf16 %v10063_v39, %v10062_v30  ;;  %v10064_v46 = vld [vmem:[#allocation26_spill] sm:$0xff]  ;;  %v8782_v39 = vadd.f32 %v8611_v28, %v682_v44  ;;  %v5044_v30 = vpop.f32.mrb[23].mxu0  ;;  %5867 = vmatmul.mubr.f32.vlgmr.msra.gmra.mrb[128].mxu0 %v8755_v58  ;;  %v8797_v28 = vsel %vm204_vm0, %v84_v4, 0  ;;  %v4876_v44 = vpop.f32.mrb[23].mxu1 }
 0x171   :  { %3230 = vmatmul.mubr.f32.gmra.mrb[126].mxu1 %v10060_v47  ;;  %v689_v17 = vadd.f32 %v4874_v22, %v368_v53  ;;  %v8789_v12 = vadd.f32 %v5044_v30, %v5043_v13  ;;  %6529 = vmatpush3.bf16.msra.mxu0 %v8664_v8  ;;  %v98_v53 = vld [vmem:[#allocation2 + $0x1b8] sm:$0xff]  ;;  %v383_v8 = vadd.f32 %v8653_v10, %v8715_v0  ;;  %v10067_v13 = vand.u32 4294901760, %v10002_v37  ;;  %v5046_v4 = vpop.f32.mrb[24].mxu0  ;;  %v4878_v10 = vpop.f32.mrb[24].mxu1 }
 0x172   :  { %6453 = vmatpush3.bf16.msra.mxu1 %v10064_v46  ;;  %3535 = vmatprep.mubr.f32.mxu1 %v10065_v57  ;;  %v8802_v57 = vsel %vm204_vm0, %v91_v36, 0  ;;  %v4877_v22 = vadd.f32 %v4876_v44, %v4875_v45  ;;  %v8816_v36 = vand.u32 4294901760, %v8797_v28 }
 0x173   :  { %6487 = vmatprep.subr.bf16.mxu1 %v10028_v61  ;;  %5869 = vmatprep.mubr.f32.mxu0 %v8761_v50  ;;  %v10066_v61 = vand.u32 4294901760, %v10001_v29  ;;  %v8811_v30 = vadd.f32 %v8630_v14, %v689_v17  ;;  %v5047_v29 = vpop.f32.mrb[25].mxu0  ;;  %v8822_v37 = vand.u32 4294901760, %v8802_v57  ;;  %v8825_v14 = vsel %vm204_vm0, %v98_v53, 0 }
 0x174   :  { %6531 = vmatprep.subr.bf16.mxu0 %v8770_v32  ;;  %5870 = vmatmul.mubr.f32.gmra.mrb[130].mxu0 %v8787_v3  ;;  %v8818_v45 = vadd.f32 %v5047_v29, %v5046_v4  ;;  %v398_v17 = vadd.f32 %v8669_v31, %v8715_v0 }
 0x175   :  { %3539 = vmatmul.mubr.f32.vlgmr.msra.gmra.mrb[128].mxu1 %v10066_v61  ;;  %v696_v61 = vadd.f32 %v4877_v22, %v383_v8  ;;  %5872 = vmatprep.mubr.f32.mxu0 %v8794_v20  ;;  %v10069_v8 = vand.u32 4294901760, %v8143_v42  ;;  %v5049_v22 = vpop.f32.mrb[26].mxu0  ;;  %v8847_v42 = vsub.f32 %v8724_v5, %v8736_v38 }
 0x176   :  { %6489 = vmatpush3.bf16.msra.mxu1 %v10031_v49  ;;  %3546 = vmatprep.mubr.f32.mxu1 %v10067_v13  ;;  %v4879_v49 = vpop.f32.mrb[25].mxu1  ;;  %v5050_v53 = vpop.f32.mrb[27].mxu0 }
 0x177   :  { %6491 = vmatprep.subr.bf16.mxu1 %v10032_v55  ;;  %v10068_v55 = vand.u32 4294901760, %v10005_v26  ;;  %v4880_v44 = vadd.f32 %v4879_v49, %v4878_v10  ;;  %v8835_v13 = vadd.f32 %v8648_v2, %v696_v61  ;;  %v8840_v26 = vand.u32 4294901760, %v8825_v14  ;;  %v4881_v31 = vpop.f32.mrb[26].mxu1  ;;  %v5052_v49 = vpop.f32.mrb[28].mxu0 }
 0x178   :  { %5873 = vmatmul.mubr.f32.gmra.mrb[132].mxu0 %v8816_v36  ;;  %v8842_v29 = vadd.f32 %v5050_v53, %v5049_v22  ;;  %v4882_v2 = vpop.f32.mrb[27].mxu1  ;;  %v10071_v10 = vand.u32 4294901760, %v8208_v33  ;;  %v5053_v5 = vpop.f32.mrb[29].mxu0  ;;  %v8870_v33 = vsub.f32 %v8743_v51, %v8761_v50  ;;  %v428_v22 = vadd.f32 %v8696_v11, %v8715_v0 }
 0x179   :  { %3550 = vmatmul.mubr.f32.gmra.mrb[130].mxu1 %v10068_v55  ;;  %v703_v4 = vadd.f32 %v4880_v44, %v398_v17  ;;  %5875 = vmatprep.mubr.f32.mxu0 %v8822_v37  ;;  %v4883_v61 = vadd.f32 %v4882_v2, %v4881_v31  ;;  %v4884_v17 = vpop.f32.mrb[28].mxu1  ;;  %v8865_v44 = vadd.f32 %v5053_v5, %v5052_v49  ;;  %v5055_v51 = vpop.f32.mrb[30].mxu0  ;;  %v10079_v49 = vld [vmem:[#allocation50_spill] sm:$0xff] }
 0x17a   :  { %6493 = vmatpush3.bf16.msra.mxu1 %v10035_v54  ;;  %3557 = vmatprep.mubr.f32.mxu1 %v10069_v8  ;;  %v10070_v54 = vand.u32 4294901760, %v8191_v15  ;;  %v8863_v15 = vsub.f32 %v8739_v18, %v8755_v58  ;;  %v10074_v8 = vand.u32 4294901760, %v8589_v27 }
 0x17b   :  { %6495 = vmatprep.subr.bf16.mxu1 %v10036_v9  ;;  %v413_v9 = vadd.f32 %v8682_v24, %v8715_v0  ;;  %v8857_v55 = vadd.f32 %v8656_v21, %v703_v4  ;;  %v4885_v21 = vpop.f32.mrb[29].mxu1  ;;  %v10075_v4 = vand.u32 4294901760, %v10010_v16  ;;  %v8900_v16 = vsub.f32 %v8774_v43, %v8794_v20 }
 0x17c   :  { %5876 = vmatmul.mubr.f32.gmra.mrb[134].mxu0 %v8840_v26  ;;  %v4886_v53 = vadd.f32 %v4885_v21, %v4884_v17  ;;  %v4887_v11 = vpop.f32.mrb[30].mxu1  ;;  %v10082_v21 = vld [vmem:[#allocation72_spill] sm:$0xff] }
 0x17d   :  { %3561 = vmatmul.mubr.f32.gmra.mrb[132].mxu1 %v10070_v54  ;;  %v710_v24 = vadd.f32 %v4883_v61, %v413_v9  ;;  %5882 = vmatprep.mubr.f32.mxu0 %v8847_v42  ;;  %v10077_v54 = vand.u32 4294901760, %v10014_v62  ;;  %v8924_v62 = vsub.f32 %v8802_v57, %v8822_v37  ;;  %v8938_v57 = vsub.f32 %v8825_v14, %v8840_v26 }
 0x17e   :  { %6497 = vmatpush3.bf16.msra.mxu1 %v10039_v52  ;;  %3568 = vmatprep.mubr.f32.mxu1 %v10071_v10  ;;  %v10072_v52 = vand.u32 4294901760, %v8247_v41  ;;  %v5056_v41 = vpop.f32.mrb[31].mxu0  ;;  %v717_v27 = vadd.f32 %v4886_v53, %v428_v22  ;;  %v10083_v53 = vld [vmem:[#allocation51_spill] sm:$0xff] }
 0x17f   :  { %6499 = vmatprep.subr.bf16.mxu1 %v10040_v23  ;;  %v10073_v23 = vand.u32 4294901760, %v8584_v59  ;;  %v8886_v31 = vadd.f32 %v8671_v48, %v710_v24  ;;  %v8892_v59 = vsub.f32 %v8764_v56, %v8787_v3  ;;  %v8894_v2 = vadd.f32 %v5056_v41, %v5055_v51  ;;  %v4888_v48 = vpop.f32.mrb[31].mxu1  ;;  %v5146_v9 = vpop.f32.mrb[32].mxu0  ;;  %v10081_v24 = vld [vmem:[#allocation84_spill] sm:$0xff]  ;;  %v10085_v41 = vld [vmem:[#allocation25_spill] sm:$0xff] }
 0x180   :  { %5883 = vmatmul.mubr.f32.vlgmr.msra.gmra.mrb[128].mxu0 %v8863_v15  ;;  %v4889_v56 = vadd.f32 %v4888_v48, %v4887_v11  ;;  %v8911_v61 = vadd.f32 %v8686_v7, %v717_v27  ;;  %v5147_v43 = vpop.f32.mrb[33].mxu0  ;;  %v10086_v27 = vld [vmem:[#allocation52_spill] sm:$0xff]  ;;  %v10088_v48 = vld [vmem:[#allocation17_spill] sm:$0xff] }
 0x181   :  { %3572 = vmatmul.mubr.f32.gmra.mrb[134].mxu1 %v10072_v52  ;;  %v8878_v18 = vpack.c.bf16 %v10074_v8, %v10073_v23  ;;  %6533 = vmatpush3.bf16.msra.mxu0 %v8770_v32  ;;  %v8919_v10 = vadd.f32 %v5147_v43, %v5146_v9  ;;  %v5149_v5 = vpop.f32.mrb[34].mxu0  ;;  %v4060_v8 = vand.u32 4294901760, %v8847_v42  ;;  %v10087_v11 = vand.u32 4294901760, %v10086_v27 }
 0x182   :  { %6501 = vmatpush3.bf16.msra.mxu1 %v10044_v35  ;;  %3579 = vmatprep.mubr.f32.mxu1 %v10075_v4  ;;  %v10076_v35 = vand.u32 4294901760, %v10013_v25  ;;  %v8917_v25 = vsub.f32 %v8797_v28, %v8816_v36  ;;  %v10080_v28 = vand.u32 4294901760, %v10079_v49  ;;  %v5150_v52 = vpop.f32.mrb[35].mxu0  ;;  %v10084_v4 = vand.u32 4294901760, %v10083_v53  ;;  %v10092_v49 = vld [vmem:[#allocation64_spill] sm:$0xff]  ;;  %v10094_v53 = vld [vmem:[#allocation35_spill] sm:$0xff] }
 0x183   :  { %6503 = vmatprep.subr.bf16.mxu1 %v10045_v40  ;;  %5885 = vmatprep.mubr.f32.mxu0 %v8870_v33  ;;  %v443_v40 = vadd.f32 %v8708_v1, %v8715_v0  ;;  %v4978_v1 = vpop.f32.mrb[32].mxu1  ;;  %v5152_v14 = vpop.f32.mrb[36].mxu0 }
 0x184   :  { %6535 = vmatprep.subr.bf16.mxu0 %v8878_v18  ;;  %5886 = vmatmul.mubr.f32.gmra.mrb[130].mxu0 %v8892_v59  ;;  %v4979_v7 = vpop.f32.mrb[33].mxu1 }
 0x185   :  { %3583 = vmatmul.mubr.f32.gmra.mrb[136].mxu1 %v10076_v35  ;;  %v724_v0 = vadd.f32 %v4889_v56, %v443_v40  ;;  %5888 = vmatprep.mubr.f32.mxu0 %v8900_v16  ;;  %v4981_v23 = vpop.f32.mrb[34].mxu1  ;;  %v10089_v35 = vld [vmem:[#allocation79_spill] sm:$0xff]  ;;  %v5153_v40 = vpop.f32.mrb[37].mxu0  ;;  %v4070_v56 = vand.u32 4294901760, %v8863_v15 }
 0x186   :  { %6505 = vmatpush3.bf16.msra.mxu1 %v10048_v19  ;;  %3590 = vmatprep.mubr.f32.mxu1 %v10077_v54  ;;  %v4980_v19 = vadd.f32 %v4979_v7, %v4978_v1  ;;  %v4982_v22 = vpop.f32.mrb[35].mxu1  ;;  %v8957_v43 = vadd.f32 %v5153_v40, %v5152_v14  ;;  %v10090_v7 = vld [vmem:[#allocation54_spill] sm:$0xff]  ;;  %v4120_v40 = vand.u32 4294901760, %v8924_v62 }
 0x187   :  { %6507 = vmatprep.subr.bf16.mxu1 %v10049_v63  ;;  %v10078_v63 = vand.u32 4294901760, %v10017_v34  ;;  %v8932_v17 = vadd.f32 %v10081_v24, %v724_v0  ;;  %v4983_v51 = vadd.f32 %v4982_v22, %v4981_v23  ;;  %v4984_v9 = vpop.f32.mrb[36].mxu1  ;;  %v4080_v0 = vand.u32 4294901760, %v8870_v33 }
 0x188   :  { %5889 = vmatmul.mubr.f32.gmra.mrb[132].mxu0 %v8917_v25  ;;  %v1033_v34 = vadd.f32 %v4980_v19, %v8750_v60  ;;  %v4985_v1 = vpop.f32.mrb[37].mxu1 }
 0x189   :  { %3594 = vmatmul.mubr.f32.gmra.mrb[138].mxu1 %v10078_v63  ;;  %5891 = vmatprep.mubr.f32.mxu0 %v8924_v62  ;;  %v1044_v54 = vadd.f32 %v4983_v51, %v8782_v39  ;;  %v10091_v63 = vand.u32 4294901760, %v10090_v7  ;;  %v4986_v19 = vadd.f32 %v4985_v1, %v4984_v9  ;;  %v10095_v51 = vld [vmem:[#allocation15_spill] sm:$0xff]  ;;  %v10097_v9 = vld [vmem:[#allocation49_spill] sm:$0xff]  ;;  %v10098_v7 = vld [vmem:[#allocation22_spill] sm:$0xff] }
 0x18a   :  { %6509 = vmatpush3.bf16.msra.mxu1 %v10053_v6  ;;  %3601 = vmatprep.mubr.f32.mxu1 %v10080_v28  ;;  %v8941_v6 = vadd.f32 %v5150_v52, %v5149_v5  ;;  %v8951_v60 = vadd.f32 %v10088_v48, %v1033_v34  ;;  %v5155_v28 = vpop.f32.mrb[38].mxu0  ;;  %v10093_v5 = vld [vmem:[#allocation55_spill] sm:$0xff]  ;;  %v4987_v34 = vpop.f32.mrb[38].mxu1 }
 0x18b   :  { %6511 = vmatprep.subr.bf16.mxu1 %v10082_v21  ;;  %v8967_v39 = vadd.f32 %v10093_v5, %v1044_v54  ;;  %v5156_v24 = vpop.f32.mrb[39].mxu0  ;;  %v4090_v21 = vand.u32 4294901760, %v8892_v59  ;;  %v1055_v52 = vadd.f32 %v4986_v19, %v8811_v30  ;;  %v4988_v22 = vpop.f32.mrb[39].mxu1 }
 0x18c   :  { %5892 = vmatmul.mubr.f32.gmra.mrb[134].mxu0 %v8938_v57  ;;  %v8974_v23 = vadd.f32 %v5156_v24, %v5155_v28  ;;  %v5158_v30 = vpop.f32.mrb[40].mxu0  ;;  %v4990_v48 = vpop.f32.mrb[40].mxu1 }
 0x18d   :  { %3605 = vmatmul.mubr.f32.gmra.mrb[140].mxu1 %v10084_v4  ;;  %5898 = vmatprep.mubr.f32.mxu0 %v4060_v8  ;;  %v4989_v4 = vadd.f32 %v4988_v22, %v4987_v34  ;;  %v4991_v54 = vpop.f32.mrb[41].mxu1  ;;  %v10099_v34 = vld [vmem:[#allocation74_spill] sm:$0xff] }
 0x18e   :  { %6513 = vmatpush3.bf16.msra.mxu1 %v10085_v41  ;;  %3612 = vmatprep.mubr.f32.mxu1 %v10087_v11  ;;  %v10096_v41 = vld [vmem:[#allocation83_spill] sm:$0xff]  ;;  %v4110_v11 = vand.u32 4294901760, %v8917_v25  ;;  %v4992_v1 = vadd.f32 %v4991_v54, %v4990_v48  ;;  %v10102_v54 = vld [vmem:[#allocation28_spill] sm:$0xff] }
 0x18f   :  { %6515 = vmatprep.subr.bf16.mxu1 %v10089_v35  ;;  %v8985_v27 = vadd.f32 %v10096_v41, %v1055_v52  ;;  %v1066_v14 = vadd.f32 %v4989_v4, %v8835_v13  ;;  %v4130_v13 = vand.u32 4294901760, %v8938_v57  ;;  %v4993_v5 = vpop.f32.mrb[42].mxu1 }
 0x190   :  { %5899 = vmatmul.mubr.f32.vlgmr.msra.gmra.mrb[128].mxu0 %v4070_v56  ;;  %v1077_v28 = vadd.f32 %v4992_v1, %v8857_v55  ;;  %v4994_v52 = vpop.f32.mrb[43].mxu1 }
 0x191   :  { %3616 = vmatmul.mubr.f32.gmra.mrb[142].mxu1 %v10091_v63  ;;  %6537 = vmatpush3.bf16.msra.mxu0 %v8878_v18  ;;  %v5159_v18 = vpop.f32.mrb[41].mxu0  ;;  %v8999_v19 = vadd.f32 %v8789_v12, %v1066_v14  ;;  %v4995_v22 = vadd.f32 %v4994_v52, %v4993_v5  ;;  %v10100_v12 = vld [vmem:[#allocation78_spill] sm:$0xff]  ;;  %v10101_v14 = vld [vmem:[#allocation27_spill] sm:$0xff] }
 0x192   :  { %6517 = vmatpush3.bf16.msra.mxu1 %v10064_v46  ;;  %3935 = vmatprep.mubr.f32.mxu1 %v10092_v49  ;;  %v4100_v46 = vand.u32 4294901760, %v8900_v16  ;;  %v8991_v35 = vadd.f32 %v5159_v18, %v5158_v30  ;;  %v5161_v63 = vpop.f32.mrb[42].mxu0  ;;  %v9012_v4 = vadd.f32 %v8818_v45, %v1077_v28  ;;  %v10103_v28 = vld [vmem:[#allocation30_spill] sm:$0xff] }
 0x193   :  { %6519 = vmatprep.subr.bf16.mxu1 %v8770_v32  ;;  %5901 = vmatprep.mubr.f32.mxu0 %v4080_v0  ;;  %v5162_v49 = vpop.f32.mrb[43].mxu0  ;;  %v1088_v55 = vadd.f32 %v4995_v22, %v8886_v31  ;;  %v4996_v30 = vpop.f32.mrb[44].mxu1  ;;  %v10104_v52 = vld [vmem:[#allocation34_spill] sm:$0xff] }
 0x194   :  { %6539 = vmatprep.subr.bf16.mxu0 %v8770_v32  ;;  %5902 = vmatmul.mubr.f32.gmra.mrb[130].mxu0 %v4090_v21  ;;  %v9005_v24 = vadd.f32 %v5162_v49, %v5161_v63  ;;  %v4997_v18 = vpop.f32.mrb[45].mxu1 }
 0x195   :  { %3937 = vmatmul.mubr.f32.vlgmr.msra.gmra.mrb[144].mxu1 %v10094_v53  ;;  %5904 = vmatprep.mubr.f32.mxu0 %v4100_v46  ;;  %v5164_v53 = vpop.f32.mrb[44].mxu0  ;;  %v4998_v48 = vadd.f32 %v4997_v18, %v4996_v30  ;;  %v9023_v45 = vadd.f32 %v8842_v29, %v1088_v55  ;;  %v10106_v30 = vld [vmem:[#allocation42_spill] sm:$0xff] }
 0x196   :  { %6521 = vmatpush3.bf16.msra.mxu1 %v8770_v32  ;;  %3942 = vmatprep.mubr.f32.mxu1 %v10095_v51  ;;  %v5165_v51 = vpop.f32.mrb[45].mxu0 }
 0x197   :  { %v9017_v41 = vadd.f32 %v5165_v51, %v5164_v53  ;;  %v1099_v31 = vadd.f32 %v4998_v48, %v8911_v61  ;;  %v10105_v51 = vld [vmem:[#allocation38_spill] sm:$0xff] }
 0x198   :  { %5905 = vmatmul.mubr.f32.gmra.mrb[132].mxu0 %v4110_v11 }
 0x199   :  { %3944 = vmatmul.mubr.f32.gmra.mrb[146].mxu1 %v10097_v9  ;;  %5907 = vmatprep.mubr.f32.mxu0 %v4120_v40  ;;  %v5167_v9 = vpop.f32.mrb[46].mxu0 }
 0x19a   :  { %3949 = vmatprep.mubr.f32.mxu1 %v10098_v7  ;;  %v5168_v1 = vpop.f32.mrb[47].mxu0  ;;  %v4999_v7 = vpop.f32.mrb[46].mxu1 }
 0x19b   :  { %v9027_v63 = vadd.f32 %v5168_v1, %v5167_v9  ;;  %v5000_v49 = vpop.f32.mrb[47].mxu1  ;;  %v5258_v29 = vpop.f32.mrb[48].mxu0 }
 0x19c   :  { %5908 = vmatmul.mubr.f32.gmra.mrb[134].mxu0 %v4130_v13  ;;  %v5001_v5 = vadd.f32 %v5000_v49, %v4999_v7  ;;  %v5259_v22 = vpop.f32.mrb[49].mxu0 }
 0x19d   :  { %3951 = vmatmul.mubr.f32.gmra.mrb[148].mxu1 %v10099_v34  ;;  %5914 = vmatprep.mubr.f32.mxu0 %v8736_v38  ;;  %v9034_v34 = vadd.f32 %v8865_v44, %v1099_v31  ;;  %v9038_v53 = vadd.f32 %v5259_v22, %v5258_v29  ;;  %v5261_v18 = vpop.f32.mrb[50].mxu0  ;;  %v4061_v44 = vsub.f32 %v8847_v42, %v4060_v8  ;;  %v10107_v31 = vld [vmem:[#allocation44_spill] sm:$0xff] }
 0x19e   :  { %3956 = vmatprep.mubr.f32.mxu1 %v10100_v12  ;;  %v1110_v61 = vadd.f32 %v5001_v5, %v8932_v17  ;;  %v5090_v12 = vpop.f32.mrb[48].mxu1  ;;  %v5262_v17 = vpop.f32.mrb[51].mxu0  ;;  %v4071_v42 = vsub.f32 %v8863_v15, %v4070_v56 }
 0x19f   :  { %v9051_v9 = vadd.f32 %v5262_v17, %v5261_v18  ;;  %v5264_v7 = vpop.f32.mrb[52].mxu0  ;;  %v4062_v49 = vand.u32 4294901760, %v4061_v44 }
 0x1a0   :  { %5915 = vmatmul.mubr.f32.vlgmr.msra.gmra.mrb[128].mxu0 %v8755_v58  ;;  %v5265_v5 = vpop.f32.mrb[53].mxu0  ;;  %v4072_v56 = vand.u32 4294901760, %v4071_v42 }
 0x1a1   :  { %3958 = vmatmul.mubr.f32.gmra.mrb[150].mxu1 %v10101_v14  ;;  %6541 = vmatpush3.bf16.msra.mxu0 %v8770_v32  ;;  %v5091_v32 = vpop.f32.mrb[49].mxu1  ;;  %v9047_v14 = vadd.f32 %v8894_v2, %v1110_v61  ;;  %v10108_v2 = vld [vmem:[#allocation46_spill] sm:$0xff]  ;;  %v9067_v22 = vadd.f32 %v5265_v5, %v5264_v7 }
 0x1a2   :  { %3963 = vmatprep.mubr.f32.mxu1 %v10102_v54  ;;  %5917 = vmatprep.mubr.f32.mxu0 %v8761_v50  ;;  %v5092_v55 = vadd.f32 %v5091_v32, %v5090_v12  ;;  %v5093_v54 = vpop.f32.mrb[50].mxu1 }
 0x1a3   :  { %v5094_v1 = vpop.f32.mrb[51].mxu1 }
 0x1a4   :  { %5918 = vmatmul.mubr.f32.gmra.mrb[130].mxu0 %v8787_v3  ;;  %v1431_v48 = vadd.f32 %v5092_v55, %v8951_v60  ;;  %v5095_v8 = vadd.f32 %v5094_v1, %v5093_v54  ;;  %v4081_v60 = vsub.f32 %v8870_v33, %v4080_v0  ;;  %v5096_v29 = vpop.f32.mrb[52].mxu1  ;;  %v4091_v33 = vsub.f32 %v8892_v59, %v4090_v21  ;;  %v5267_v0 = vpop.f32.mrb[54].mxu0 }
 0x1a5   :  { %3965 = vmatmul.mubr.f32.gmra.mrb[152].mxu1 %v10103_v28  ;;  %5920 = vmatprep.mubr.f32.mxu0 %v8794_v20  ;;  %v5097_v15 = vpop.f32.mrb[53].mxu1 }
 0x1a6   :  { %3970 = vmatprep.mubr.f32.mxu1 %v10104_v52  ;;  %v9063_v28 = vadd.f32 %v8919_v10, %v1431_v48  ;;  %v1438_v52 = vadd.f32 %v5095_v8, %v8967_v39  ;;  %v5098_v10 = vadd.f32 %v5097_v15, %v5096_v29  ;;  %v4082_v61 = vand.u32 4294901760, %v4081_v60 }
 0x1a7   :  { %v4101_v39 = vsub.f32 %v8900_v16, %v4100_v46  ;;  %v4092_v21 = vand.u32 4294901760, %v4091_v33  ;;  %v4111_v16 = vsub.f32 %v8917_v25, %v4110_v11 }
 0x1a8   :  { %5921 = vmatmul.mubr.f32.gmra.mrb[132].mxu0 %v8816_v36  ;;  %v9078_v12 = vadd.f32 %v8941_v6, %v1438_v52  ;;  %v5099_v32 = vpop.f32.mrb[54].mxu1 }
 0x1a9   :  { %3972 = vmatmul.mubr.f32.gmra.mrb[154].mxu1 %v10105_v51  ;;  %5923 = vmatprep.mubr.f32.mxu0 %v8822_v37  ;;  %v5100_v59 = vpop.f32.mrb[55].mxu1  ;;  %v4102_v55 = vand.u32 4294901760, %v4101_v39  ;;  %v4112_v11 = vand.u32 4294901760, %v4111_v16 }
 0x1aa   :  { %3977 = vmatprep.mubr.f32.mxu1 %v10106_v30  ;;  %v5101_v46 = vadd.f32 %v5100_v59, %v5099_v32 }
 0x1ac   :  { %5924 = vmatmul.mubr.f32.gmra.mrb[134].mxu0 %v8840_v26  ;;  %v5102_v18 = vpop.f32.mrb[56].mxu1 }
 0x1ad   :  { %3979 = vmatmul.mubr.f32.gmra.mrb[156].mxu1 %v10107_v31  ;;  %5930 = vmatprep.mubr.f32.mxu0 %v8736_v38  ;;  %v5268_v38 = vpop.f32.mrb[55].mxu0  ;;  %v5103_v25 = vpop.f32.mrb[57].mxu1 }
 0x1ae   :  { %3984 = vmatprep.mubr.f32.mxu1 %v10108_v2  ;;  %v9082_v51 = vadd.f32 %v5268_v38, %v5267_v0  ;;  %v5270_v6 = vpop.f32.mrb[56].mxu0 }
 0x1af   :  { %v5271_v30 = vpop.f32.mrb[57].mxu0 }
 0x1b0   :  { %5931 = vmatmul.mubr.f32.vlgmr.msra.gmra.mrb[128].mxu0 %v8755_v58  ;;  %v4121_v58 = vsub.f32 %v8924_v62, %v4120_v40  ;;  %v9096_v44 = vadd.f32 %v5271_v30, %v5270_v6  ;;  %v4131_v62 = vsub.f32 %v8938_v57, %v4130_v13  ;;  %v5104_v40 = vadd.f32 %v5103_v25, %v5102_v18 }
 0x1b1   :  { %3986 = vmatmul.mubr.f32.gmra.mrb[158].mxu1 %v10060_v47  ;;  %v1445_v47 = vadd.f32 %v5098_v10, %v8985_v27  ;;  %5933 = vmatprep.mubr.f32.mxu0 %v8761_v50  ;;  %v1452_v50 = vadd.f32 %v5101_v46, %v8999_v19 }
 0x1b2   :  { %5850 = vmatprep.mubr.f32.mxu1 %v4062_v49  ;;  %v4122_v17 = vand.u32 4294901760, %v4121_v58  ;;  %v1459_v48 = vadd.f32 %v5104_v40, %v9012_v4  ;;  %v4132_v57 = vand.u32 4294901760, %v4131_v62 }
 0x1b3   :  { %v9092_v27 = vadd.f32 %v8957_v43, %v1445_v47  ;;  %v5273_v43 = vpop.f32.mrb[58].mxu0 }
 0x1b4   :  { %5934 = vmatmul.mubr.f32.gmra.mrb[130].mxu0 %v8787_v3  ;;  %v9103_v3 = vadd.f32 %v8974_v23, %v1452_v50  ;;  %v5274_v19 = vpop.f32.mrb[59].mxu0  ;;  %v1652_v42 = vadd.f32 %v8991_v35, %v1459_v48 }
 0x1b5   :  { %5851 = vmatmul.mubr.f32.vlgmr.msra.gmra.mrb[160].mxu1 %v4072_v56  ;;  %5936 = vmatprep.mubr.f32.mxu0 %v8794_v20  ;;  %v5105_v20 = vpop.f32.mrb[58].mxu1  ;;  %v9107_v54 = vadd.f32 %v5274_v19, %v5273_v43  ;;  %v5276_v31 = vpop.f32.mrb[60].mxu0 }
 0x1b6   :  { %5853 = vmatprep.mubr.f32.mxu1 %v4082_v61  ;;  %v5106_v1 = vpop.f32.mrb[59].mxu1  ;;  %v5277_v23 = vpop.f32.mrb[61].mxu0 }
 0x1b7   :  { %v5107_v13 = vadd.f32 %v5106_v1, %v5105_v20  ;;  %v5108_v8 = vpop.f32.mrb[60].mxu1  ;;  %v9113_v4 = vadd.f32 %v5277_v23, %v5276_v31 }
 0x1b8   :  { %5937 = vmatmul.mubr.f32.gmra.mrb[132].mxu0 %v8816_v36  ;;  %v5109_v2 = vpop.f32.mrb[61].mxu1 }
 0x1b9   :  { %5854 = vmatmul.mubr.f32.gmra.mrb[162].mxu1 %v4092_v21  ;;  %5939 = vmatprep.mubr.f32.mxu0 %v8822_v37  ;;  %v1466_v36 = vadd.f32 %v5107_v13, %v9023_v45  ;;  %v5110_v7 = vadd.f32 %v5109_v2, %v5108_v8  ;;  %v5279_v37 = vpop.f32.mrb[62].mxu0  ;;  %v5111_v52 = vpop.f32.mrb[62].mxu1 }
 0x1ba   :  { %5856 = vmatprep.mubr.f32.mxu1 %v4102_v55  ;;  %v5280_v60 = vpop.f32.mrb[63].mxu0  ;;  %v5112_v35 = vpop.f32.mrb[63].mxu1 }
 0x1bb   :  { %v1667_v49 = vadd.f32 %v9005_v24, %v1466_v36  ;;  %v1473_v5 = vadd.f32 %v5110_v7, %v9034_v34  ;;  %v9117_v29 = vadd.f32 %v5280_v60, %v5279_v37  ;;  %v5113_v15 = vadd.f32 %v5112_v35, %v5111_v52 }
 0x1bc   :  { %5940 = vmatmul.mubr.f32.gmra.mrb[134].mxu0 %v8840_v26  ;;  %v5370_v26 = vpop.f32.mrb[64].mxu0  ;;  %v5202_v10 = vpop.f32.mrb[64].mxu1 }
 0x1bd   :  { %5857 = vmatmul.mubr.f32.gmra.mrb[164].mxu1 %v4112_v11  ;;  %v1682_v45 = vadd.f32 %v9017_v41, %v1473_v5  ;;  %v5371_v56 = vpop.f32.mrb[65].mxu0  ;;  %v1480_v33 = vadd.f32 %v5113_v15, %v9047_v14  ;;  %v5203_v61 = vpop.f32.mrb[65].mxu1 }
 0x1be   :  { %5859 = vmatprep.mubr.f32.mxu1 %v4122_v17  ;;  %v9121_v0 = vadd.f32 %v5371_v56, %v5370_v26  ;;  %v5204_v39 = vadd.f32 %v5203_v61, %v5202_v10  ;;  %v5373_v24 = vpop.f32.mrb[66].mxu0 }
 0x1bf   :  { %v1697_v38 = vadd.f32 %v9027_v63, %v1480_v33  ;;  %v5374_v34 = vpop.f32.mrb[67].mxu0 }
 0x1c0   :  { %v1929_v47 = vadd.f32 %v5204_v39, %v9063_v28  ;;  %v5205_v32 = vpop.f32.mrb[66].mxu1  ;;  %v9125_v59 = vadd.f32 %v5374_v34, %v5373_v24  ;;  %v5376_v41 = vpop.f32.mrb[68].mxu0 }
 0x1c1   :  { %5860 = vmatmul.mubr.f32.gmra.mrb[166].mxu1 %v4132_v57  ;;  %v5206_v21 = vpop.f32.mrb[67].mxu1  ;;  %v5377_v14 = vpop.f32.mrb[69].mxu0 }
 0x1c2   :  { %v5207_v16 = vadd.f32 %v5206_v21, %v5205_v32  ;;  %v2116_v46 = vadd.f32 %v9038_v53, %v1929_v47  ;;  %v9129_v58 = vadd.f32 %v5377_v14, %v5376_v41 }
 0x1c3   :  { %v5379_v63 = vpop.f32.mrb[70].mxu0 }
 0x1c4   :  { %v1936_v6 = vadd.f32 %v5207_v16, %v9078_v12  ;;  %v5208_v55 = vpop.f32.mrb[68].mxu1  ;;  %v5380_v28 = vpop.f32.mrb[71].mxu0 }
 0x1c5   :  { %v5209_v30 = vpop.f32.mrb[69].mxu1  ;;  %v9133_v62 = vadd.f32 %v5380_v28, %v5379_v63 }
 0x1c6   :  { %v5210_v50 = vadd.f32 %v5209_v30, %v5208_v55  ;;  %v2125_v18 = vadd.f32 %v9051_v9, %v1936_v6 }
 0x1c8   :  { %v1943_v25 = vadd.f32 %v5210_v50, %v9092_v27  ;;  %v5211_v11 = vpop.f32.mrb[70].mxu1 }
 0x1c9   :  { %v5212_v40 = vpop.f32.mrb[71].mxu1 }
 0x1ca   :  { %v5213_v43 = vadd.f32 %v5212_v40, %v5211_v11  ;;  %v2134_v17 = vadd.f32 %v9067_v22, %v1943_v25 }
 0x1cc   :  { %v5382_v53 = vpop.f32.mrb[72].mxu0  ;;  %v1950_v19 = vadd.f32 %v5213_v43, %v9103_v3 }
 0x1cd   :  { %v5383_v12 = vpop.f32.mrb[73].mxu0  ;;  %v5214_v48 = vpop.f32.mrb[72].mxu1 }
 0x1ce   :  { %v9137_v20 = vadd.f32 %v5383_v12, %v5382_v53  ;;  %v5215_v1 = vpop.f32.mrb[73].mxu1  ;;  %v2143_v13 = vadd.f32 %v9082_v51, %v1950_v19 }
 0x1cf   :  { %v5216_v57 = vadd.f32 %v5215_v1, %v5214_v48 }
 0x1d0   :  { %v5385_v9 = vpop.f32.mrb[74].mxu0 }
 0x1d1   :  { %v5386_v27 = vpop.f32.mrb[75].mxu0  ;;  %v1957_v31 = vadd.f32 %v5216_v57, %v1652_v42  ;;  %v5217_v23 = vpop.f32.mrb[74].mxu1 }
 0x1d2   :  { %v9140_v36 = vadd.f32 %v5386_v27, %v5385_v9  ;;  %v5218_v8 = vpop.f32.mrb[75].mxu1 }
 0x1d3   :  { %v5219_v2 = vadd.f32 %v5218_v8, %v5217_v23  ;;  %v2152_v22 = vadd.f32 %v9096_v44, %v1957_v31 }
 0x1d5   :  { %v5388_v7 = vpop.f32.mrb[76].mxu0  ;;  %v1964_v3 = vadd.f32 %v5219_v2, %v1667_v49 }
 0x1d6   :  { %v5389_v37 = vpop.f32.mrb[77].mxu0  ;;  %v5220_v60 = vpop.f32.mrb[76].mxu1 }
 0x1d7   :  { %v9143_v5 = vadd.f32 %v5389_v37, %v5388_v7  ;;  %v5221_v52 = vpop.f32.mrb[77].mxu1  ;;  %v2161_v51 = vadd.f32 %v9107_v54, %v1964_v3 }
 0x1d8   :  { %v5222_v35 = vadd.f32 %v5221_v52, %v5220_v60 }
 0x1d9   :  { %v5391_v15 = vpop.f32.mrb[78].mxu0 }
 0x1da   :  { %v5392_v26 = vpop.f32.mrb[79].mxu0  ;;  %v1971_v42 = vadd.f32 %v5222_v35, %v1682_v45 }
 0x1db   :  { %v5223_v56 = vpop.f32.mrb[78].mxu1  ;;  %v9146_v33 = vadd.f32 %v5392_v26, %v5391_v15 }
 0x1dc   :  { %v5224_v10 = vpop.f32.mrb[79].mxu1  ;;  %v2170_v44 = vadd.f32 %v9113_v4, %v1971_v42 }
 0x1dd   :  { %v5225_v61 = vadd.f32 %v5224_v10, %v5223_v56 }
 0x1de   :  { %v5482_v39 = vpop.f32.mrb[80].mxu0 }
 0x1df   :  { %v5483_v24 = vpop.f32.mrb[81].mxu0  ;;  %v1978_v49 = vadd.f32 %v5225_v61, %v1697_v38 }
 0x1e0   :  { %v9149_v47 = vadd.f32 %v5483_v24, %v5482_v39 }
 0x1e1   :  { %v5314_v34 = vpop.f32.mrb[80].mxu1  ;;  %v2179_v54 = vadd.f32 %v9117_v29, %v1978_v49 }
 0x1e2   :  { %v5315_v32 = vpop.f32.mrb[81].mxu1 }
 0x1e3   :  { %v5316_v21 = vadd.f32 %v5315_v32, %v5314_v34  ;;  %v5485_v16 = vpop.f32.mrb[82].mxu0 }
 0x1e4   :  { %v5486_v41 = vpop.f32.mrb[83].mxu0 }
 0x1e5   :  { %v2287_v45 = vadd.f32 %v5316_v21, %v2116_v46  ;;  %v9152_v6 = vadd.f32 %v5486_v41, %v5485_v16 }
 0x1e6   :  { %v5317_v14 = vpop.f32.mrb[82].mxu1 }
 0x1e7   :  { %v5318_v55 = vpop.f32.mrb[83].mxu1  ;;  %v2532_v4 = vadd.f32 %v9121_v0, %v2287_v45 }
 0x1e8   :  { %v5319_v30 = vadd.f32 %v5318_v55, %v5317_v14  ;;  %v5488_v50 = vpop.f32.mrb[84].mxu0 }
 0x1e9   :  { %v5489_v63 = vpop.f32.mrb[85].mxu0 }
 0x1ea   :  { %v2298_v38 = vadd.f32 %v5319_v30, %v2125_v18  ;;  %v9155_v25 = vadd.f32 %v5489_v63, %v5488_v50 }
 0x1ec   :  { %v5320_v28 = vpop.f32.mrb[84].mxu1  ;;  %v2539_v29 = vadd.f32 %v9125_v59, %v2298_v38 }
 0x1ed   :  { %v5321_v11 = vpop.f32.mrb[85].mxu1  ;;  %v5491_v43 = vpop.f32.mrb[86].mxu0 }
 0x1ee   :  { %v5322_v40 = vadd.f32 %v5321_v11, %v5320_v28  ;;  %v5492_v53 = vpop.f32.mrb[87].mxu0 }
 0x1ef   :  { %v9158_v19 = vadd.f32 %v5492_v53, %v5491_v43 }
 0x1f0   :  { %v2309_v46 = vadd.f32 %v5322_v40, %v2134_v17 }
 0x1f1   :  { %v5323_v12 = vpop.f32.mrb[86].mxu1  ;;  %v5494_v57 = vpop.f32.mrb[88].mxu0 }
 0x1f2   :  { %v5324_v48 = vpop.f32.mrb[87].mxu1  ;;  %v2546_v0 = vadd.f32 %v9129_v58, %v2309_v46  ;;  %v5495_v9 = vpop.f32.mrb[89].mxu0 }
 0x1f3   :  { %v5325_v1 = vadd.f32 %v5324_v48, %v5323_v12  ;;  %v9161_v31 = vadd.f32 %v5495_v9, %v5494_v57 }
 0x1f5   :  { %v2320_v18 = vadd.f32 %v5325_v1, %v2143_v13  ;;  %v5497_v2 = vpop.f32.mrb[90].mxu0 }
 0x1f6   :  { %v5326_v27 = vpop.f32.mrb[88].mxu1  ;;  %v5498_v7 = vpop.f32.mrb[91].mxu0 }
 0x1f7   :  { %v5327_v23 = vpop.f32.mrb[89].mxu1  ;;  %v2553_v59 = vadd.f32 %v9133_v62, %v2320_v18  ;;  %v9164_v3 = vadd.f32 %v5498_v7, %v5497_v2 }
 0x1f8   :  { %v5328_v8 = vadd.f32 %v5327_v23, %v5326_v27 }
 0x1f9   :  { %v5500_v35 = vpop.f32.mrb[92].mxu0 }
 0x1fa   :  { %v2331_v17 = vadd.f32 %v5328_v8, %v2152_v22  ;;  %v5329_v37 = vpop.f32.mrb[90].mxu1  ;;  %v5501_v15 = vpop.f32.mrb[93].mxu0 }
 0x1fb   :  { %v5330_v60 = vpop.f32.mrb[91].mxu1  ;;  %v9167_v42 = vadd.f32 %v5501_v15, %v5500_v35 }
 0x1fc   :  { %v5331_v52 = vadd.f32 %v5330_v60, %v5329_v37  ;;  %v2560_v58 = vadd.f32 %v9137_v20, %v2331_v17 }
 0x1fd   :  { %v5503_v61 = vpop.f32.mrb[94].mxu0 }
 0x1fe   :  { %v2342_v13 = vadd.f32 %v5331_v52, %v2161_v51  ;;  %v5504_v39 = vpop.f32.mrb[95].mxu0 }
 0x1ff   :  { %v5332_v26 = vpop.f32.mrb[92].mxu1  ;;  %v9170_v49 = vadd.f32 %v5504_v39, %v5503_v61 }
 0x200   :  { %v5333_v56 = vpop.f32.mrb[93].mxu1  ;;  %v2567_v62 = vadd.f32 %v9140_v36, %v2342_v13 }
 0x201   :  { %v5334_v10 = vadd.f32 %v5333_v56, %v5332_v26 }
 0x202   :  { %v5594_v21 = vpop.f32.mrb[96].mxu0 }
 0x203   :  { %v2353_v22 = vadd.f32 %v5334_v10, %v2170_v44  ;;  %v5595_v16 = vpop.f32.mrb[97].mxu0 }
 0x204   :  { %v5335_v24 = vpop.f32.mrb[94].mxu1  ;;  %v9173_v45 = vadd.f32 %v5595_v16, %v5594_v21 }
 0x205   :  { %v5336_v34 = vpop.f32.mrb[95].mxu1  ;;  %v2574_v20 = vadd.f32 %v9143_v5, %v2353_v22 }
 0x206   :  { %v5337_v32 = vadd.f32 %v5336_v34, %v5335_v24  ;;  %v5597_v30 = vpop.f32.mrb[98].mxu0 }
 0x207   :  { %v5598_v50 = vpop.f32.mrb[99].mxu0 }
 0x208   :  { %v2364_v51 = vadd.f32 %v5337_v32, %v2179_v54  ;;  %v5426_v41 = vpop.f32.mrb[96].mxu1  ;;  %v9176_v38 = vadd.f32 %v5598_v50, %v5597_v30 }
 0x209   :  { %v5427_v14 = vpop.f32.mrb[97].mxu1 }
 0x20a   :  { %v5428_v55 = vadd.f32 %v5427_v14, %v5426_v41  ;;  %v2581_v36 = vadd.f32 %v9146_v33, %v2364_v51  ;;  %v5600_v40 = vpop.f32.mrb[100].mxu0 }
 0x20b   :  { %v5601_v43 = vpop.f32.mrb[101].mxu0 }
 0x20c   :  { %v2685_v44 = vadd.f32 %v5428_v55, %v2532_v4  ;;  %v5429_v63 = vpop.f32.mrb[98].mxu1  ;;  %v9179_v46 = vadd.f32 %v5601_v43, %v5600_v40 }
 0x20d   :  { %v5430_v28 = vpop.f32.mrb[99].mxu1 }
 0x20e   :  { %v5431_v11 = vadd.f32 %v5430_v28, %v5429_v63  ;;  %v2846_v5 = vadd.f32 %v9149_v47, %v2685_v44  ;;  %v5603_v1 = vpop.f32.mrb[102].mxu0 }
 0x20f   :  { %v5604_v57 = vpop.f32.mrb[103].mxu0 }
 0x210   :  { %v2692_v54 = vadd.f32 %v5431_v11, %v2539_v29  ;;  %v5432_v53 = vpop.f32.mrb[100].mxu1  ;;  %v9182_v18 = vadd.f32 %v5604_v57, %v5603_v1 }
 0x211   :  { %v5433_v12 = vpop.f32.mrb[101].mxu1 }
 0x212   :  { %v5434_v48 = vadd.f32 %v5433_v12, %v5432_v53  ;;  %v2861_v33 = vadd.f32 %v9152_v6, %v2692_v54  ;;  %v5606_v8 = vpop.f32.mrb[104].mxu0 }
 0x213   :  { %v5607_v2 = vpop.f32.mrb[105].mxu0 }
 0x214   :  { %v2699_v4 = vadd.f32 %v5434_v48, %v2546_v0  ;;  %v5435_v9 = vpop.f32.mrb[102].mxu1  ;;  %v9185_v17 = vadd.f32 %v5607_v2, %v5606_v8 }
 0x215   :  { %v5436_v27 = vpop.f32.mrb[103].mxu1 }
 0x216   :  { %v5437_v23 = vadd.f32 %v5436_v27, %v5435_v9  ;;  %v2876_v47 = vadd.f32 %v9155_v25, %v2699_v4 }
 0x217   :  { %v5609_v52 = vpop.f32.mrb[106].mxu0 }
 0x218   :  { %v2706_v29 = vadd.f32 %v5437_v23, %v2553_v59  ;;  %v5438_v7 = vpop.f32.mrb[104].mxu1  ;;  %v5610_v35 = vpop.f32.mrb[107].mxu0 }
 0x219   :  { %v5439_v37 = vpop.f32.mrb[105].mxu1  ;;  %v9188_v13 = vadd.f32 %v5610_v35, %v5609_v52 }
 0x21a   :  { %v5440_v60 = vadd.f32 %v5439_v37, %v5438_v7  ;;  %v2891_v6 = vadd.f32 %v9158_v19, %v2706_v29 }
 0x21b   :  { %v5612_v10 = vpop.f32.mrb[108].mxu0 }
 0x21c   :  { %v2713_v0 = vadd.f32 %v5440_v60, %v2560_v58  ;;  %v5441_v15 = vpop.f32.mrb[106].mxu1  ;;  %v5613_v61 = vpop.f32.mrb[109].mxu0 }
 0x21d   :  { %v5442_v26 = vpop.f32.mrb[107].mxu1  ;;  %v9191_v22 = vadd.f32 %v5613_v61, %v5612_v10 }
 0x21e   :  { %v5443_v56 = vadd.f32 %v5442_v26, %v5441_v15  ;;  %v2906_v25 = vadd.f32 %v9161_v31, %v2713_v0 }
 0x21f   :  { %v5615_v32 = vpop.f32.mrb[110].mxu0 }
 0x220   :  { %v2720_v59 = vadd.f32 %v5443_v56, %v2567_v62  ;;  %v5444_v39 = vpop.f32.mrb[108].mxu1  ;;  %v5616_v21 = vpop.f32.mrb[111].mxu0 }
 0x221   :  { %v5445_v24 = vpop.f32.mrb[109].mxu1  ;;  %v9194_v51 = vadd.f32 %v5616_v21, %v5615_v32 }
 0x222   :  { %v5446_v34 = vadd.f32 %v5445_v24, %v5444_v39  ;;  %v2921_v19 = vadd.f32 %v9164_v3, %v2720_v59 }
 0x223   :  { %v5706_v55 = vpop.f32.mrb[112].mxu0 }
 0x224   :  { %v2727_v58 = vadd.f32 %v5446_v34, %v2574_v20  ;;  %v5447_v16 = vpop.f32.mrb[110].mxu1  ;;  %v5707_v30 = vpop.f32.mrb[113].mxu0 }
 0x225   :  { %v5448_v41 = vpop.f32.mrb[111].mxu1  ;;  %v9197_v44 = vadd.f32 %v5707_v30, %v5706_v55 }
 0x226   :  { %v5449_v14 = vadd.f32 %v5448_v41, %v5447_v16  ;;  %v2936_v31 = vadd.f32 %v9167_v42, %v2727_v58 }
 0x227   :  { %v5709_v11 = vpop.f32.mrb[114].mxu0 }
 0x228   :  { %v2734_v62 = vadd.f32 %v5449_v14, %v2581_v36  ;;  %v5538_v50 = vpop.f32.mrb[112].mxu1  ;;  %v5710_v40 = vpop.f32.mrb[115].mxu0 }
 0x229   :  { %v5539_v63 = vpop.f32.mrb[113].mxu1  ;;  %v9200_v54 = vadd.f32 %v5710_v40, %v5709_v11 }
 0x22a   :  { %v5540_v28 = vadd.f32 %v5539_v63, %v5538_v50  ;;  %v2951_v3 = vadd.f32 %v9170_v49, %v2734_v62 }
 0x22b   :  { %v5712_v48 = vpop.f32.mrb[116].mxu0 }
 0x22c   :  { %v3183_v20 = vadd.f32 %v5540_v28, %v2846_v5  ;;  %v5541_v43 = vpop.f32.mrb[114].mxu1  ;;  %v5713_v1 = vpop.f32.mrb[117].mxu0 }
 0x22d   :  { %v5542_v53 = vpop.f32.mrb[115].mxu1  ;;  %v9203_v4 = vadd.f32 %v5713_v1, %v5712_v48 }
 0x22e   :  { %v5543_v12 = vadd.f32 %v5542_v53, %v5541_v43  ;;  %v3370_v42 = vadd.f32 %v9173_v45, %v3183_v20 }
 0x22f   :  { %v5715_v23 = vpop.f32.mrb[118].mxu0 }
 0x230   :  { %v3190_v36 = vadd.f32 %v5543_v12, %v2861_v33  ;;  %v5544_v57 = vpop.f32.mrb[116].mxu1  ;;  %v5716_v8 = vpop.f32.mrb[119].mxu0 }
 0x231   :  { %v5545_v9 = vpop.f32.mrb[117].mxu1  ;;  %v5717_v29 = vadd.f32 %v5716_v8, %v5715_v23 }
 0x232   :  { %v5546_v27 = vadd.f32 %v5545_v9, %v5544_v57  ;;  %v3379_v49 = vadd.f32 %v9176_v38, %v3190_v36 }
 0x233   :  { %v5718_v60 = vpop.f32.mrb[120].mxu0 }
 0x234   :  { %v3197_v5 = vadd.f32 %v5546_v27, %v2876_v47  ;;  %v5547_v2 = vpop.f32.mrb[118].mxu1  ;;  %v5719_v45 = vpop.f32.mrb[121].mxu0 }
 0x235   :  { %v5548_v7 = vpop.f32.mrb[119].mxu1  ;;  %v5720_v0 = vadd.f32 %v5719_v45, %v5718_v60 }
 0x236   :  { %v5549_v37 = vadd.f32 %v5548_v7, %v5547_v2  ;;  %v3388_v52 = vadd.f32 %v9179_v46, %v3197_v5 }
 0x237   :  { %v5721_v56 = vpop.f32.mrb[122].mxu0 }
 0x238   :  { %v3204_v35 = vadd.f32 %v5549_v37, %v2891_v6  ;;  %v5550_v33 = vpop.f32.mrb[120].mxu1  ;;  %v5722_v61 = vpop.f32.mrb[123].mxu0 }
 0x239   :  { %v5551_v15 = vpop.f32.mrb[121].mxu1  ;;  %v5723_v47 = vadd.f32 %v5722_v61, %v5721_v56 }
 0x23a   :  { %v5552_v26 = vadd.f32 %v5551_v15, %v5550_v33  ;;  %v3397_v10 = vadd.f32 %v9182_v18, %v3204_v35 }
 0x23b   :  { %v5724_v34 = vpop.f32.mrb[124].mxu0 }
 0x23c   :  { %v3211_v38 = vadd.f32 %v5552_v26, %v2906_v25  ;;  %v5553_v59 = vpop.f32.mrb[122].mxu1  ;;  %v5725_v21 = vpop.f32.mrb[125].mxu0 }
 0x23d   :  { %v5554_v39 = vpop.f32.mrb[123].mxu1  ;;  %v5726_v6 = vadd.f32 %v5725_v21, %v5724_v34 }
 0x23e   :  { %v5555_v24 = vadd.f32 %v5554_v39, %v5553_v59  ;;  %v3406_v32 = vadd.f32 %v9185_v17, %v3211_v38 }
 0x23f   :  { %v5727_v14 = vpop.f32.mrb[126].mxu0 }
 0x240   :  { %v3218_v46 = vadd.f32 %v5555_v24, %v2921_v19  ;;  %v5556_v58 = vpop.f32.mrb[124].mxu1  ;;  %v5728_v30 = vpop.f32.mrb[127].mxu0 }
 0x241   :  { %v5557_v16 = vpop.f32.mrb[125].mxu1  ;;  %v5729_v25 = vadd.f32 %v5728_v30, %v5727_v14 }
 0x242   :  { %v5558_v41 = vadd.f32 %v5557_v16, %v5556_v58  ;;  %v3415_v55 = vadd.f32 %v9188_v13, %v3218_v46 }
 0x244   :  { %v3225_v18 = vadd.f32 %v5558_v41, %v2936_v31  ;;  %v5559_v62 = vpop.f32.mrb[126].mxu1 }
 0x245   :  { %v5560_v50 = vpop.f32.mrb[127].mxu1 }
 0x246   :  { %v5561_v63 = vadd.f32 %v5560_v50, %v5559_v62  ;;  %v3424_v28 = vadd.f32 %v9191_v22, %v3225_v18 }
 0x248   :  { %v3232_v11 = vadd.f32 %v5561_v63, %v2951_v3  ;;  %v5650_v40 = vpop.f32.mrb[128].mxu1 }
 0x249   :  { %v5651_v17 = vpop.f32.mrb[129].mxu1 }
 0x24a   :  { %v5652_v20 = vadd.f32 %v5651_v17, %v5650_v40  ;;  %v3433_v19 = vadd.f32 %v9194_v51, %v3232_v11 }
 0x24c   :  { %v3541_v43 = vadd.f32 %v5652_v20, %v3370_v42  ;;  %v5653_v53 = vpop.f32.mrb[130].mxu1 }
 0x24d   :  { %v5654_v12 = vpop.f32.mrb[131].mxu1 }
 0x24e   :  { %v5655_v48 = vadd.f32 %v5654_v12, %v5653_v53  ;;  %v3786_v13 = vadd.f32 %v9197_v44, %v3541_v43 }
 0x250   :  { %v3552_v1 = vadd.f32 %v5655_v48, %v3379_v49  ;;  %v5656_v31 = vpop.f32.mrb[132].mxu1 }
 0x251   :  { %v5657_v36 = vpop.f32.mrb[133].mxu1 }
 0x252   :  { %v5658_v57 = vadd.f32 %v5657_v36, %v5656_v31  ;;  %v3793_v9 = vadd.f32 %v9200_v54, %v3552_v1 }
 0x254   :  { %v3563_v27 = vadd.f32 %v5658_v57, %v3388_v52  ;;  %v5659_v22 = vpop.f32.mrb[134].mxu1 }
 0x255   :  { %v5660_v3 = vpop.f32.mrb[135].mxu1 }
 0x256   :  { %v5661_v23 = vadd.f32 %v5660_v3, %v5659_v22  ;;  %v3800_v8 = vadd.f32 %v9203_v4, %v3563_v27 }
 0x258   :  { %v3574_v5 = vadd.f32 %v5661_v23, %v3397_v10  ;;  %v5662_v51 = vpop.f32.mrb[136].mxu1 }
 0x259   :  { %v5663_v42 = vpop.f32.mrb[137].mxu1 }
 0x25a   :  { %v5664_v2 = vadd.f32 %v5663_v42, %v5662_v51  ;;  %v3807_v7 = vadd.f32 %v5717_v29, %v3574_v5 }
 0x25c   :  { %v3585_v37 = vadd.f32 %v5664_v2, %v3406_v32  ;;  %v5665_v60 = vpop.f32.mrb[138].mxu1 }
 0x25d   :  { %v5666_v44 = vpop.f32.mrb[139].mxu1 }
 0x25e   :  { %v5667_v49 = vadd.f32 %v5666_v44, %v5665_v60  ;;  %v3814_v45 = vadd.f32 %v5720_v0, %v3585_v37 }
 0x260   :  { %v3596_v35 = vadd.f32 %v5667_v49, %v3415_v55  ;;  %v5668_v33 = vpop.f32.mrb[140].mxu1 }
 0x261   :  { %v5669_v15 = vpop.f32.mrb[141].mxu1 }
 0x262   :  { %v5670_v54 = vadd.f32 %v5669_v15, %v5668_v33  ;;  %v3821_v52 = vadd.f32 %v5723_v47, %v3596_v35 }
 0x264   :  { %v3607_v26 = vadd.f32 %v5670_v54, %v3424_v28  ;;  %v5671_v56 = vpop.f32.mrb[142].mxu1 }
 0x265   :  { %v5672_v61 = vpop.f32.mrb[143].mxu1 }
 0x266   :  { %v5673_v38 = vadd.f32 %v5672_v61, %v5671_v56  ;;  %v3828_v4 = vadd.f32 %v5726_v6, %v3607_v26 }
 0x268   :  { %v3618_v10 = vadd.f32 %v5673_v38, %v3433_v19  ;;  %v5762_v59 = vpop.f32.mrb[144].mxu1 }
 0x269   :  { %v5763_v39 = vpop.f32.mrb[145].mxu1 }
 0x26a   :  { %v5764_v24 = vadd.f32 %v5763_v39, %v5762_v59  ;;  %v3835_v29 = vadd.f32 %v5729_v25, %v3618_v10 }
 0x26c   :  { %v5765_v34 = vpop.f32.mrb[146].mxu1  ;;  %v3939_v32 = vadd.f32 %v5764_v24, %v3786_v13 }
 0x26d   :  { %v5766_v21 = vpop.f32.mrb[147].mxu1 }
 0x26e   :  { %v5767_v46 = vadd.f32 %v5766_v21, %v5765_v34 }
 0x270   :  { %v5768_v0 = vpop.f32.mrb[148].mxu1  ;;  %v3946_v58 = vadd.f32 %v5767_v46, %v3793_v9 }
 0x271   :  { %v5769_v16 = vpop.f32.mrb[149].mxu1 }
 0x272   :  { %v5770_v41 = vadd.f32 %v5769_v16, %v5768_v0 }
 0x274   :  { %v5771_v14 = vpop.f32.mrb[150].mxu1  ;;  %v3953_v47 = vadd.f32 %v5770_v41, %v3800_v8 }
 0x275   :  { %v5772_v55 = vpop.f32.mrb[151].mxu1 }
 0x276   :  { %v5773_v30 = vadd.f32 %v5772_v55, %v5771_v14 }
 0x278   :  { %v5774_v18 = vpop.f32.mrb[152].mxu1  ;;  %v3960_v62 = vadd.f32 %v5773_v30, %v3807_v7 }
 0x279   :  { %v5775_v6 = vpop.f32.mrb[153].mxu1 }
 0x27a   :  { %v5776_v50 = vadd.f32 %v5775_v6, %v5774_v18 }
 0x27c   :  { %v5777_v63 = vpop.f32.mrb[154].mxu1  ;;  %v3967_v28 = vadd.f32 %v5776_v50, %v3814_v45 }
 0x27d   :  { %v5778_v11 = vpop.f32.mrb[155].mxu1 }
 0x27e   :  { %v5779_v25 = vadd.f32 %v5778_v11, %v5777_v63 }
 0x280   :  { %v5780_v40 = vpop.f32.mrb[156].mxu1  ;;  %v3974_v17 = vadd.f32 %v5779_v25, %v3821_v52 }
 0x281   :  { %v5781_v20 = vpop.f32.mrb[157].mxu1 }
 0x282   :  { %v5782_v19 = vadd.f32 %v5781_v20, %v5780_v40 }
 0x283   :  { %v5932_v13 = vpop.f32.mrb[128].mxu0 }
 0x284   :  { %v5783_v43 = vpop.f32.mrb[158].mxu1  ;;  %v3981_v53 = vadd.f32 %v5782_v19, %v3828_v4  ;;  %v4705_v1 = vpop.f32.mrb[129].mxu0 }
 0x285   :  { %v5784_v12 = vpop.f32.mrb[159].mxu1 }
 0x286   :  { %v5785_v48 = vadd.f32 %v5784_v12, %v5783_v43 }
 0x287   :  { %v5935_v22 = vpop.f32.mrb[130].mxu0 }
 0x288   :  { %v5852_v31 = vpop.f32.mrb[160].mxu1  ;;  %v3988_v36 = vadd.f32 %v5785_v48, %v3835_v29  ;;  %v4717_v23 = vpop.f32.mrb[131].mxu0 }
 0x289   :  { %v4075_v57 = vadd.f32 %v5852_v31, %v3946_v58  ;;  %v4064_v9 = vpop.f32.mrb[161].mxu1 }
 0x28a   :  { %v4065_v27 = vadd.f32 %v4064_v9, %v3939_v32 }
 0x28b   :  { %v6543_v3 = vadd.f32 %v5932_v13, %v4075_v57  ;;  %v5938_v7 = vpop.f32.mrb[132].mxu0 }
 0x28c   :  { %v6545_v8 = vadd.f32 %v4705_v1, %v4065_v27  ;;  %v5855_v5 = vpop.f32.mrb[162].mxu1  ;;  %v4729_v60 = vpop.f32.mrb[133].mxu0 }
 0x28d   :  { %4752 = vst [vmem:[#allocation7 + $0x8] sm:$0xff] %v6543_v3  ;;  %v4095_v51 = vadd.f32 %v5855_v5, %v3960_v62  ;;  %v4084_v42 = vpop.f32.mrb[163].mxu1 }
 0x28e   :  { %4751 = vst [vmem:[#allocation7] sm:$0xff] %v6545_v8  ;;  %v4085_v2 = vadd.f32 %v4084_v42, %v3953_v47 }
 0x28f   :  { %v6547_v37 = vadd.f32 %v5935_v22, %v4095_v51  ;;  %v5941_v15 = vpop.f32.mrb[134].mxu0 }
 0x290   :  { %v6549_v44 = vadd.f32 %v4717_v23, %v4085_v2  ;;  %v5858_v49 = vpop.f32.mrb[164].mxu1  ;;  %v4741_v52 = vpop.f32.mrb[135].mxu0 }
 0x291   :  { %4754 = vst [vmem:[#allocation7 + $0x18] sm:$0xff] %v6547_v37  ;;  %v4115_v45 = vadd.f32 %v5858_v49, %v3974_v17  ;;  %v4104_v35 = vpop.f32.mrb[165].mxu1 }
 0x292   :  { %4753 = vst [vmem:[#allocation7 + $0x10] sm:$0xff] %v6549_v44  ;;  %v4105_v33 = vadd.f32 %v4104_v35, %v3967_v28 }
 0x293   :  { %v6551_v54 = vadd.f32 %v5938_v7, %v4115_v45 }
 0x294   :  { %v6553_v26 = vadd.f32 %v4729_v60, %v4105_v33  ;;  %v5861_v56 = vpop.f32.mrb[166].mxu1 }
 0x295   :  { %4756 = vst [vmem:[#allocation7 + $0x28] sm:$0xff] %v6551_v54  ;;  %v4135_v61 = vadd.f32 %v5861_v56, %v3988_v36  ;;  %v4124_v38 = vpop.f32.mrb[167].mxu1 }
 0x296   :  { %4755 = vst [vmem:[#allocation7 + $0x20] sm:$0xff] %v6553_v26  ;;  %v4125_v4 = vadd.f32 %v4124_v38, %v3981_v53 }
 0x297   :  { %v6555_v10 = vadd.f32 %v5941_v15, %v4135_v61 }
 0x298   :  { %v6557_v59 = vadd.f32 %v4741_v52, %v4125_v4 }
 0x299   :  { %4758 = vst [vmem:[#allocation7 + $0x38] sm:$0xff] %v6555_v10 }
 0x29a   :  { %4757 = vst [vmem:[#allocation7 + $0x30] sm:$0xff] %v6557_v59 }
 0x29b   :  { %6652 = shalt.err (!%p6649_p6)
}
 0x29c   :  { %s6653_s17 = scalar_lea.hbm %s9233_s3, 1024 }
 0x29d   :  { %p6654_p7 = scmp.ne.s32.totalorder %s9233_s3, %s6653_s17  ;;  %p6657_p8 = scmp.lt.u32.totalorder %s6653_s17, %s9233_s3 }
 0x29f   :  { %p6659_p9 = pnand %p6657_p8, %p6654_p7 }
 0x2a1   :  { %6662 = shalt.err (!%p6659_p9)
}
 0x2a2   :  { %4770 = dma.vmem_to_hbm [thread:$0]  %s4765_s13, 1024, %s9233_s3, [#allocation4], %s6673_s0, %s6673_s0, %s6674_s9  }
 0x2a3   :  { %6667 = dma.done.wait [#allocation4], 1024  }
 0x2a4   :  { %6668 = vsyncadd [#allocation4], 4294966272 }
 0x2a5   :  { %4774 = vsyncpa [#allocation3], 1 }
 0x2a6   :  { %4775 = vsyncpa [#allocation6], 1 }
 0x2a7   :  { %4776 = vsyncpa [#allocation4], 1 }

</bundles_post_ra>
